<compile_context>
chip_gen: v6e
topology: v6e:2x2x1
jax: 0.10.0
libtpu: 0.0.40
codegen_flags: <defaults>
</compile_context>

<pallas_src>
import jax
import jax.numpy as jnp
from jax.experimental import pallas as pl
from jax.experimental.pallas import tpu as pltpu


def _round_up(a, b):
    return (a + b - 1) // b * b


def _upsample_nearest2x_kernel(x_ref, o_ref):
    """x_ref: (TB, TH, W) VMEM tile.  o_ref: (TB, TH, 4W) view of (.., 2TH, 2W)."""
    x = x_ref[...]
    w = x.shape[-1]
    xw = jnp.repeat(x, 2, axis=2)              # width (lane) repeat -> (TB, TH, 2W)
    # Row duplication is pure addressing: the two halves of the 4W output chunk
    # are output rows 2i and 2i+1, both equal to the width-repeated input row.
    o_ref[:, :, pl.ds(0, 2 * w)] = xw
    o_ref[:, :, pl.ds(2 * w, 2 * w)] = xw


def _vmem_capacity_bytes():
    try:
        info = pltpu.get_tpu_info()
        cap = getattr(info, "vmem_capacity_bytes", None)
        if cap:
            return int(cap)
    except Exception:
        pass
    return 64 << 20  # conservative default (v7x-sized VMEM)


def _num_tensorcores():
    """Best-effort TensorCores-per-device (2 on v7x, 1 on v5e/v6e)."""
    try:
        info = pltpu.get_tpu_info()
        for name in ("num_cores", "tensorcore_count", "num_tensorcores", "core_count"):
            n = getattr(info, name, None)
            if n:
                return int(n)
    except Exception:
        pass
    try:
        n = getattr(jax.devices()[0], "num_cores", None)
        if n:
            return int(n)
    except Exception:
        pass
    return 1


def _choose_tiles(B, H, W, dtype, step_budget_bytes):
    """Pick (TB, TH) so one grid step's *padded* in+out tiles fit the budget."""
    db = jnp.dtype(dtype).itemsize
    sublane = {4: 8, 2: 16, 1: 32}.get(db, 8)
    in_row = _round_up(W, 128) * db            # padded bytes per input row
    out_row = _round_up(4 * W, 128) * db       # padded bytes per output row-pair
    row_bytes = in_row + out_row

    def slice_bytes(th):
        return _round_up(th, sublane) * row_bytes

    TH = H
    if slice_bytes(H) > step_budget_bytes:
        th = (step_budget_bytes // row_bytes) // sublane * sublane
        th = max(sublane, th)
        if th < H:
            TH = th                            # sublane-multiple H tile
    TB = max(1, step_budget_bytes // max(1, slice_bytes(TH)))
    TB = min(TB, B)
    return TB, TH


def upsample_nearest_2x(x):
    """x: (N, C, H, W) -> (N, C, 2H, 2W), nearest-neighbor, scale_factor=2."""
    N, C, H, W = x.shape
    B = N * C
    dtype_bytes = jnp.dtype(x.dtype).itemsize
    x_flat = x.reshape(B, H, W)

    # Generation-aware sizing: double-buffered in+out tiles <= ~2/3 of the
    # scoped VMEM limit; limit <= ~3/4 of physical VMEM.
    vmem_cap = _vmem_capacity_bytes()
    vmem_limit = min(vmem_cap * 3 // 4, 96 << 20)
    step_budget = min(32 << 20, vmem_limit // 3)

    TB, TH = _choose_tiles(B, H, W, x.dtype, step_budget)

    # Megacore: only force >= 2 grid steps when the chip has >= 2 TensorCores.
    if B > 1 and _num_tensorcores() >= 2:
        if pl.cdiv(B, TB) * pl.cdiv(H, TH) < 2:
            TB = pl.cdiv(B, 2)

    B_pad = pl.cdiv(B, TB) * TB
    H_pad = pl.cdiv(H, TH) * TH
    needs_pad = (B_pad != B) or (H_pad != H)
    if needs_pad:
        x_flat = jnp.pad(x_flat, ((0, B_pad - B), (0, H_pad - H), (0, 0)))

    grid = (B_pad // TB, H_pad // TH)

    out_view = pl.pallas_call(
        _upsample_nearest2x_kernel,
        out_shape=jax.ShapeDtypeStruct((B_pad, H_pad, 4 * W), x.dtype),
        grid_spec=pltpu.PrefetchScalarGridSpec(
            num_scalar_prefetch=0,
            grid=grid,
            in_specs=[pl.BlockSpec((TB, TH, W), lambda i, h: (i, h, 0))],
            out_specs=pl.BlockSpec((TB, TH, 4 * W), lambda i, h: (i, h, 0)),
        ),
        compiler_params=pltpu.CompilerParams(
            dimension_semantics=("parallel", "parallel"),
            vmem_limit_bytes=vmem_limit,
        ),
        cost_estimate=pl.CostEstimate(
            flops=0,
            transcendentals=0,
            # 1x read + 4x write of every (grid-padded) input element.
            bytes_accessed=5 * B_pad * H_pad * W * dtype_bytes,
        ),
    )(x_flat)

    if needs_pad:
        out_view = out_view[:B, :H, :]
    # (B, H, 4W) is bit-identical to (B, 2H, 2W) in row-major order.
    return out_view.reshape(N, C, 2 * H, 2 * W)


if __name__ == "__main__":
    key = jax.random.PRNGKey(0)
    # Small shapes consistent with the module's forward (any NCHW image tensor).
    N, C, H, W = 2, 4, 16, 16
    x = jax.random.normal(key, (N, C, H, W), dtype=jnp.float32)

    out = upsample_nearest_2x(x)
    out = jax.block_until_ready(out)

    # Pure-JAX reference (same semantics as torch.nn.UpsamplingNearest2d(2)).
    ref = jnp.repeat(jnp.repeat(x, 2, axis=2), 2, axis=3)
    assert out.shape == (N, C, 2 * H, 2 * W)
    assert out.dtype == x.dtype
    assert jnp.array_equal(out, ref)

    print("KERNEL_OK")
</pallas_src>

<mosaic_0001>
module attributes {stable_mosaic.version = 11 : i64} {
  func.func @_upsample_nearest2x_kernel(%arg0: i32, %arg1: i32, %arg2: memref<8x16x16xf32, #tpu.memory_space<vmem>>, %arg3: memref<8x16x64xf32, #tpu.memory_space<vmem>>) attributes {dimension_semantics = [#tpu.dimension_semantics<parallel>, #tpu.dimension_semantics<parallel>], iteration_bounds = array<i64: 1, 1>, scalar_prefetch = 0 : i64, scratch_operands = 0 : i64, tpu.core_type = #tpu.core_type<tc>, window_params = [{transform_indices = @transform_0, window_bounds = array<i64: 8, 16, 16>}, {transform_indices = @transform_1, window_bounds = array<i64: 8, 16, 64>}]} {
    %c0 = arith.constant 0 : index
    %c0_0 = arith.constant 0 : index
    %c0_1 = arith.constant 0 : index
    %0 = vector.load %arg2[%c0, %c0_0, %c0_1] : memref<8x16x16xf32, #tpu.memory_space<vmem>>, vector<8x16x16xf32>
    %1 = vector.shape_cast %0 : vector<8x16x16xf32> to vector<8x16x16x1xf32>
    %2 = vector.broadcast %1 : vector<8x16x16x1xf32> to vector<8x16x16x2xf32>
    %3 = vector.shape_cast %2 : vector<8x16x16x2xf32> to vector<8x16x32xf32>
    %c0_2 = arith.constant 0 : index
    %c0_3 = arith.constant 0 : index
    %c0_4 = arith.constant 0 : index
    %4 = vector.load %arg3[%c0_2, %c0_3, %c0_4] : memref<8x16x64xf32, #tpu.memory_space<vmem>>, vector<8x16x32xf32>
    tpu.vector_store %arg3[%c0_2, %c0_3, %c0_4], %3 {strides = array<i32>} : memref<8x16x64xf32, #tpu.memory_space<vmem>>, vector<8x16x32xf32>,
    %c0_5 = arith.constant 0 : index
    %c0_6 = arith.constant 0 : index
    %c32 = arith.constant 32 : index
    %5 = vector.load %arg3[%c0_5, %c0_6, %c32] : memref<8x16x64xf32, #tpu.memory_space<vmem>>, vector<8x16x32xf32>
    tpu.vector_store %arg3[%c0_5, %c0_6, %c32], %3 {strides = array<i32>} : memref<8x16x64xf32, #tpu.memory_space<vmem>>, vector<8x16x32xf32>,
    return
  }
  func.func @transform_0(%arg0: i32, %arg1: i32) -> (i32, i32, i32) {
    %c0_i32 = arith.constant 0 : i32
    %c0_i32_0 = arith.constant 0 : i32
    return %arg0, %arg1, %c0_i32 : i32, i32, i32
  }
  func.func @transform_1(%arg0: i32, %arg1: i32) -> (i32, i32, i32) {
    %c0_i32 = arith.constant 0 : i32
    %c0_i32_0 = arith.constant 0 : i32
    return %arg0, %arg1, %c0_i32 : i32, i32, i32
  }
}

</mosaic_0001>

<bundles_post_ra>
// kernel: tpu_custom_call.1
= control target key start
LH: loop header
LB: loop body
LE: loop exit
PB: predicated region body
PF: predicated region fallthrough
CT: control target
= control target key end

     0   :  { %6 = vsyncpa [#allocation3], 0  ;;  %s11358_s0 = inlined_call_operand.hbm [shape: f32[8,16,16], index: 0, kind: input, shape index: {}]   ;;  %s11359_s1 = inlined_call_operand.hbm [shape: f32[8,16,64], index: 1, kind: output, shape index: {}]  }
   0x1   :  { %7 = vsyncpa [#allocation4], 0  ;;  %s7194_s6 = smov [#allocation2]  }
   0x2   :  { %s13_s7 = sshll.u32 %s7194_s6, 4  ;;  %s14_s7 = int_to_ptr.vmem [resolvable:$true] %s13_s7 }
   0x3   :  { %s7158_s8 = scalar_lea.vmem %s14_s7, 2048  ;;  %p7163_p1 = scmp.lt.s32.totalorder %s14_s7, %s14_s7 }
   0x4   :  { %p7159_p0 = scmp.ne.s32.totalorder %s14_s7, %s7158_s8  ;;  %p7164_p2 = scmp.lt.s32.totalorder %s7158_s8, %s7158_s8 }
   0x6   :  { %p7165_p3 = por %p7164_p2, %p7163_p1 }
   0x8   :  { %p7166_p4 = pnand %p7165_p3, %p7159_p0 }
   0xa   :  { %7169 = shalt.err (!%p7166_p4)
}
   0xb   :  { %s7195_s9 = smov 128   ;;  %s7196_s10 = smov 8  }
   0xc   :  { %19 = dma.hbm_to_vmem [thread:$0]  %s11358_s0, 2048, %s14_s7, [#allocation3], %s7195_s9, %s7195_s9, %s7196_s10  }
   0xd   :  { %7190 = dma.done.wait [#allocation3], 2048  }
   0xe   :  { %7191 = vsyncadd [#allocation3], 4294965248  ;;  %v39_v0 = vlaneseq  ;;  %v23_v4 = vld [vmem:[#allocation2] sm:$0xff]  ;;  %v24_v19 = vld [vmem:[#allocation2 + $0x8] sm:$0xff]  ;;  %v7197_v46 = vmov 1983009808  }
   0xf   :  { %v25_v28 = vld [vmem:[#allocation2 + $0x10] sm:$0xff]  ;;  %v26_v37 = vld [vmem:[#allocation2 + $0x18] sm:$0xff]  ;;  %v1450_v47 = vunpack.c.l.s4 %v7197_v46  ;;  %v7289_v53 = vld [vmem:[#allocation2 + $0x20] sm:$0xff]  ;;  %s7199_s0 = smov 2   ;;  %s7200_s13 = smov 4   ;;  %vm6759_vm0 = vcmask 15360  }
  0x10   :  { %v7231_v1 = vshrl.u32 %v39_v0, 7  ;;  %s7201_s14 = smov 6   ;;  %s7202_s15 = smov 10   ;;  %vm6776_vm1 = vcmask 31744   ;;  %vm6793_vm2 = vcmask 48128   ;;  %vm6810_vm3 = vcmask 64512  }
  0x11   :  { %v1451_v51 = vunpack.c.0.s8 %v1450_v47  ;;  %s7203_s16 = smov 12   ;;  %s7204_s17 = smov 14   ;;  %vm6827_vm4 = vcmask 80896   ;;  %vm6844_vm5 = vcmask 97280   ;;  %vm6861_vm6 = vcmask 113664  }
  0x12   :  { %v7234_v2 = vsub.s32 1, %v7231_v1  ;;  %v7237_v3 = vsub.s32 0, %v7231_v1  ;;  %v7242_v7 = vsub.s32 2, %v7231_v1  ;;  %v7246_v9 = vsub.s32 3, %v7231_v1  ;;  %s7205_s18 = smov 16   ;;  %s7206_s19 = smov 18  }
  0x13   :  { %v7250_v11 = vsub.s32 4, %v7231_v1  ;;  %v7254_v13 = vsub.s32 5, %v7231_v1  ;;  %v7258_v15 = vsub.s32 6, %v7231_v1  ;;  %v7262_v17 = vsub.s32 7, %v7231_v1  ;;  %s7207_s20 = smov 20   ;;  %s7208_s21 = smov 22  }
  0x14   :  { %v53_v5 = vrot.slane %v23_v4, %v7234_v2  ;;  %v42_v6 = vrot.slane %v23_v4, %v7237_v3  ;;  %v64_v8 = vrot.slane %v23_v4, %v7242_v7  ;;  %v75_v10 = vrot.slane %v23_v4, %v7246_v9  ;;  %s7209_s22 = smov 24   ;;  %s7210_s23 = smov 26  }
  0x15   :  { %v86_v12 = vrot.slane %v23_v4, %v7250_v11  ;;  %v97_v14 = vrot.slane %v23_v4, %v7254_v13  ;;  %v108_v16 = vrot.slane %v23_v4, %v7258_v15  ;;  %v119_v18 = vrot.slane %v23_v4, %v7262_v17  ;;  %s7211_s24 = smov 28   ;;  %s7212_s25 = smov 30  }
  0x16   :  { %55 = vbcast.lane.b32.xlu1 %v53_v5, 256  ;;  %44 = vbcast.lane.b32.xlu0 %v42_v6, 256  ;;  %v130_v20 = vrot.slane %v24_v19, %v7237_v3  ;;  %v141_v21 = vrot.slane %v24_v19, %v7234_v2  ;;  %v152_v22 = vrot.slane %v24_v19, %v7242_v7  ;;  %vm6878_vm7 = vcmask 130048   ;;  %s7213_s26 = smov 32   ;;  %s7214_s27 = smov [#allocation5]  }
  0x17   :  { %v163_v23 = vrot.slane %v24_v19, %v7246_v9  ;;  %v174_v24 = vrot.slane %v24_v19, %v7250_v11  ;;  %v185_v25 = vrot.slane %v24_v19, %v7254_v13  ;;  %v196_v26 = vrot.slane %v24_v19, %v7258_v15  ;;  %s7117_s28 = sshll.u32 %s7214_s27, 4  ;;  %s7118_s28 = int_to_ptr.vmem [resolvable:$true] %s7117_s28 }
  0x18   :  { %v207_v27 = vrot.slane %v24_v19, %v7262_v17  ;;  %v218_v29 = vrot.slane %v25_v28, %v7237_v3  ;;  %v229_v30 = vrot.slane %v25_v28, %v7234_v2  ;;  %v240_v31 = vrot.slane %v25_v28, %v7242_v7  ;;  %s7170_s29 = scalar_lea.vmem %s7118_s28, 2048  ;;  %p7175_p6 = scmp.lt.s32.totalorder %s7118_s28, %s7118_s28 }
  0x19   :  { %v251_v32 = vrot.slane %v25_v28, %v7246_v9  ;;  %v262_v33 = vrot.slane %v25_v28, %v7250_v11  ;;  %v273_v34 = vrot.slane %v25_v28, %v7254_v13  ;;  %v284_v35 = vrot.slane %v25_v28, %v7258_v15  ;;  %p7171_p5 = scmp.ne.s32.totalorder %s7118_s28, %s7170_s29  ;;  %p7176_p7 = scmp.lt.s32.totalorder %s7170_s29, %s7170_s29 }
  0x1a   :  { %59 = vbcast.lane.b32.xlu1 %v53_v5, 264  ;;  %48 = vbcast.lane.b32.xlu0 %v42_v6, 264  ;;  %v295_v36 = vrot.slane %v25_v28, %v7262_v17  ;;  %v306_v38 = vrot.slane %v26_v37, %v7237_v3  ;;  %v317_v39 = vrot.slane %v26_v37, %v7234_v2  ;;  %vm6895_vm8 = vcmask 146432  }
  0x1b   :  { %v328_v40 = vrot.slane %v26_v37, %v7242_v7  ;;  %v339_v41 = vrot.slane %v26_v37, %v7246_v9  ;;  %v350_v42 = vrot.slane %v26_v37, %v7250_v11  ;;  %v361_v43 = vrot.slane %v26_v37, %v7254_v13  ;;  %p7177_p8 = por %p7176_p7, %p7175_p6 }
  0x1c   :  { %v372_v48 = vrot.slane %v26_v37, %v7258_v15  ;;  %v383_v52 = vrot.slane %v26_v37, %v7262_v17  ;;  %v7292_v56 = vsub.s32 %v1451_v51, %v7231_v1  ;;  %v394_v59 = vrot.slane %v7289_v53, %v7237_v3 }
  0x1d   :  { %v416_v28 = vrot.slane %v7289_v53, %v7242_v7  ;;  %vm6912_vm9 = vcmask 162816   ;;  %vm6929_vm10 = vcmask 179200   ;;  %vm6946_vm11 = vcmask 195584   ;;  %p7178_p9 = pnand %p7177_p8, %p7171_p5 }
  0x1e   :  { %70 = vbcast.lane.b32.xlu1 %v64_v8, 264  ;;  %66 = vbcast.lane.b32.xlu0 %v64_v8, 256  ;;  %vm6963_vm12 = vcmask 211968   ;;  %vm6980_vm13 = vcmask 228352   ;;  %vm6997_vm14 = vcmask 244736   ;;  %vm7014_vm15 = vcmask 261120  }
  0x22   :  { %81 = vbcast.lane.b32.xlu1 %v75_v10, 264  ;;  %77 = vbcast.lane.b32.xlu0 %v75_v10, 256 }
  0x26   :  { %92 = vbcast.lane.b32.xlu1 %v86_v12, 264  ;;  %88 = vbcast.lane.b32.xlu0 %v86_v12, 256  ;;  %v405_v12 = vrot.slane %v7289_v53, %v7234_v2 }
  0x2a   :  { %103 = vbcast.lane.b32.xlu1 %v97_v14, 264  ;;  %99 = vbcast.lane.b32.xlu0 %v97_v14, 256 }
  0x2e   :  { %114 = vbcast.lane.b32.xlu1 %v108_v16, 264  ;;  %110 = vbcast.lane.b32.xlu0 %v108_v16, 256 }
  0x32   :  { %125 = vbcast.lane.b32.xlu1 %v119_v18, 264  ;;  %121 = vbcast.lane.b32.xlu0 %v119_v18, 256 }
  0x36   :  { %136 = vbcast.lane.b32.xlu1 %v130_v20, 264  ;;  %132 = vbcast.lane.b32.xlu0 %v130_v20, 256 }
  0x3a   :  { %147 = vbcast.lane.b32.xlu1 %v141_v21, 264  ;;  %143 = vbcast.lane.b32.xlu0 %v141_v21, 256 }
  0x3e   :  { %158 = vbcast.lane.b32.xlu1 %v152_v22, 264  ;;  %154 = vbcast.lane.b32.xlu0 %v152_v22, 256 }
  0x42   :  { %169 = vbcast.lane.b32.xlu1 %v163_v23, 264  ;;  %165 = vbcast.lane.b32.xlu0 %v163_v23, 256 }
  0x46   :  { %180 = vbcast.lane.b32.xlu1 %v174_v24, 264  ;;  %176 = vbcast.lane.b32.xlu0 %v174_v24, 256 }
  0x4a   :  { %191 = vbcast.lane.b32.xlu1 %v185_v25, 264  ;;  %187 = vbcast.lane.b32.xlu0 %v185_v25, 256 }
  0x4e   :  { %202 = vbcast.lane.b32.xlu1 %v196_v26, 264  ;;  %198 = vbcast.lane.b32.xlu0 %v196_v26, 256 }
  0x52   :  { %213 = vbcast.lane.b32.xlu1 %v207_v27, 264  ;;  %209 = vbcast.lane.b32.xlu0 %v207_v27, 256 }
  0x56   :  { %224 = vbcast.lane.b32.xlu1 %v218_v29, 264  ;;  %220 = vbcast.lane.b32.xlu0 %v218_v29, 256 }
  0x5a   :  { %235 = vbcast.lane.b32.xlu1 %v229_v30, 264  ;;  %231 = vbcast.lane.b32.xlu0 %v229_v30, 256 }
  0x5e   :  { %246 = vbcast.lane.b32.xlu1 %v240_v31, 264  ;;  %242 = vbcast.lane.b32.xlu0 %v240_v31, 256  ;;  %v7198_v31 = vmov 1934713408  }
  0x62   :  { %257 = vbcast.lane.b32.xlu1 %v251_v32, 264  ;;  %253 = vbcast.lane.b32.xlu0 %v251_v32, 256  ;;  %v1514_v32 = vunpack.c.l.s4 %v7198_v31 }
  0x66   :  { %268 = vbcast.lane.b32.xlu1 %v262_v33, 264  ;;  %264 = vbcast.lane.b32.xlu0 %v262_v33, 256  ;;  %v427_v33 = vrot.slane %v7289_v53, %v7246_v9 }
  0x6a   :  { %279 = vbcast.lane.b32.xlu1 %v273_v34, 264  ;;  %275 = vbcast.lane.b32.xlu0 %v273_v34, 256 }
  0x6e   :  { %290 = vbcast.lane.b32.xlu1 %v284_v35, 264  ;;  %286 = vbcast.lane.b32.xlu0 %v284_v35, 256 }
  0x72   :  { %301 = vbcast.lane.b32.xlu1 %v295_v36, 264  ;;  %297 = vbcast.lane.b32.xlu0 %v295_v36, 256 }
  0x76   :  { %312 = vbcast.lane.b32.xlu1 %v306_v38, 264  ;;  %308 = vbcast.lane.b32.xlu0 %v306_v38, 256  ;;  %v1515_v38 = vunpack.c.0.s8 %v1514_v32 }
  0x7a   :  { %323 = vbcast.lane.b32.xlu1 %v317_v39, 264  ;;  %319 = vbcast.lane.b32.xlu0 %v317_v39, 256  ;;  %v438_v39 = vrot.slane %v7289_v53, %v7250_v11 }
  0x7e   :  { %334 = vbcast.lane.b32.xlu1 %v328_v40, 264  ;;  %330 = vbcast.lane.b32.xlu0 %v328_v40, 256 }
  0x82   :  { %345 = vbcast.lane.b32.xlu1 %v339_v41, 264  ;;  %341 = vbcast.lane.b32.xlu0 %v339_v41, 256 }
  0x86   :  { %356 = vbcast.lane.b32.xlu1 %v350_v42, 264  ;;  %352 = vbcast.lane.b32.xlu0 %v350_v42, 256 }
  0x88   :  { %v56_v44 = vpop.permute.xlu1 %55  ;;  %v45_v45 = vpop.permute.xlu0 %44 }
  0x8a   :  { %367 = vbcast.lane.b32.xlu1 %v361_v43, 264  ;;  %363 = vbcast.lane.b32.xlu0 %v361_v43, 256 }
  0x8c   :  { %v60_v49 = vpop.permute.xlu1 %59  ;;  %v49_v50 = vpop.permute.xlu0 %48 }
  0x8e   :  { %378 = vbcast.lane.b32.xlu1 %v372_v48, 264  ;;  %374 = vbcast.lane.b32.xlu0 %v372_v48, 256 }
  0x90   :  { %v71_v54 = vpop.permute.xlu1 %70  ;;  %v67_v55 = vpop.permute.xlu0 %66 }
  0x91   :  { %v1719_v57 = vcombine.low %v49_v50, %v71_v54  ;;  %v1720_v58 = vcombine.high %v49_v50, %v71_v54  ;;  %v1447_v60 = vcombine.low %v45_v45, %v67_v55  ;;  %v1448_v61 = vcombine.high %v45_v45, %v67_v55 }
  0x92   :  { %389 = vbcast.lane.b32.xlu1 %v383_v52, 264  ;;  %385 = vbcast.lane.b32.xlu0 %v383_v52, 256  ;;  %v7343_v50 = vsub.s32 %v1515_v38, %v7231_v1  ;;  %v449_v52 = vrot.slane %v7289_v53, %v7254_v13 }
  0x93   :  { %v7297_v8 = vrot.slane %v1719_v57, %v7292_v56  ;;  %v7300_v10 = vrot.slane %v1720_v58, %v7292_v56  ;;  %v7317_v20 = vrot.slane %v1447_v60, %v7292_v56  ;;  %v7320_v21 = vrot.slane %v1448_v61, %v7292_v56 }
  0x94   :  { %v82_v62 = vpop.permute.xlu1 %81  ;;  %v78_v63 = vpop.permute.xlu0 %77 }
  0x95   :  { %v1735_v0 = vcombine.low %v60_v49, %v82_v62  ;;  %v1736_v4 = vcombine.high %v60_v49, %v82_v62  ;;  %v1463_v5 = vcombine.low %v56_v44, %v78_v63  ;;  %v1464_v6 = vcombine.high %v56_v44, %v78_v63  ;;  %11769 = vst [vmem:[#allocation8_spill] sm:$0xff] %v7297_v8 }
  0x96   :  { %11770 = vst [vmem:[#allocation9_spill] sm:$0xff] %v7300_v10  ;;  %400 = vbcast.lane.b32.xlu1 %v394_v59, 264  ;;  %396 = vbcast.lane.b32.xlu0 %v394_v59, 256  ;;  %11774 = vst [vmem:[#allocation13_spill] sm:$0xff] %v7320_v21 }
  0x97   :  { %v7305_v14 = vrot.slane %v1735_v0, %v7292_v56  ;;  %v7308_v16 = vrot.slane %v1736_v4, %v7292_v56  ;;  %v7311_v18 = vrot.slane %v1463_v5, %v7292_v56  ;;  %v7314_v19 = vrot.slane %v1464_v6, %v7292_v56 }
  0x98   :  { %v93_v22 = vpop.permute.xlu1 %92  ;;  %v89_v23 = vpop.permute.xlu0 %88  ;;  %v460_v6 = vrot.slane %v7289_v53, %v7258_v15 }
  0x99   :  { %11771 = vst [vmem:[#allocation10_spill] sm:$0xff] %v7305_v14  ;;  %11772 = vst [vmem:[#allocation11_spill] sm:$0xff] %v7308_v16  ;;  %v1784_v24 = vcombine.high %v7297_v8, %v7305_v14  ;;  %v1800_v25 = vcombine.high %v7300_v10, %v7308_v16  ;;  %v1512_v26 = vcombine.high %v7317_v20, %v7311_v18 }
  0x9a   :  { %11773 = vst [vmem:[#allocation12_spill] sm:$0xff] %v7314_v19  ;;  %v1528_v27 = vcombine.high %v7320_v21, %v7314_v19  ;;  %411 = vbcast.lane.b32.xlu1 %v405_v12, 264  ;;  %407 = vbcast.lane.b32.xlu0 %v405_v12, 256  ;;  %v1511_v51 = vcombine.low %v7317_v20, %v7311_v18 }
  0x9b   :  { %v7375_v18 = vrot.slane %v1784_v24, %v7343_v50 }
  0x9c   :  { %v104_v29 = vpop.permute.xlu1 %103  ;;  %v100_v30 = vpop.permute.xlu0 %99  ;;  %v7372_v12 = vrot.slane %v1511_v51, %v7343_v50  ;;  %v7393_v24 = vrot.slane %v1528_v27, %v7343_v50 }
  0x9d   :  { %11782 = vst [vmem:[#allocation21_spill] sm:$0xff] %v7375_v18 }
  0x9e   :  { %422 = vbcast.lane.b32.xlu1 %v416_v28, 264  ;;  %418 = vbcast.lane.b32.xlu0 %v416_v28, 256  ;;  %11781 = vst [vmem:[#allocation20_spill] sm:$0xff] %v7372_v12  ;;  %11786 = vst [vmem:[#allocation25_spill] sm:$0xff] %v7393_v24 }
  0xa0   :  { %v115_v34 = vpop.permute.xlu1 %114  ;;  %v111_v35 = vpop.permute.xlu0 %110 }
  0xa1   :  { %v1751_v36 = vcombine.low %v93_v22, %v115_v34  ;;  %v1752_v37 = vcombine.high %v93_v22, %v115_v34  ;;  %v1479_v42 = vcombine.low %v89_v23, %v111_v35  ;;  %v1480_v43 = vcombine.high %v89_v23, %v111_v35 }
  0xa2   :  { %433 = vbcast.lane.b32.xlu1 %v427_v33, 264  ;;  %429 = vbcast.lane.b32.xlu0 %v427_v33, 256  ;;  %v471_v33 = vrot.slane %v7289_v53, %v7262_v17 }
  0xa3   :  { %v7337_v40 = vrot.slane %v1751_v36, %v7292_v56  ;;  %v7340_v41 = vrot.slane %v1752_v37, %v7292_v56  ;;  %v1487_v1 = vrot.slane %v1479_v42, %v7292_v56  ;;  %v7361_v59 = vrot.slane %v1480_v43, %v7292_v56  ;;  %v7405_v36 = vld [vmem:[#allocation2 + $0x28] sm:$0xff] }
  0xa4   :  { %v126_v44 = vpop.permute.xlu1 %125  ;;  %v122_v45 = vpop.permute.xlu0 %121  ;;  %v7417_v42 = vrot.slane %v1800_v25, %v7343_v50  ;;  %v526_v34 = vrot.slane %v7405_v36, %v7250_v11 }
  0xa5   :  { %11775 = vst [vmem:[#allocation14_spill] sm:$0xff] %v7337_v40  ;;  %11776 = vst [vmem:[#allocation15_spill] sm:$0xff] %v7340_v41  ;;  %v1767_v46 = vcombine.low %v104_v29, %v126_v44  ;;  %v1768_v47 = vcombine.high %v104_v29, %v126_v44  ;;  %v1495_v48 = vcombine.low %v100_v30, %v122_v45 }
  0xa6   :  { %v1496_v49 = vcombine.high %v100_v30, %v122_v45  ;;  %444 = vbcast.lane.b32.xlu1 %v438_v39, 264  ;;  %440 = vbcast.lane.b32.xlu0 %v438_v39, 256  ;;  %11780 = vst [vmem:[#allocation19_spill] sm:$0xff] %v7361_v59  ;;  %v7384_v29 = vrot.slane %v1512_v26, %v7343_v50  ;;  %11787 = vst [vmem:[#allocation26_spill] sm:$0xff] %v7417_v42 }
  0xa7   :  { %v7350_v54 = vrot.slane %v1767_v46, %v7292_v56  ;;  %v7353_v55 = vrot.slane %v1768_v47, %v7292_v56  ;;  %v1503_v57 = vrot.slane %v1495_v48, %v7292_v56  ;;  %v482_v46 = vrot.slane %v7405_v36, %v7237_v3 }
  0xa8   :  { %v7357_v58 = vrot.slane %v1496_v49, %v7292_v56  ;;  %v137_v60 = vpop.permute.xlu1 %136  ;;  %v133_v61 = vpop.permute.xlu0 %132 }
  0xa9   :  { %11777 = vst [vmem:[#allocation16_spill] sm:$0xff] %v7350_v54  ;;  %11778 = vst [vmem:[#allocation17_spill] sm:$0xff] %v7353_v55  ;;  %v1816_v62 = vcombine.high %v7337_v40, %v7350_v54  ;;  %v1832_v63 = vcombine.high %v7340_v41, %v7353_v55  ;;  %v1543_v0 = vcombine.low %v1487_v1, %v1503_v57 }
  0xaa   :  { %11779 = vst [vmem:[#allocation18_spill] sm:$0xff] %v7357_v58  ;;  %v1544_v4 = vcombine.high %v1487_v1, %v1503_v57  ;;  %v1560_v5 = vcombine.high %v7361_v59, %v7357_v58  ;;  %455 = vbcast.lane.b32.xlu1 %v449_v52, 264  ;;  %451 = vbcast.lane.b32.xlu0 %v449_v52, 256 }
  0xab   :  { %v7378_v20 = vrot.slane %v1816_v62, %v7343_v50  ;;  %v7381_v28 = vrot.slane %v1543_v0, %v7343_v50  ;;  %v7420_v43 = vrot.slane %v1832_v63, %v7343_v50 }
  0xac   :  { %v148_v22 = vpop.permute.xlu1 %147  ;;  %v144_v23 = vpop.permute.xlu0 %143  ;;  %v7387_v30 = vrot.slane %v1544_v4, %v7343_v50  ;;  %v7390_v31 = vrot.slane %v1560_v5, %v7343_v50  ;;  %v493_v4 = vrot.slane %v7405_v36, %v7234_v2 }
  0xad   :  { %11783 = vst [vmem:[#allocation22_spill] sm:$0xff] %v7378_v20  ;;  %11784 = vst [vmem:[#allocation23_spill] sm:$0xff] %v7381_v28 }
  0xae   :  { %11785 = vst [vmem:[#allocation24_spill] sm:$0xff] %v7390_v31  ;;  %466 = vbcast.lane.b32.xlu1 %v460_v6, 264  ;;  %462 = vbcast.lane.b32.xlu0 %v460_v6, 256  ;;  %11788 = vst [vmem:[#allocation27_spill] sm:$0xff] %v7420_v43 }
  0xb0   :  { %v159_v38 = vpop.permute.xlu1 %158  ;;  %v155_v53 = vpop.permute.xlu0 %154 }
  0xb1   :  { %v1855_v44 = vcombine.low %v137_v60, %v159_v38  ;;  %v1856_v45 = vcombine.high %v137_v60, %v159_v38  ;;  %v1583_v51 = vcombine.low %v133_v61, %v155_v53  ;;  %v1584_v52 = vcombine.high %v133_v61, %v155_v53 }
  0xb2   :  { %477 = vbcast.lane.b32.xlu1 %v471_v33, 264  ;;  %473 = vbcast.lane.b32.xlu0 %v471_v33, 256 }
  0xb3   :  { %v7429_v49 = vrot.slane %v1855_v44, %v7292_v56  ;;  %v7432_v25 = vrot.slane %v1856_v45, %v7292_v56 }
  0xb4   :  { %v170_v57 = vpop.permute.xlu1 %169  ;;  %v166_v1 = vpop.permute.xlu0 %165 }
  0xb5   :  { %11789 = vst [vmem:[#allocation28_spill] sm:$0xff] %v7429_v49  ;;  %11790 = vst [vmem:[#allocation29_spill] sm:$0xff] %v7432_v25  ;;  %v1871_v60 = vcombine.low %v148_v22, %v170_v57  ;;  %v1872_v62 = vcombine.high %v148_v22, %v170_v57  ;;  %v1599_v63 = vcombine.low %v144_v23, %v166_v1 }
  0xb6   :  { %v1600_v0 = vcombine.high %v144_v23, %v166_v1  ;;  %488 = vbcast.lane.b32.xlu1 %v482_v46, 264  ;;  %484 = vbcast.lane.b32.xlu0 %v482_v46, 256  ;;  %v1591_v22 = vrot.slane %v1583_v51, %v7292_v56  ;;  %v7450_v23 = vrot.slane %v1584_v52, %v7292_v56 }
  0xb7   :  { %v7437_v5 = vrot.slane %v1871_v60, %v7292_v56  ;;  %v7440_v6 = vrot.slane %v1872_v62, %v7292_v56  ;;  %v7443_v33 = vrot.slane %v1599_v63, %v7292_v56  ;;  %v504_v46 = vrot.slane %v7405_v36, %v7242_v7 }
  0xb8   :  { %v7446_v61 = vrot.slane %v1600_v0, %v7292_v56  ;;  %11794 = vst [vmem:[#allocation33_spill] sm:$0xff] %v7450_v23  ;;  %v181_v38 = vpop.permute.xlu1 %180  ;;  %v177_v53 = vpop.permute.xlu0 %176  ;;  %v515_v60 = vrot.slane %v7405_v36, %v7246_v9 }
  0xb9   :  { %11791 = vst [vmem:[#allocation30_spill] sm:$0xff] %v7437_v5  ;;  %11792 = vst [vmem:[#allocation31_spill] sm:$0xff] %v7440_v6  ;;  %v1920_v44 = vcombine.high %v7429_v49, %v7437_v5  ;;  %v1648_v57 = vcombine.high %v1591_v22, %v7443_v33 }
  0xba   :  { %11793 = vst [vmem:[#allocation32_spill] sm:$0xff] %v7446_v61  ;;  %v1664_v1 = vcombine.high %v7450_v23, %v7446_v61  ;;  %499 = vbcast.lane.b32.xlu1 %v493_v4, 264  ;;  %495 = vbcast.lane.b32.xlu0 %v493_v4, 256 }
  0xbc   :  { %v192_v51 = vpop.permute.xlu1 %191  ;;  %v188_v52 = vpop.permute.xlu0 %187 }
  0xbe   :  { %510 = vbcast.lane.b32.xlu1 %v504_v46, 264  ;;  %506 = vbcast.lane.b32.xlu0 %v504_v46, 256 }
  0xc0   :  { %v203_v62 = vpop.permute.xlu1 %202  ;;  %v199_v63 = vpop.permute.xlu0 %198 }
  0xc1   :  { %v1887_v0 = vcombine.low %v181_v38, %v203_v62  ;;  %v1888_v48 = vcombine.high %v181_v38, %v203_v62  ;;  %v1615_v39 = vcombine.low %v177_v53, %v199_v63  ;;  %v1616_v32 = vcombine.high %v177_v53, %v199_v63 }
  0xc2   :  { %521 = vbcast.lane.b32.xlu1 %v515_v60, 264  ;;  %517 = vbcast.lane.b32.xlu0 %v515_v60, 256  ;;  %v1647_v38 = vcombine.low %v1591_v22, %v7443_v33  ;;  %v537_v60 = vrot.slane %v7405_v36, %v7254_v13 }
  0xc3   :  { %v7466_v47 = vrot.slane %v1887_v0, %v7292_v56  ;;  %v7469_v4 = vrot.slane %v1888_v48, %v7292_v56 }
  0xc4   :  { %v214_v37 = vpop.permute.xlu1 %213  ;;  %v210_v27 = vpop.permute.xlu0 %209 }
  0xc5   :  { %11795 = vst [vmem:[#allocation34_spill] sm:$0xff] %v7466_v47  ;;  %11796 = vst [vmem:[#allocation35_spill] sm:$0xff] %v7469_v4  ;;  %v1903_v46 = vcombine.low %v192_v51, %v214_v37  ;;  %v1904_v35 = vcombine.high %v192_v51, %v214_v37  ;;  %v1631_v26 = vcombine.low %v188_v52, %v210_v27 }
  0xc6   :  { %v1632_v45 = vcombine.high %v188_v52, %v210_v27  ;;  %532 = vbcast.lane.b32.xlu1 %v526_v34, 264  ;;  %528 = vbcast.lane.b32.xlu0 %v526_v34, 256  ;;  %v1623_v27 = vrot.slane %v1615_v39, %v7292_v56  ;;  %v7486_v37 = vrot.slane %v1616_v32, %v7292_v56 }
  0xc7   :  { %v7475_v62 = vrot.slane %v1903_v46, %v7292_v56  ;;  %v7478_v48 = vrot.slane %v1904_v35, %v7292_v56  ;;  %v1639_v53 = vrot.slane %v1631_v26, %v7292_v56  ;;  %v7493_v52 = vrot.slane %v1920_v44, %v7343_v50 }
  0xc8   :  { %v7482_v63 = vrot.slane %v1632_v45, %v7292_v56  ;;  %11800 = vst [vmem:[#allocation39_spill] sm:$0xff] %v7486_v37  ;;  %v225_v33 = vpop.permute.xlu1 %224  ;;  %v221_v22 = vpop.permute.xlu0 %220  ;;  %v548_v32 = vrot.slane %v7405_v36, %v7258_v15  ;;  %v7500_v39 = vrot.slane %v1647_v38, %v7343_v50  ;;  %v559_v38 = vrot.slane %v7405_v36, %v7262_v17 }
  0xc9   :  { %11797 = vst [vmem:[#allocation36_spill] sm:$0xff] %v7475_v62  ;;  %11798 = vst [vmem:[#allocation37_spill] sm:$0xff] %v7478_v48  ;;  %v1952_v51 = vcombine.high %v7466_v47, %v7475_v62  ;;  %v1968_v35 = vcombine.high %v7469_v4, %v7478_v48  ;;  %v1679_v26 = vcombine.low %v1623_v27, %v1639_v53 }
  0xca   :  { %11799 = vst [vmem:[#allocation38_spill] sm:$0xff] %v7482_v63  ;;  %11801 = vst [vmem:[#allocation40_spill] sm:$0xff] %v7493_v52  ;;  %v1680_v45 = vcombine.high %v1623_v27, %v1639_v53  ;;  %v1696_v34 = vcombine.high %v7486_v37, %v7482_v63  ;;  %543 = vbcast.lane.b32.xlu1 %v537_v60, 264  ;;  %539 = vbcast.lane.b32.xlu0 %v537_v60, 256 }
  0xcb   :  { %11802 = vst [vmem:[#allocation41_spill] sm:$0xff] %v7500_v39  ;;  %v7503_v0 = vrot.slane %v1952_v51, %v7343_v50  ;;  %v7506_v44 = vrot.slane %v1679_v26, %v7343_v50  ;;  %v7509_v53 = vrot.slane %v1648_v57, %v7343_v50  ;;  %v7520_v60 = vrot.slane %v1664_v1, %v7343_v50  ;;  %v7536_v1 = vld [vmem:[#allocation2 + $0x30] sm:$0xff] }
  0xcc   :  { %v236_v46 = vpop.permute.xlu1 %235  ;;  %v232_v43 = vpop.permute.xlu0 %231  ;;  %v7512_v27 = vrot.slane %v1680_v45, %v7343_v50  ;;  %v7515_v42 = vrot.slane %v1696_v34, %v7343_v50  ;;  %v11809_v36 = vcombine.high %v7432_v25, %v7440_v6  ;;  %v7545_v48 = vrot.slane %v1968_v35, %v7343_v50 }
  0xcd   :  { %11803 = vst [vmem:[#allocation42_spill] sm:$0xff] %v7503_v0  ;;  %11804 = vst [vmem:[#allocation43_spill] sm:$0xff] %v7506_v44  ;;  %v581_v51 = vrot.slane %v7536_v1, %v7234_v2  ;;  %v614_v52 = vrot.slane %v7536_v1, %v7250_v11 }
  0xce   :  { %11805 = vst [vmem:[#allocation44_spill] sm:$0xff] %v7509_v53  ;;  %11806 = vst [vmem:[#allocation45_spill] sm:$0xff] %v7512_v27  ;;  %554 = vbcast.lane.b32.xlu1 %v548_v32, 264  ;;  %v7534_v34 = vrot.slane %v11809_v36, %v7343_v50  ;;  %550 = vbcast.lane.b32.xlu0 %v548_v32, 256  ;;  %v570_v32 = vrot.slane %v7536_v1, %v7237_v3 }
  0xcf   :  { %11807 = vst [vmem:[#allocation46_spill] sm:$0xff] %v7515_v42  ;;  %11808 = vst [vmem:[#allocation47_spill] sm:$0xff] %v7520_v60 }
  0xd0   :  { %11810 = vst [vmem:[#allocation48_spill] sm:$0xff] %v7534_v34  ;;  %v247_v4 = vpop.permute.xlu1 %246  ;;  %v243_v26 = vpop.permute.xlu0 %242  ;;  %11811 = vst [vmem:[#allocation49_spill] sm:$0xff] %v7545_v48 }
  0xd1   :  { %v2263_v25 = vcombine.low %v225_v33, %v247_v4  ;;  %v2264_v36 = vcombine.high %v225_v33, %v247_v4  ;;  %v1991_v35 = vcombine.low %v221_v22, %v243_v26  ;;  %v1992_v10 = vcombine.high %v221_v22, %v243_v26 }
  0xd2   :  { %565 = vbcast.lane.b32.xlu1 %v559_v38, 264  ;;  %561 = vbcast.lane.b32.xlu0 %v559_v38, 256 }
  0xd3   :  { %v7554_v6 = vrot.slane %v2263_v25, %v7292_v56  ;;  %v7557_v45 = vrot.slane %v2264_v36, %v7292_v56 }
  0xd4   :  { %v258_v4 = vpop.permute.xlu1 %257  ;;  %v254_v33 = vpop.permute.xlu0 %253 }
  0xd5   :  { %11812 = vst [vmem:[#allocation50_spill] sm:$0xff] %v7554_v6  ;;  %11813 = vst [vmem:[#allocation51_spill] sm:$0xff] %v7557_v45  ;;  %v2279_v16 = vcombine.low %v236_v46, %v258_v4  ;;  %v2280_v41 = vcombine.high %v236_v46, %v258_v4  ;;  %v2007_v55 = vcombine.low %v232_v43, %v254_v33 }
  0xd6   :  { %v2008_v0 = vcombine.high %v232_v43, %v254_v33  ;;  %576 = vbcast.lane.b32.xlu1 %v570_v32, 264  ;;  %572 = vbcast.lane.b32.xlu0 %v570_v32, 256  ;;  %v1999_v46 = vrot.slane %v1991_v35, %v7292_v56  ;;  %v7575_v43 = vrot.slane %v1992_v10, %v7292_v56 }
  0xd7   :  { %v7562_v38 = vrot.slane %v2279_v16, %v7292_v56  ;;  %v7565_v25 = vrot.slane %v2280_v41, %v7292_v56  ;;  %v7568_v36 = vrot.slane %v2007_v55, %v7292_v56  ;;  %v592_v32 = vrot.slane %v7536_v1, %v7242_v7 }
  0xd8   :  { %v7571_v22 = vrot.slane %v2008_v0, %v7292_v56  ;;  %11817 = vst [vmem:[#allocation55_spill] sm:$0xff] %v7575_v43  ;;  %v269_v26 = vpop.permute.xlu1 %268  ;;  %v265_v4 = vpop.permute.xlu0 %264  ;;  %v603_v33 = vrot.slane %v7536_v1, %v7246_v9 }
  0xd9   :  { %11814 = vst [vmem:[#allocation52_spill] sm:$0xff] %v7562_v38  ;;  %11815 = vst [vmem:[#allocation53_spill] sm:$0xff] %v7565_v25  ;;  %v2328_v16 = vcombine.high %v7554_v6, %v7562_v38  ;;  %v2056_v55 = vcombine.high %v1999_v46, %v7568_v36 }
  0xda   :  { %11816 = vst [vmem:[#allocation54_spill] sm:$0xff] %v7571_v22  ;;  %v2072_v0 = vcombine.high %v7575_v43, %v7571_v22  ;;  %587 = vbcast.lane.b32.xlu1 %v581_v51, 264  ;;  %583 = vbcast.lane.b32.xlu0 %v581_v51, 256 }
  0xdc   :  { %v280_v10 = vpop.permute.xlu1 %279  ;;  %v276_v35 = vpop.permute.xlu0 %275 }
  0xde   :  { %598 = vbcast.lane.b32.xlu1 %v592_v32, 264  ;;  %594 = vbcast.lane.b32.xlu0 %v592_v32, 256 }
  0xe0   :  { %v291_v57 = vpop.permute.xlu1 %290  ;;  %v287_v48 = vpop.permute.xlu0 %286 }
  0xe1   :  { %v2295_v41 = vcombine.low %v269_v26, %v291_v57  ;;  %v2296_v34 = vcombine.high %v269_v26, %v291_v57  ;;  %v2023_v18 = vcombine.low %v265_v4, %v287_v48  ;;  %v2024_v47 = vcombine.high %v265_v4, %v287_v48 }
  0xe2   :  { %609 = vbcast.lane.b32.xlu1 %v603_v33, 264  ;;  %605 = vbcast.lane.b32.xlu0 %v603_v33, 256  ;;  %v2055_v57 = vcombine.low %v1999_v46, %v7568_v36  ;;  %v625_v26 = vrot.slane %v7536_v1, %v7254_v13 }
  0xe3   :  { %v7591_v20 = vrot.slane %v2295_v41, %v7292_v56  ;;  %v7594_v51 = vrot.slane %v2296_v34, %v7292_v56 }
  0xe4   :  { %v302_v62 = vpop.permute.xlu1 %301  ;;  %v298_v49 = vpop.permute.xlu0 %297 }
  0xe5   :  { %11818 = vst [vmem:[#allocation56_spill] sm:$0xff] %v7591_v20  ;;  %11819 = vst [vmem:[#allocation57_spill] sm:$0xff] %v7594_v51  ;;  %v2311_v32 = vcombine.low %v280_v10, %v302_v62  ;;  %v2312_v5 = vcombine.high %v280_v10, %v302_v62  ;;  %v2039_v6 = vcombine.low %v276_v35, %v298_v49 }
  0xe6   :  { %v2040_v38 = vcombine.high %v276_v35, %v298_v49  ;;  %620 = vbcast.lane.b32.xlu1 %v614_v52, 264  ;;  %616 = vbcast.lane.b32.xlu0 %v614_v52, 256  ;;  %v2031_v49 = vrot.slane %v2023_v18, %v7292_v56  ;;  %v7611_v62 = vrot.slane %v2024_v47, %v7292_v56 }
  0xe7   :  { %v7600_v41 = vrot.slane %v2311_v32, %v7292_v56  ;;  %v7603_v34 = vrot.slane %v2312_v5, %v7292_v56  ;;  %v2047_v48 = vrot.slane %v2039_v6, %v7292_v56  ;;  %v7618_v35 = vrot.slane %v2328_v16, %v7343_v50 }
  0xe8   :  { %v7607_v4 = vrot.slane %v2040_v38, %v7292_v56  ;;  %11823 = vst [vmem:[#allocation61_spill] sm:$0xff] %v7611_v62  ;;  %v313_v36 = vpop.permute.xlu1 %312  ;;  %v309_v46 = vpop.permute.xlu0 %308  ;;  %v636_v18 = vrot.slane %v7536_v1, %v7258_v15  ;;  %v7625_v47 = vrot.slane %v2055_v57, %v7343_v50  ;;  %v647_v57 = vrot.slane %v7536_v1, %v7262_v17 }
  0xe9   :  { %11820 = vst [vmem:[#allocation58_spill] sm:$0xff] %v7600_v41  ;;  %11821 = vst [vmem:[#allocation59_spill] sm:$0xff] %v7603_v34  ;;  %v2360_v10 = vcombine.high %v7591_v20, %v7600_v41  ;;  %v2376_v5 = vcombine.high %v7594_v51, %v7603_v34  ;;  %v2087_v6 = vcombine.low %v2031_v49, %v2047_v48 }
  0xea   :  { %11822 = vst [vmem:[#allocation60_spill] sm:$0xff] %v7607_v4  ;;  %11824 = vst [vmem:[#allocation62_spill] sm:$0xff] %v7618_v35  ;;  %v2088_v38 = vcombine.high %v2031_v49, %v2047_v48  ;;  %v2104_v52 = vcombine.high %v7611_v62, %v7607_v4  ;;  %631 = vbcast.lane.b32.xlu1 %v625_v26, 264  ;;  %627 = vbcast.lane.b32.xlu0 %v625_v26, 256 }
  0xeb   :  { %11825 = vst [vmem:[#allocation63_spill] sm:$0xff] %v7625_v47  ;;  %v7628_v33 = vrot.slane %v2360_v10, %v7343_v50  ;;  %v7631_v16 = vrot.slane %v2087_v6, %v7343_v50  ;;  %v7634_v48 = vrot.slane %v2056_v55, %v7343_v50  ;;  %v7645_v26 = vrot.slane %v2072_v0, %v7343_v50  ;;  %v7661_v0 = vld [vmem:[#allocation2 + $0x38] sm:$0xff] }
  0xec   :  { %v324_v32 = vpop.permute.xlu1 %323  ;;  %v320_v51 = vpop.permute.xlu0 %319  ;;  %v7637_v49 = vrot.slane %v2088_v38, %v7343_v50  ;;  %v7640_v34 = vrot.slane %v2104_v52, %v7343_v50  ;;  %v11830_v1 = vcombine.high %v7557_v45, %v7565_v25  ;;  %v7670_v41 = vrot.slane %v2376_v5, %v7343_v50 }
  0xed   :  { %11826 = vst [vmem:[#allocation64_spill] sm:$0xff] %v7628_v33  ;;  %11827 = vst [vmem:[#allocation65_spill] sm:$0xff] %v7631_v16  ;;  %v669_v10 = vrot.slane %v7661_v0, %v7234_v2 }
  0xee   :  { %11828 = vst [vmem:[#allocation66_spill] sm:$0xff] %v7640_v34  ;;  %11829 = vst [vmem:[#allocation67_spill] sm:$0xff] %v7645_v26  ;;  %642 = vbcast.lane.b32.xlu1 %v636_v18, 264  ;;  %v7659_v52 = vrot.slane %v11830_v1, %v7343_v50  ;;  %638 = vbcast.lane.b32.xlu0 %v636_v18, 256  ;;  %v658_v18 = vrot.slane %v7661_v0, %v7237_v3 }
  0xef   :  { %11832 = vst [vmem:[#allocation69_spill] sm:$0xff] %v7670_v41 }
  0xf0   :  { %11831 = vst [vmem:[#allocation68_spill] sm:$0xff] %v7659_v52  ;;  %v335_v20 = vpop.permute.xlu1 %334  ;;  %v331_v6 = vpop.permute.xlu0 %330 }
  0xf1   :  { %v2399_v45 = vcombine.low %v313_v36, %v335_v20  ;;  %v2400_v1 = vcombine.high %v313_v36, %v335_v20  ;;  %v2127_v5 = vcombine.low %v309_v46, %v331_v6  ;;  %v2128_v33 = vcombine.high %v309_v46, %v331_v6 }
  0xf2   :  { %653 = vbcast.lane.b32.xlu1 %v647_v57, 264  ;;  %649 = vbcast.lane.b32.xlu0 %v647_v57, 256 }
  0xf3   :  { %v7679_v25 = vrot.slane %v2399_v45, %v7292_v56  ;;  %v7682_v38 = vrot.slane %v2400_v1, %v7292_v56 }
  0xf4   :  { %v346_v20 = vpop.permute.xlu1 %345  ;;  %v342_v36 = vpop.permute.xlu0 %341 }
  0xf5   :  { %11833 = vst [vmem:[#allocation70_spill] sm:$0xff] %v7679_v25  ;;  %11834 = vst [vmem:[#allocation71_spill] sm:$0xff] %v7682_v38  ;;  %v2415_v35 = vcombine.low %v324_v32, %v346_v20  ;;  %v2416_v8 = vcombine.high %v324_v32, %v346_v20  ;;  %v2143_v14 = vcombine.low %v320_v51, %v342_v36 }
  0xf6   :  { %v2144_v40 = vcombine.high %v320_v51, %v342_v36  ;;  %664 = vbcast.lane.b32.xlu1 %v658_v18, 264  ;;  %660 = vbcast.lane.b32.xlu0 %v658_v18, 256  ;;  %v2135_v32 = vrot.slane %v2127_v5, %v7292_v56  ;;  %v7698_v51 = vrot.slane %v2128_v33, %v7292_v56 }
  0xf7   :  { %v7687_v57 = vrot.slane %v2415_v35, %v7292_v56  ;;  %v7690_v45 = vrot.slane %v2416_v8, %v7292_v56  ;;  %v2151_v1 = vrot.slane %v2143_v14, %v7292_v56  ;;  %v691_v5 = vrot.slane %v7661_v0, %v7246_v9 }
  0xf8   :  { %v7694_v46 = vrot.slane %v2144_v40, %v7292_v56  ;;  %11838 = vst [vmem:[#allocation75_spill] sm:$0xff] %v7698_v51  ;;  %v357_v6 = vpop.permute.xlu1 %356  ;;  %v353_v20 = vpop.permute.xlu0 %352  ;;  %v680_v40 = vrot.slane %v7661_v0, %v7242_v7 }
  0xf9   :  { %11835 = vst [vmem:[#allocation72_spill] sm:$0xff] %v7687_v57  ;;  %11836 = vst [vmem:[#allocation73_spill] sm:$0xff] %v7690_v45  ;;  %v2464_v35 = vcombine.high %v7679_v25, %v7687_v57  ;;  %v2192_v36 = vcombine.high %v2135_v32, %v2151_v1  ;;  %v702_v25 = vrot.slane %v7661_v0, %v7250_v11 }
  0xfa   :  { %11837 = vst [vmem:[#allocation74_spill] sm:$0xff] %v7694_v46  ;;  %v2208_v14 = vcombine.high %v7698_v51, %v7694_v46  ;;  %675 = vbcast.lane.b32.xlu1 %v669_v10, 264  ;;  %671 = vbcast.lane.b32.xlu0 %v669_v10, 256 }
  0xfc   :  { %v368_v18 = vpop.permute.xlu1 %367  ;;  %v364_v33 = vpop.permute.xlu0 %363 }
  0xfe   :  { %686 = vbcast.lane.b32.xlu1 %v680_v40, 264  ;;  %682 = vbcast.lane.b32.xlu0 %v680_v40, 256 }
 0x100   :  { %v379_v55 = vpop.permute.xlu1 %378  ;;  %v375_v41 = vpop.permute.xlu0 %374 }
 0x101   :  { %v2431_v52 = vcombine.low %v357_v6, %v379_v55  ;;  %v2432_v8 = vcombine.high %v357_v6, %v379_v55  ;;  %v2159_v54 = vcombine.low %v353_v20, %v375_v41  ;;  %v2160_v42 = vcombine.high %v353_v20, %v375_v41 }
 0x102   :  { %697 = vbcast.lane.b32.xlu1 %v691_v5, 264  ;;  %693 = vbcast.lane.b32.xlu0 %v691_v5, 256  ;;  %v2191_v55 = vcombine.low %v2135_v32, %v2151_v1  ;;  %v713_v6 = vrot.slane %v7661_v0, %v7254_v13 }
 0x103   :  { %v7713_v57 = vrot.slane %v2431_v52, %v7292_v56  ;;  %v7716_v10 = vrot.slane %v2432_v8, %v7292_v56 }
 0x104   :  { %v390_v60 = vpop.permute.xlu1 %389  ;;  %v386_v34 = vpop.permute.xlu0 %385 }
 0x105   :  { %11839 = vst [vmem:[#allocation76_spill] sm:$0xff] %v7713_v57  ;;  %11840 = vst [vmem:[#allocation77_spill] sm:$0xff] %v7716_v10  ;;  %v2447_v40 = vcombine.low %v368_v18, %v390_v60  ;;  %v2448_v26 = vcombine.high %v368_v18, %v390_v60  ;;  %v2175_v31 = vcombine.low %v364_v33, %v386_v34 }
 0x106   :  { %v2176_v24 = vcombine.high %v364_v33, %v386_v34  ;;  %708 = vbcast.lane.b32.xlu1 %v702_v25, 264  ;;  %704 = vbcast.lane.b32.xlu0 %v702_v25, 256  ;;  %v2167_v60 = vrot.slane %v2159_v54, %v7292_v56  ;;  %v7732_v34 = vrot.slane %v2160_v42, %v7292_v56 }
 0x107   :  { %v7721_v5 = vrot.slane %v2447_v40, %v7292_v56  ;;  %v7724_v52 = vrot.slane %v2448_v26, %v7292_v56  ;;  %v2183_v8 = vrot.slane %v2175_v31, %v7292_v56  ;;  %v7739_v18 = vrot.slane %v2464_v35, %v7343_v50 }
 0x108   :  { %v7728_v41 = vrot.slane %v2176_v24, %v7292_v56  ;;  %11844 = vst [vmem:[#allocation81_spill] sm:$0xff] %v7732_v34  ;;  %v401_v1 = vpop.permute.xlu1 %400  ;;  %v397_v32 = vpop.permute.xlu0 %396  ;;  %v724_v54 = vrot.slane %v7661_v0, %v7258_v15  ;;  %v7746_v42 = vrot.slane %v2191_v55, %v7343_v50  ;;  %v735_v55 = vrot.slane %v7661_v0, %v7262_v17 }
 0x109   :  { %11841 = vst [vmem:[#allocation78_spill] sm:$0xff] %v7721_v5  ;;  %11842 = vst [vmem:[#allocation79_spill] sm:$0xff] %v7724_v52  ;;  %v2496_v20 = vcombine.high %v7713_v57, %v7721_v5  ;;  %v2512_v26 = vcombine.high %v7716_v10, %v7724_v52  ;;  %v2223_v31 = vcombine.low %v2167_v60, %v2183_v8 }
 0x10a   :  { %11843 = vst [vmem:[#allocation80_spill] sm:$0xff] %v7728_v41  ;;  %11845 = vst [vmem:[#allocation82_spill] sm:$0xff] %v7739_v18  ;;  %v2224_v24 = vcombine.high %v2167_v60, %v2183_v8  ;;  %v2240_v25 = vcombine.high %v7732_v34, %v7728_v41  ;;  %719 = vbcast.lane.b32.xlu1 %v713_v6, 264  ;;  %715 = vbcast.lane.b32.xlu0 %v713_v6, 256 }
 0x10b   :  { %11846 = vst [vmem:[#allocation83_spill] sm:$0xff] %v7746_v42  ;;  %v7749_v33 = vrot.slane %v2496_v20, %v7343_v50  ;;  %v7752_v35 = vrot.slane %v2223_v31, %v7343_v50  ;;  %v7755_v8 = vrot.slane %v2192_v36, %v7343_v50  ;;  %v7766_v20 = vrot.slane %v2208_v14, %v7343_v50  ;;  %v7782_v14 = vld [vmem:[#allocation2 + $0x40] sm:$0xff] }
 0x10c   :  { %v412_v40 = vpop.permute.xlu1 %411  ;;  %v7758_v60 = vrot.slane %v2224_v24, %v7343_v50  ;;  %v7761_v10 = vrot.slane %v2240_v25, %v7343_v50  ;;  %v408_v6 = vpop.permute.xlu0 %407  ;;  %v11853_v0 = vcombine.high %v7682_v38, %v7690_v45  ;;  %v7791_v25 = vrot.slane %v2512_v26, %v7343_v50 }
 0x10d   :  { %11847 = vst [vmem:[#allocation84_spill] sm:$0xff] %v7749_v33  ;;  %11848 = vst [vmem:[#allocation85_spill] sm:$0xff] %v7752_v35  ;;  %v757_v31 = vrot.slane %v7782_v14, %v7234_v2 }
 0x10e   :  { %11849 = vst [vmem:[#allocation86_spill] sm:$0xff] %v7755_v8  ;;  %11850 = vst [vmem:[#allocation87_spill] sm:$0xff] %v7758_v60  ;;  %730 = vbcast.lane.b32.xlu1 %v724_v54, 264  ;;  %v7780_v52 = vrot.slane %v11853_v0, %v7343_v50  ;;  %726 = vbcast.lane.b32.xlu0 %v724_v54, 256  ;;  %v746_v54 = vrot.slane %v7782_v14, %v7237_v3 }
 0x10f   :  { %11851 = vst [vmem:[#allocation88_spill] sm:$0xff] %v7761_v10  ;;  %11852 = vst [vmem:[#allocation89_spill] sm:$0xff] %v7766_v20 }
 0x110   :  { %11854 = vst [vmem:[#allocation90_spill] sm:$0xff] %v7780_v52  ;;  %v423_v57 = vpop.permute.xlu1 %422  ;;  %11855 = vst [vmem:[#allocation91_spill] sm:$0xff] %v7791_v25  ;;  %v419_v0 = vpop.permute.xlu0 %418 }
 0x111   :  { %v2807_v5 = vcombine.low %v401_v1, %v423_v57  ;;  %v2808_v38 = vcombine.high %v401_v1, %v423_v57  ;;  %v2535_v45 = vcombine.low %v397_v32, %v419_v0  ;;  %v2536_v10 = vcombine.high %v397_v32, %v419_v0 }
 0x112   :  { %741 = vbcast.lane.b32.xlu1 %v735_v55, 264  ;;  %737 = vbcast.lane.b32.xlu0 %v735_v55, 256 }
 0x113   :  { %v7800_v26 = vrot.slane %v2807_v5, %v7292_v56  ;;  %v7803_v57 = vrot.slane %v2808_v38, %v7292_v56  ;;  %v2543_v5 = vrot.slane %v2535_v45, %v7292_v56  ;;  %v7815_v38 = vrot.slane %v2536_v10, %v7292_v56 }
 0x114   :  { %v434_v24 = vpop.permute.xlu1 %433  ;;  %v430_v18 = vpop.permute.xlu0 %429  ;;  %v768_v10 = vrot.slane %v7782_v14, %v7242_v7 }
 0x115   :  { %11856 = vst [vmem:[#allocation92_spill] sm:$0xff] %v7800_v26  ;;  %11857 = vst [vmem:[#allocation93_spill] sm:$0xff] %v7803_v57  ;;  %v2823_v1 = vcombine.low %v412_v40, %v434_v24  ;;  %v2824_v33 = vcombine.high %v412_v40, %v434_v24  ;;  %v2551_v20 = vcombine.low %v408_v6, %v430_v18 }
 0x116   :  { %v2552_v51 = vcombine.high %v408_v6, %v430_v18  ;;  %752 = vbcast.lane.b32.xlu1 %v746_v54, 264  ;;  %748 = vbcast.lane.b32.xlu0 %v746_v54, 256  ;;  %11860 = vst [vmem:[#allocation96_spill] sm:$0xff] %v7815_v38  ;;  %v779_v54 = vrot.slane %v7782_v14, %v7246_v9 }
 0x117   :  { %v7808_v55 = vrot.slane %v2823_v1, %v7292_v56  ;;  %v7811_v32 = vrot.slane %v2824_v33, %v7292_v56  ;;  %v2559_v40 = vrot.slane %v2551_v20, %v7292_v56 }
 0x118   :  { %v7819_v18 = vrot.slane %v2552_v51, %v7292_v56  ;;  %v445_v6 = vpop.permute.xlu1 %444  ;;  %v441_v33 = vpop.permute.xlu0 %440 }
 0x119   :  { %11858 = vst [vmem:[#allocation94_spill] sm:$0xff] %v7808_v55  ;;  %11859 = vst [vmem:[#allocation95_spill] sm:$0xff] %v7811_v32  ;;  %v2872_v24 = vcombine.high %v7800_v26, %v7808_v55  ;;  %v2600_v1 = vcombine.high %v2543_v5, %v2559_v40  ;;  %v790_v26 = vrot.slane %v7782_v14, %v7250_v11 }
 0x11a   :  { %11861 = vst [vmem:[#allocation97_spill] sm:$0xff] %v7819_v18  ;;  %v2616_v45 = vcombine.high %v7815_v38, %v7819_v18  ;;  %763 = vbcast.lane.b32.xlu1 %v757_v31, 264  ;;  %759 = vbcast.lane.b32.xlu0 %v757_v31, 256  ;;  %v2599_v63 = vcombine.low %v2543_v5, %v2559_v40 }
 0x11c   :  { %v456_v20 = vpop.permute.xlu1 %455  ;;  %v452_v51 = vpop.permute.xlu0 %451 }
 0x11e   :  { %774 = vbcast.lane.b32.xlu1 %v768_v10, 264  ;;  %770 = vbcast.lane.b32.xlu0 %v768_v10, 256 }
 0x120   :  { %v467_v36 = vpop.permute.xlu1 %466  ;;  %v463_v52 = vpop.permute.xlu0 %462 }
 0x121   :  { %v2839_v25 = vcombine.low %v445_v6, %v467_v36  ;;  %v2840_v0 = vcombine.high %v445_v6, %v467_v36  ;;  %v2567_v55 = vcombine.low %v441_v33, %v463_v52  ;;  %v2568_v46 = vcombine.high %v441_v33, %v463_v52 }
 0x122   :  { %785 = vbcast.lane.b32.xlu1 %v779_v54, 264  ;;  %781 = vbcast.lane.b32.xlu0 %v779_v54, 256  ;;  %v801_v6 = vrot.slane %v7782_v14, %v7254_v13 }
 0x123   :  { %v7834_v31 = vrot.slane %v2839_v25, %v7292_v56  ;;  %v7837_v41 = vrot.slane %v2840_v0, %v7292_v56  ;;  %v2575_v25 = vrot.slane %v2567_v55, %v7292_v56  ;;  %v7849_v0 = vrot.slane %v2568_v46, %v7292_v56 }
 0x124   :  { %v478_v34 = vpop.permute.xlu1 %477  ;;  %v474_v61 = vpop.permute.xlu0 %473 }
 0x125   :  { %11862 = vst [vmem:[#allocation98_spill] sm:$0xff] %v7834_v31  ;;  %11863 = vst [vmem:[#allocation99_spill] sm:$0xff] %v7837_v41  ;;  %v2855_v23 = vcombine.low %v456_v20, %v478_v34  ;;  %v2856_v10 = vcombine.high %v456_v20, %v478_v34  ;;  %v2583_v37 = vcombine.low %v452_v51, %v474_v61 }
 0x126   :  { %v2584_v36 = vcombine.high %v452_v51, %v474_v61  ;;  %796 = vbcast.lane.b32.xlu1 %v790_v26, 264  ;;  %792 = vbcast.lane.b32.xlu0 %v790_v26, 256  ;;  %11866 = vst [vmem:[#allocation102_spill] sm:$0xff] %v7849_v0  ;;  %v7860_v26 = vrot.slane %v2872_v24, %v7343_v50 }
 0x127   :  { %v7842_v54 = vrot.slane %v2855_v23, %v7292_v56  ;;  %v7845_v52 = vrot.slane %v2856_v10, %v7292_v56  ;;  %v2591_v34 = vrot.slane %v2583_v37, %v7292_v56  ;;  %v812_v37 = vrot.slane %v7782_v14, %v7258_v15 }
 0x128   :  { %v7853_v61 = vrot.slane %v2584_v36, %v7292_v56  ;;  %v489_v33 = vpop.permute.xlu1 %488  ;;  %v485_v40 = vpop.permute.xlu0 %484  ;;  %11868 = vst [vmem:[#allocation104_spill] sm:$0xff] %v7860_v26  ;;  %v7867_v51 = vrot.slane %v2599_v63, %v7343_v50  ;;  %v823_v63 = vrot.slane %v7782_v14, %v7262_v17  ;;  %v11874_v14 = vcombine.high %v7803_v57, %v7811_v32 }
 0x129   :  { %11864 = vst [vmem:[#allocation100_spill] sm:$0xff] %v7842_v54  ;;  %11865 = vst [vmem:[#allocation101_spill] sm:$0xff] %v7845_v52  ;;  %v2904_v5 = vcombine.high %v7834_v31, %v7842_v54  ;;  %v2920_v23 = vcombine.high %v7837_v41, %v7845_v52  ;;  %v2631_v55 = vcombine.low %v2575_v25, %v2591_v34 }
 0x12a   :  { %11867 = vst [vmem:[#allocation103_spill] sm:$0xff] %v7853_v61  ;;  %v2632_v20 = vcombine.high %v2575_v25, %v2591_v34  ;;  %v2648_v46 = vcombine.high %v7849_v0, %v7853_v61  ;;  %807 = vbcast.lane.b32.xlu1 %v801_v6, 264  ;;  %803 = vbcast.lane.b32.xlu0 %v801_v6, 256  ;;  %11869 = vst [vmem:[#allocation105_spill] sm:$0xff] %v7867_v51 }
 0x12b   :  { %v7870_v10 = vrot.slane %v2904_v5, %v7343_v50  ;;  %v7873_v24 = vrot.slane %v2631_v55, %v7343_v50  ;;  %v7876_v25 = vrot.slane %v2600_v1, %v7343_v50  ;;  %v7887_v5 = vrot.slane %v2616_v45, %v7343_v50  ;;  %v7903_v45 = vld [vmem:[#allocation2 + $0x48] sm:$0xff] }
 0x12c   :  { %v500_v36 = vpop.permute.xlu1 %499  ;;  %v7879_v34 = vrot.slane %v2632_v20, %v7343_v50  ;;  %v7882_v41 = vrot.slane %v2648_v46, %v7343_v50  ;;  %v496_v6 = vpop.permute.xlu0 %495  ;;  %v7901_v52 = vrot.slane %v11874_v14, %v7343_v50  ;;  %v7912_v46 = vrot.slane %v2920_v23, %v7343_v50 }
 0x12d   :  { %11870 = vst [vmem:[#allocation106_spill] sm:$0xff] %v7870_v10  ;;  %11871 = vst [vmem:[#allocation107_spill] sm:$0xff] %v7873_v24  ;;  %v845_v55 = vrot.slane %v7903_v45, %v7234_v2 }
 0x12e   :  { %11872 = vst [vmem:[#allocation108_spill] sm:$0xff] %v7882_v41  ;;  %11873 = vst [vmem:[#allocation109_spill] sm:$0xff] %v7887_v5  ;;  %818 = vbcast.lane.b32.xlu1 %v812_v37, 264  ;;  %814 = vbcast.lane.b32.xlu0 %v812_v37, 256  ;;  %v834_v37 = vrot.slane %v7903_v45, %v7237_v3 }
 0x12f   :  { %11875 = vst [vmem:[#allocation110_spill] sm:$0xff] %v7901_v52  ;;  %11876 = vst [vmem:[#allocation111_spill] sm:$0xff] %v7912_v46 }
 0x130   :  { %v511_v31 = vpop.permute.xlu1 %510  ;;  %v507_v14 = vpop.permute.xlu0 %506 }
 0x131   :  { %v2943_v54 = vcombine.low %v489_v33, %v511_v31  ;;  %v2944_v57 = vcombine.high %v489_v33, %v511_v31  ;;  %v2671_v32 = vcombine.low %v485_v40, %v507_v14  ;;  %v2672_v41 = vcombine.high %v485_v40, %v507_v14 }
 0x132   :  { %829 = vbcast.lane.b32.xlu1 %v823_v63, 264  ;;  %825 = vbcast.lane.b32.xlu0 %v823_v63, 256 }
 0x133   :  { %v7921_v23 = vrot.slane %v2943_v54, %v7292_v56  ;;  %v7924_v31 = vrot.slane %v2944_v57, %v7292_v56  ;;  %v2679_v54 = vrot.slane %v2671_v32, %v7292_v56  ;;  %v7936_v57 = vrot.slane %v2672_v41, %v7292_v56 }
 0x134   :  { %v522_v20 = vpop.permute.xlu1 %521  ;;  %v518_v26 = vpop.permute.xlu0 %517  ;;  %v856_v41 = vrot.slane %v7903_v45, %v7242_v7 }
 0x135   :  { %11877 = vst [vmem:[#allocation112_spill] sm:$0xff] %v7921_v23  ;;  %11878 = vst [vmem:[#allocation113_spill] sm:$0xff] %v7924_v31  ;;  %v2959_v33 = vcombine.low %v500_v36, %v522_v20  ;;  %v2960_v10 = vcombine.high %v500_v36, %v522_v20  ;;  %v2687_v5 = vcombine.low %v496_v6, %v518_v26 }
 0x136   :  { %v2688_v38 = vcombine.high %v496_v6, %v518_v26  ;;  %840 = vbcast.lane.b32.xlu1 %v834_v37, 264  ;;  %836 = vbcast.lane.b32.xlu0 %v834_v37, 256  ;;  %11881 = vst [vmem:[#allocation116_spill] sm:$0xff] %v7936_v57  ;;  %v867_v37 = vrot.slane %v7903_v45, %v7246_v9 }
 0x137   :  { %v7929_v63 = vrot.slane %v2959_v33, %v7292_v56  ;;  %v7932_v40 = vrot.slane %v2960_v10, %v7292_v56  ;;  %v2695_v36 = vrot.slane %v2687_v5, %v7292_v56 }
 0x138   :  { %v7940_v26 = vrot.slane %v2688_v38, %v7292_v56  ;;  %v533_v6 = vpop.permute.xlu1 %532  ;;  %v529_v10 = vpop.permute.xlu0 %528 }
 0x139   :  { %11879 = vst [vmem:[#allocation114_spill] sm:$0xff] %v7929_v63  ;;  %11880 = vst [vmem:[#allocation115_spill] sm:$0xff] %v7932_v40  ;;  %v3008_v20 = vcombine.high %v7921_v23, %v7929_v63  ;;  %v2736_v33 = vcombine.high %v2679_v54, %v2695_v36  ;;  %v878_v23 = vrot.slane %v7903_v45, %v7250_v11 }
 0x13a   :  { %11882 = vst [vmem:[#allocation117_spill] sm:$0xff] %v7940_v26  ;;  %v2752_v32 = vcombine.high %v7936_v57, %v7940_v26  ;;  %851 = vbcast.lane.b32.xlu1 %v845_v55, 264  ;;  %847 = vbcast.lane.b32.xlu0 %v845_v55, 256  ;;  %v2735_v22 = vcombine.low %v2679_v54, %v2695_v36 }
 0x13c   :  { %v544_v5 = vpop.permute.xlu1 %543  ;;  %v540_v38 = vpop.permute.xlu0 %539 }
 0x13e   :  { %862 = vbcast.lane.b32.xlu1 %v856_v41, 264  ;;  %858 = vbcast.lane.b32.xlu0 %v856_v41, 256 }
 0x140   :  { %v555_v1 = vpop.permute.xlu1 %554  ;;  %v551_v52 = vpop.permute.xlu0 %550 }
 0x141   :  { %v2975_v46 = vcombine.low %v533_v6, %v555_v1  ;;  %v2976_v14 = vcombine.high %v533_v6, %v555_v1  ;;  %v2703_v63 = vcombine.low %v529_v10, %v551_v52  ;;  %v2704_v57 = vcombine.high %v529_v10, %v551_v52 }
 0x142   :  { %873 = vbcast.lane.b32.xlu1 %v867_v37, 264  ;;  %869 = vbcast.lane.b32.xlu0 %v867_v37, 256  ;;  %v889_v6 = vrot.slane %v7903_v45, %v7254_v13 }
 0x143   :  { %v7955_v55 = vrot.slane %v2975_v46, %v7292_v56  ;;  %v7958_v18 = vrot.slane %v2976_v14, %v7292_v56  ;;  %v2711_v46 = vrot.slane %v2703_v63, %v7292_v56  ;;  %v7970_v14 = vrot.slane %v2704_v57, %v7292_v56 }
 0x144   :  { %v566_v26 = vpop.permute.xlu1 %565  ;;  %v562_v61 = vpop.permute.xlu0 %561 }
 0x145   :  { %11883 = vst [vmem:[#allocation118_spill] sm:$0xff] %v7955_v55  ;;  %11884 = vst [vmem:[#allocation119_spill] sm:$0xff] %v7958_v18  ;;  %v2991_v0 = vcombine.low %v544_v5, %v566_v26  ;;  %v2992_v41 = vcombine.high %v544_v5, %v566_v26  ;;  %v2719_v43 = vcombine.low %v540_v38, %v562_v61 }
 0x146   :  { %v2720_v1 = vcombine.high %v540_v38, %v562_v61  ;;  %884 = vbcast.lane.b32.xlu1 %v878_v23, 264  ;;  %880 = vbcast.lane.b32.xlu0 %v878_v23, 256  ;;  %11887 = vst [vmem:[#allocation122_spill] sm:$0xff] %v7970_v14  ;;  %v7981_v23 = vrot.slane %v3008_v20, %v7343_v50 }
 0x147   :  { %v7963_v37 = vrot.slane %v2991_v0, %v7292_v56  ;;  %v7966_v52 = vrot.slane %v2992_v41, %v7292_v56  ;;  %v2727_v26 = vrot.slane %v2719_v43, %v7292_v56  ;;  %v900_v43 = vrot.slane %v7903_v45, %v7258_v15 }
 0x148   :  { %v7974_v61 = vrot.slane %v2720_v1, %v7292_v56  ;;  %v577_v10 = vpop.permute.xlu1 %576  ;;  %v573_v36 = vpop.permute.xlu0 %572  ;;  %11889 = vst [vmem:[#allocation124_spill] sm:$0xff] %v7981_v23  ;;  %v7988_v38 = vrot.slane %v2735_v22, %v7343_v50  ;;  %v911_v22 = vrot.slane %v7903_v45, %v7262_v17  ;;  %v11897_v45 = vcombine.high %v7924_v31, %v7932_v40 }
 0x149   :  { %11885 = vst [vmem:[#allocation120_spill] sm:$0xff] %v7963_v37  ;;  %11886 = vst [vmem:[#allocation121_spill] sm:$0xff] %v7966_v52  ;;  %v3040_v54 = vcombine.high %v7955_v55, %v7963_v37  ;;  %v3056_v0 = vcombine.high %v7958_v18, %v7966_v52  ;;  %v2767_v63 = vcombine.low %v2711_v46, %v2727_v26 }
 0x14a   :  { %11888 = vst [vmem:[#allocation123_spill] sm:$0xff] %v7974_v61  ;;  %v2768_v5 = vcombine.high %v2711_v46, %v2727_v26  ;;  %v2784_v57 = vcombine.high %v7970_v14, %v7974_v61  ;;  %895 = vbcast.lane.b32.xlu1 %v889_v6, 264  ;;  %891 = vbcast.lane.b32.xlu0 %v889_v6, 256  ;;  %11890 = vst [vmem:[#allocation125_spill] sm:$0xff] %v7988_v38 }
 0x14b   :  { %v7991_v41 = vrot.slane %v3040_v54, %v7343_v50  ;;  %v7994_v20 = vrot.slane %v2767_v63, %v7343_v50  ;;  %v7997_v46 = vrot.slane %v2736_v33, %v7343_v50  ;;  %v8008_v54 = vrot.slane %v2752_v32, %v7343_v50  ;;  %v8024_v32 = vld [vmem:[#allocation2 + $0x50] sm:$0xff] }
 0x14c   :  { %v588_v1 = vpop.permute.xlu1 %587  ;;  %v8000_v26 = vrot.slane %v2768_v5, %v7343_v50  ;;  %v8003_v18 = vrot.slane %v2784_v57, %v7343_v50  ;;  %v584_v6 = vpop.permute.xlu0 %583  ;;  %v8022_v52 = vrot.slane %v11897_v45, %v7343_v50  ;;  %v8033_v57 = vrot.slane %v3056_v0, %v7343_v50 }
 0x14d   :  { %11891 = vst [vmem:[#allocation126_spill] sm:$0xff] %v7991_v41  ;;  %11892 = vst [vmem:[#allocation127_spill] sm:$0xff] %v7994_v20  ;;  %v933_v63 = vrot.slane %v8024_v32, %v7234_v2 }
 0x14e   :  { %11893 = vst [vmem:[#allocation128_spill] sm:$0xff] %v7997_v46  ;;  %11894 = vst [vmem:[#allocation129_spill] sm:$0xff] %v8000_v26  ;;  %906 = vbcast.lane.b32.xlu1 %v900_v43, 264  ;;  %902 = vbcast.lane.b32.xlu0 %v900_v43, 256  ;;  %v922_v43 = vrot.slane %v8024_v32, %v7237_v3 }
 0x14f   :  { %11895 = vst [vmem:[#allocation130_spill] sm:$0xff] %v8003_v18  ;;  %11896 = vst [vmem:[#allocation131_spill] sm:$0xff] %v8008_v54 }
 0x150   :  { %11898 = vst [vmem:[#allocation132_spill] sm:$0xff] %v8022_v52  ;;  %v599_v55 = vpop.permute.xlu1 %598  ;;  %11899 = vst [vmem:[#allocation133_spill] sm:$0xff] %v8033_v57  ;;  %v595_v45 = vpop.permute.xlu0 %594 }
 0x151   :  { %v3351_v37 = vcombine.low %v577_v10, %v599_v55  ;;  %v3352_v31 = vcombine.high %v577_v10, %v599_v55  ;;  %v3079_v40 = vcombine.low %v573_v36, %v595_v45  ;;  %v3080_v18 = vcombine.high %v573_v36, %v595_v45 }
 0x152   :  { %917 = vbcast.lane.b32.xlu1 %v911_v22, 264  ;;  %913 = vbcast.lane.b32.xlu0 %v911_v22, 256 }
 0x153   :  { %v8042_v0 = vrot.slane %v3351_v37, %v7292_v56  ;;  %v8045_v55 = vrot.slane %v3352_v31, %v7292_v56  ;;  %v3087_v37 = vrot.slane %v3079_v40, %v7292_v56  ;;  %v8057_v31 = vrot.slane %v3080_v18, %v7292_v56 }
 0x154   :  { %v610_v5 = vpop.permute.xlu1 %609  ;;  %v606_v23 = vpop.permute.xlu0 %605  ;;  %v944_v18 = vrot.slane %v8024_v32, %v7242_v7 }
 0x155   :  { %11900 = vst [vmem:[#allocation134_spill] sm:$0xff] %v8042_v0  ;;  %11901 = vst [vmem:[#allocation135_spill] sm:$0xff] %v8045_v55  ;;  %v3367_v10 = vcombine.low %v588_v1, %v610_v5  ;;  %v3368_v41 = vcombine.high %v588_v1, %v610_v5  ;;  %v3095_v54 = vcombine.low %v584_v6, %v606_v23 }
 0x156   :  { %v3096_v14 = vcombine.high %v584_v6, %v606_v23  ;;  %928 = vbcast.lane.b32.xlu1 %v922_v43, 264  ;;  %924 = vbcast.lane.b32.xlu0 %v922_v43, 256  ;;  %11904 = vst [vmem:[#allocation138_spill] sm:$0xff] %v8057_v31  ;;  %v955_v43 = vrot.slane %v8024_v32, %v7246_v9 }
 0x157   :  { %v8050_v22 = vrot.slane %v3367_v10, %v7292_v56  ;;  %v8053_v36 = vrot.slane %v3368_v41, %v7292_v56  ;;  %v3103_v1 = vrot.slane %v3095_v54, %v7292_v56 }
 0x158   :  { %v8061_v23 = vrot.slane %v3096_v14, %v7292_v56  ;;  %v621_v6 = vpop.permute.xlu1 %620  ;;  %v617_v41 = vpop.permute.xlu0 %616 }
 0x159   :  { %11902 = vst [vmem:[#allocation136_spill] sm:$0xff] %v8050_v22  ;;  %11903 = vst [vmem:[#allocation137_spill] sm:$0xff] %v8053_v36  ;;  %v3416_v5 = vcombine.high %v8042_v0, %v8050_v22  ;;  %v3144_v10 = vcombine.high %v3087_v37, %v3103_v1  ;;  %v966_v0 = vrot.slane %v8024_v32, %v7250_v11 }
 0x15a   :  { %11905 = vst [vmem:[#allocation139_spill] sm:$0xff] %v8061_v23  ;;  %v3160_v40 = vcombine.high %v8057_v31, %v8061_v23  ;;  %939 = vbcast.lane.b32.xlu1 %v933_v63, 264  ;;  %935 = vbcast.lane.b32.xlu0 %v933_v63, 256  ;;  %v3143_v19 = vcombine.low %v3087_v37, %v3103_v1 }
 0x15c   :  { %v632_v54 = vpop.permute.xlu1 %631  ;;  %v628_v14 = vpop.permute.xlu0 %627 }
 0x15e   :  { %950 = vbcast.lane.b32.xlu1 %v944_v18, 264  ;;  %946 = vbcast.lane.b32.xlu0 %v944_v18, 256 }
 0x160   :  { %v643_v33 = vpop.permute.xlu1 %642  ;;  %v639_v52 = vpop.permute.xlu0 %638 }
 0x161   :  { %v3383_v57 = vcombine.low %v621_v6, %v643_v33  ;;  %v3384_v45 = vcombine.high %v621_v6, %v643_v33  ;;  %v3111_v22 = vcombine.low %v617_v41, %v639_v52  ;;  %v3112_v61 = vcombine.high %v617_v41, %v639_v52 }
 0x162   :  { %961 = vbcast.lane.b32.xlu1 %v955_v43, 264  ;;  %957 = vbcast.lane.b32.xlu0 %v955_v43, 256  ;;  %v977_v6 = vrot.slane %v8024_v32, %v7254_v13 }
 0x163   :  { %v8076_v63 = vrot.slane %v3383_v57, %v7292_v56  ;;  %v8079_v23 = vrot.slane %v3384_v45, %v7292_v56  ;;  %v3119_v57 = vrot.slane %v3111_v22, %v7292_v56  ;;  %v8091_v45 = vrot.slane %v3112_v61, %v7292_v56 }
 0x164   :  { %v654_v31 = vpop.permute.xlu1 %653  ;;  %v650_v4 = vpop.permute.xlu0 %649 }
 0x165   :  { %11906 = vst [vmem:[#allocation140_spill] sm:$0xff] %v8076_v63  ;;  %11907 = vst [vmem:[#allocation141_spill] sm:$0xff] %v8079_v23  ;;  %v3399_v62 = vcombine.low %v632_v54, %v654_v31  ;;  %v3400_v18 = vcombine.high %v632_v54, %v654_v31  ;;  %v3127_v21 = vcombine.low %v628_v14, %v650_v4 }
 0x166   :  { %v3128_v33 = vcombine.high %v628_v14, %v650_v4  ;;  %972 = vbcast.lane.b32.xlu1 %v966_v0, 264  ;;  %968 = vbcast.lane.b32.xlu0 %v966_v0, 256  ;;  %11910 = vst [vmem:[#allocation144_spill] sm:$0xff] %v8091_v45  ;;  %v8102_v0 = vrot.slane %v3416_v5, %v7343_v50 }
 0x167   :  { %v8084_v43 = vrot.slane %v3399_v62, %v7292_v56  ;;  %v8087_v52 = vrot.slane %v3400_v18, %v7292_v56  ;;  %v3135_v31 = vrot.slane %v3127_v21, %v7292_v56  ;;  %v988_v21 = vrot.slane %v8024_v32, %v7258_v15 }
 0x168   :  { %v8095_v4 = vrot.slane %v3128_v33, %v7292_v56  ;;  %v665_v41 = vpop.permute.xlu1 %664  ;;  %v661_v1 = vpop.permute.xlu0 %660  ;;  %11912 = vst [vmem:[#allocation146_spill] sm:$0xff] %v8102_v0  ;;  %v8109_v14 = vrot.slane %v3143_v19, %v7343_v50  ;;  %v999_v19 = vrot.slane %v8024_v32, %v7262_v17  ;;  %v11919_v32 = vcombine.high %v8045_v55, %v8053_v36 }
 0x169   :  { %11908 = vst [vmem:[#allocation142_spill] sm:$0xff] %v8084_v43  ;;  %11909 = vst [vmem:[#allocation143_spill] sm:$0xff] %v8087_v52  ;;  %v3448_v37 = vcombine.high %v8076_v63, %v8084_v43  ;;  %v3464_v62 = vcombine.high %v8079_v23, %v8087_v52  ;;  %v3175_v22 = vcombine.low %v3119_v57, %v3135_v31 }
 0x16a   :  { %11911 = vst [vmem:[#allocation145_spill] sm:$0xff] %v8095_v4  ;;  %v3176_v54 = vcombine.high %v3119_v57, %v3135_v31  ;;  %v3192_v61 = vcombine.high %v8091_v45, %v8095_v4  ;;  %983 = vbcast.lane.b32.xlu1 %v977_v6, 264  ;;  %979 = vbcast.lane.b32.xlu0 %v977_v6, 256  ;;  %11913 = vst [vmem:[#allocation147_spill] sm:$0xff] %v8109_v14 }
 0x16b   :  { %v8112_v18 = vrot.slane %v3448_v37, %v7343_v50  ;;  %v8115_v5 = vrot.slane %v3175_v22, %v7343_v50  ;;  %v8118_v57 = vrot.slane %v3144_v10, %v7343_v50  ;;  %v8129_v37 = vrot.slane %v3160_v40, %v7343_v50  ;;  %v8145_v40 = vld [vmem:[#allocation2 + $0x58] sm:$0xff] }
 0x16c   :  { %v676_v33 = vpop.permute.xlu1 %675  ;;  %v8121_v31 = vrot.slane %v3176_v54, %v7343_v50  ;;  %v8124_v23 = vrot.slane %v3192_v61, %v7343_v50  ;;  %v672_v6 = vpop.permute.xlu0 %671  ;;  %v8143_v52 = vrot.slane %v11919_v32, %v7343_v50  ;;  %v8154_v61 = vrot.slane %v3464_v62, %v7343_v50 }
 0x16d   :  { %11914 = vst [vmem:[#allocation148_spill] sm:$0xff] %v8112_v18  ;;  %11915 = vst [vmem:[#allocation149_spill] sm:$0xff] %v8115_v5  ;;  %v1021_v22 = vrot.slane %v8145_v40, %v7234_v2 }
 0x16e   :  { %11916 = vst [vmem:[#allocation150_spill] sm:$0xff] %v8121_v31  ;;  %11917 = vst [vmem:[#allocation151_spill] sm:$0xff] %v8124_v23  ;;  %994 = vbcast.lane.b32.xlu1 %v988_v21, 264  ;;  %990 = vbcast.lane.b32.xlu0 %v988_v21, 256  ;;  %v1010_v21 = vrot.slane %v8145_v40, %v7237_v3 }
 0x16f   :  { %11918 = vst [vmem:[#allocation152_spill] sm:$0xff] %v8129_v37  ;;  %11920 = vst [vmem:[#allocation153_spill] sm:$0xff] %v8143_v52 }
 0x170   :  { %v687_v63 = vpop.permute.xlu1 %686  ;;  %11921 = vst [vmem:[#allocation154_spill] sm:$0xff] %v8154_v61  ;;  %v683_v32 = vpop.permute.xlu0 %682 }
 0x171   :  { %v3487_v43 = vcombine.low %v665_v41, %v687_v63  ;;  %v3488_v55 = vcombine.high %v665_v41, %v687_v63  ;;  %v3215_v36 = vcombine.low %v661_v1, %v683_v32  ;;  %v3216_v23 = vcombine.high %v661_v1, %v683_v32 }
 0x172   :  { %1005 = vbcast.lane.b32.xlu1 %v999_v19, 264  ;;  %1001 = vbcast.lane.b32.xlu0 %v999_v19, 256 }
 0x173   :  { %v8163_v62 = vrot.slane %v3487_v43, %v7292_v56  ;;  %v8166_v63 = vrot.slane %v3488_v55, %v7292_v56  ;;  %v3223_v43 = vrot.slane %v3215_v36, %v7292_v56  ;;  %v8178_v55 = vrot.slane %v3216_v23, %v7292_v56 }
 0x174   :  { %v698_v54 = vpop.permute.xlu1 %697  ;;  %v694_v0 = vpop.permute.xlu0 %693  ;;  %v1032_v23 = vrot.slane %v8145_v40, %v7242_v7 }
 0x175   :  { %11922 = vst [vmem:[#allocation155_spill] sm:$0xff] %v8163_v62  ;;  %11923 = vst [vmem:[#allocation156_spill] sm:$0xff] %v8166_v63  ;;  %v3503_v41 = vcombine.low %v676_v33, %v698_v54  ;;  %v3504_v18 = vcombine.high %v676_v33, %v698_v54  ;;  %v3231_v37 = vcombine.low %v672_v6, %v694_v0 }
 0x176   :  { %v3232_v45 = vcombine.high %v672_v6, %v694_v0  ;;  %1016 = vbcast.lane.b32.xlu1 %v1010_v21, 264  ;;  %1012 = vbcast.lane.b32.xlu0 %v1010_v21, 256  ;;  %11926 = vst [vmem:[#allocation159_spill] sm:$0xff] %v8178_v55  ;;  %v1043_v21 = vrot.slane %v8145_v40, %v7246_v9 }
 0x177   :  { %v8171_v19 = vrot.slane %v3503_v41, %v7292_v56  ;;  %v8174_v1 = vrot.slane %v3504_v18, %v7292_v56  ;;  %v3239_v33 = vrot.slane %v3231_v37, %v7292_v56 }
 0x178   :  { %v8182_v0 = vrot.slane %v3232_v45, %v7292_v56  ;;  %v709_v6 = vpop.permute.xlu1 %708  ;;  %v705_v18 = vpop.permute.xlu0 %704 }
 0x179   :  { %11924 = vst [vmem:[#allocation157_spill] sm:$0xff] %v8171_v19  ;;  %11925 = vst [vmem:[#allocation158_spill] sm:$0xff] %v8174_v1  ;;  %v3552_v54 = vcombine.high %v8163_v62, %v8171_v19  ;;  %v3280_v41 = vcombine.high %v3223_v43, %v3239_v33  ;;  %v1054_v62 = vrot.slane %v8145_v40, %v7250_v11 }
 0x17a   :  { %11927 = vst [vmem:[#allocation160_spill] sm:$0xff] %v8182_v0  ;;  %v3296_v36 = vcombine.high %v8178_v55, %v8182_v0  ;;  %1027 = vbcast.lane.b32.xlu1 %v1021_v22, 264  ;;  %1023 = vbcast.lane.b32.xlu0 %v1021_v22, 256  ;;  %v3279_v46 = vcombine.low %v3223_v43, %v3239_v33 }
 0x17c   :  { %v720_v37 = vpop.permute.xlu1 %719  ;;  %v716_v45 = vpop.permute.xlu0 %715 }
 0x17e   :  { %1038 = vbcast.lane.b32.xlu1 %v1032_v23, 264  ;;  %1034 = vbcast.lane.b32.xlu0 %v1032_v23, 256 }
 0x180   :  { %v731_v10 = vpop.permute.xlu1 %730  ;;  %v727_v52 = vpop.permute.xlu0 %726 }
 0x181   :  { %v3519_v61 = vcombine.low %v709_v6, %v731_v10  ;;  %v3520_v32 = vcombine.high %v709_v6, %v731_v10  ;;  %v3247_v19 = vcombine.low %v705_v18, %v727_v52  ;;  %v3248_v55 = vcombine.high %v705_v18, %v727_v52 }
 0x182   :  { %1049 = vbcast.lane.b32.xlu1 %v1043_v21, 264  ;;  %1045 = vbcast.lane.b32.xlu0 %v1043_v21, 256  ;;  %v1065_v6 = vrot.slane %v8145_v40, %v7254_v13 }
 0x183   :  { %v8197_v22 = vrot.slane %v3519_v61, %v7292_v56  ;;  %v8200_v4 = vrot.slane %v3520_v32, %v7292_v56  ;;  %v3255_v61 = vrot.slane %v3247_v19, %v7292_v56  ;;  %v8212_v32 = vrot.slane %v3248_v55, %v7292_v56 }
 0x184   :  { %v742_v0 = vpop.permute.xlu1 %741  ;;  %v738_v58 = vpop.permute.xlu0 %737 }
 0x185   :  { %11928 = vst [vmem:[#allocation161_spill] sm:$0xff] %v8197_v22  ;;  %11929 = vst [vmem:[#allocation162_spill] sm:$0xff] %v8200_v4  ;;  %v3535_v59 = vcombine.low %v720_v37, %v742_v0  ;;  %v3536_v23 = vcombine.high %v720_v37, %v742_v0  ;;  %v3263_v26 = vcombine.low %v716_v45, %v738_v58 }
 0x186   :  { %v3264_v10 = vcombine.high %v716_v45, %v738_v58  ;;  %1060 = vbcast.lane.b32.xlu1 %v1054_v62, 264  ;;  %1056 = vbcast.lane.b32.xlu0 %v1054_v62, 256  ;;  %11932 = vst [vmem:[#allocation165_spill] sm:$0xff] %v8212_v32  ;;  %v8223_v62 = vrot.slane %v3552_v54, %v7343_v50 }
 0x187   :  { %v8205_v21 = vrot.slane %v3535_v59, %v7292_v56  ;;  %v8208_v52 = vrot.slane %v3536_v23, %v7292_v56  ;;  %v3271_v0 = vrot.slane %v3263_v26, %v7292_v56  ;;  %v1076_v26 = vrot.slane %v8145_v40, %v7258_v15 }
 0x188   :  { %v8216_v58 = vrot.slane %v3264_v10, %v7292_v56  ;;  %v753_v18 = vpop.permute.xlu1 %752  ;;  %v749_v33 = vpop.permute.xlu0 %748  ;;  %11934 = vst [vmem:[#allocation167_spill] sm:$0xff] %v8223_v62  ;;  %v8230_v45 = vrot.slane %v3279_v46, %v7343_v50  ;;  %v1087_v46 = vrot.slane %v8145_v40, %v7262_v17  ;;  %v11942_v40 = vcombine.high %v8166_v63, %v8174_v1 }
 0x189   :  { %11930 = vst [vmem:[#allocation163_spill] sm:$0xff] %v8205_v21  ;;  %11931 = vst [vmem:[#allocation164_spill] sm:$0xff] %v8208_v52  ;;  %v3584_v43 = vcombine.high %v8197_v22, %v8205_v21  ;;  %v3600_v59 = vcombine.high %v8200_v4, %v8208_v52  ;;  %v3311_v19 = vcombine.low %v3255_v61, %v3271_v0 }
 0x18a   :  { %11933 = vst [vmem:[#allocation166_spill] sm:$0xff] %v8216_v58  ;;  %v3312_v37 = vcombine.high %v3255_v61, %v3271_v0  ;;  %v3328_v55 = vcombine.high %v8212_v32, %v8216_v58  ;;  %1071 = vbcast.lane.b32.xlu1 %v1065_v6, 264  ;;  %1067 = vbcast.lane.b32.xlu0 %v1065_v6, 256  ;;  %11935 = vst [vmem:[#allocation168_spill] sm:$0xff] %v8230_v45 }
 0x18b   :  { %v8233_v23 = vrot.slane %v3584_v43, %v7343_v50  ;;  %v8236_v54 = vrot.slane %v3311_v19, %v7343_v50  ;;  %v8239_v61 = vrot.slane %v3280_v41, %v7343_v50  ;;  %v8250_v43 = vrot.slane %v3296_v36, %v7343_v50  ;;  %v8266_v36 = vld [vmem:[#allocation2 + $0x60] sm:$0xff] }
 0x18c   :  { %v764_v10 = vpop.permute.xlu1 %763  ;;  %v8242_v0 = vrot.slane %v3312_v37, %v7343_v50  ;;  %v8245_v4 = vrot.slane %v3328_v55, %v7343_v50  ;;  %v760_v6 = vpop.permute.xlu0 %759  ;;  %v8264_v52 = vrot.slane %v11942_v40, %v7343_v50  ;;  %v8275_v55 = vrot.slane %v3600_v59, %v7343_v50 }
 0x18d   :  { %11936 = vst [vmem:[#allocation169_spill] sm:$0xff] %v8233_v23  ;;  %11937 = vst [vmem:[#allocation170_spill] sm:$0xff] %v8236_v54  ;;  %v1109_v19 = vrot.slane %v8266_v36, %v7234_v2 }
 0x18e   :  { %11938 = vst [vmem:[#allocation171_spill] sm:$0xff] %v8239_v61  ;;  %11939 = vst [vmem:[#allocation172_spill] sm:$0xff] %v8242_v0  ;;  %1082 = vbcast.lane.b32.xlu1 %v1076_v26, 264  ;;  %1078 = vbcast.lane.b32.xlu0 %v1076_v26, 256  ;;  %v1098_v26 = vrot.slane %v8266_v36, %v7237_v3 }
 0x18f   :  { %11940 = vst [vmem:[#allocation173_spill] sm:$0xff] %v8245_v4  ;;  %11941 = vst [vmem:[#allocation174_spill] sm:$0xff] %v8250_v43 }
 0x190   :  { %11943 = vst [vmem:[#allocation175_spill] sm:$0xff] %v8264_v52  ;;  %v775_v22 = vpop.permute.xlu1 %774  ;;  %11944 = vst [vmem:[#allocation176_spill] sm:$0xff] %v8275_v55  ;;  %v771_v40 = vpop.permute.xlu0 %770 }
 0x191   :  { %v3895_v21 = vcombine.low %v753_v18, %v775_v22  ;;  %v3896_v63 = vcombine.high %v753_v18, %v775_v22  ;;  %v3623_v1 = vcombine.low %v749_v33, %v771_v40  ;;  %v3624_v4 = vcombine.high %v749_v33, %v771_v40 }
 0x192   :  { %1093 = vbcast.lane.b32.xlu1 %v1087_v46, 264  ;;  %1089 = vbcast.lane.b32.xlu0 %v1087_v46, 256 }
 0x193   :  { %v8284_v59 = vrot.slane %v3895_v21, %v7292_v56  ;;  %v8287_v22 = vrot.slane %v3896_v63, %v7292_v56  ;;  %v3631_v21 = vrot.slane %v3623_v1, %v7292_v56  ;;  %v8299_v63 = vrot.slane %v3624_v4, %v7292_v56 }
 0x194   :  { %v786_v37 = vpop.permute.xlu1 %785  ;;  %v782_v62 = vpop.permute.xlu0 %781  ;;  %v1120_v4 = vrot.slane %v8266_v36, %v7242_v7 }
 0x195   :  { %11945 = vst [vmem:[#allocation177_spill] sm:$0xff] %v8284_v59  ;;  %11946 = vst [vmem:[#allocation178_spill] sm:$0xff] %v8287_v22  ;;  %v3911_v18 = vcombine.low %v764_v10, %v786_v37  ;;  %v3912_v23 = vcombine.high %v764_v10, %v786_v37  ;;  %v3639_v43 = vcombine.low %v760_v6, %v782_v62 }
 0x196   :  { %v3640_v32 = vcombine.high %v760_v6, %v782_v62  ;;  %1104 = vbcast.lane.b32.xlu1 %v1098_v26, 264  ;;  %1100 = vbcast.lane.b32.xlu0 %v1098_v26, 256  ;;  %11949 = vst [vmem:[#allocation181_spill] sm:$0xff] %v8299_v63  ;;  %v1131_v26 = vrot.slane %v8266_v36, %v7246_v9 }
 0x197   :  { %v8292_v46 = vrot.slane %v3911_v18, %v7292_v56  ;;  %v8295_v33 = vrot.slane %v3912_v23, %v7292_v56  ;;  %v3647_v10 = vrot.slane %v3639_v43, %v7292_v56 }
 0x198   :  { %v8303_v62 = vrot.slane %v3640_v32, %v7292_v56  ;;  %v797_v6 = vpop.permute.xlu1 %796  ;;  %v793_v23 = vpop.permute.xlu0 %792 }
 0x199   :  { %11947 = vst [vmem:[#allocation179_spill] sm:$0xff] %v8292_v46  ;;  %11948 = vst [vmem:[#allocation180_spill] sm:$0xff] %v8295_v33  ;;  %v3960_v37 = vcombine.high %v8284_v59, %v8292_v46  ;;  %v3976_v40 = vcombine.high %v8287_v22, %v8295_v33  ;;  %v3688_v18 = vcombine.high %v3631_v21, %v3647_v10 }
 0x19a   :  { %11950 = vst [vmem:[#allocation182_spill] sm:$0xff] %v8303_v62  ;;  %v3704_v1 = vcombine.high %v8299_v63, %v8303_v62  ;;  %1115 = vbcast.lane.b32.xlu1 %v1109_v19, 264  ;;  %1111 = vbcast.lane.b32.xlu0 %v1109_v19, 256  ;;  %v1142_v33 = vrot.slane %v8266_v36, %v7250_v11 }
 0x19b   :  { %v3687_v60 = vcombine.low %v3631_v21, %v3647_v10 }
 0x19c   :  { %v808_v43 = vpop.permute.xlu1 %807  ;;  %v804_v32 = vpop.permute.xlu0 %803 }
 0x19e   :  { %1126 = vbcast.lane.b32.xlu1 %v1120_v4, 264  ;;  %1122 = vbcast.lane.b32.xlu0 %v1120_v4, 256 }
 0x1a0   :  { %v819_v41 = vpop.permute.xlu1 %818  ;;  %v815_v22 = vpop.permute.xlu0 %814 }
 0x1a1   :  { %v3927_v55 = vcombine.low %v797_v6, %v819_v41  ;;  %v3928_v52 = vcombine.high %v797_v6, %v819_v41  ;;  %v3655_v59 = vcombine.low %v793_v23, %v815_v22  ;;  %v3656_v46 = vcombine.high %v793_v23, %v815_v22 }
 0x1a2   :  { %1137 = vbcast.lane.b32.xlu1 %v1131_v26, 264  ;;  %1133 = vbcast.lane.b32.xlu0 %v1131_v26, 256  ;;  %v1153_v6 = vrot.slane %v8266_v36, %v7254_v13 }
 0x1a3   :  { %v8318_v19 = vrot.slane %v3927_v55, %v7292_v56  ;;  %v8321_v63 = vrot.slane %v3928_v52, %v7292_v56  ;;  %v3663_v52 = vrot.slane %v3655_v59, %v7292_v56  ;;  %v8333_v55 = vrot.slane %v3656_v46, %v7292_v56 }
 0x1a4   :  { %v830_v58 = vpop.permute.xlu1 %829  ;;  %v826_v0 = vpop.permute.xlu0 %825 }
 0x1a5   :  { %11951 = vst [vmem:[#allocation183_spill] sm:$0xff] %v8318_v19  ;;  %11952 = vst [vmem:[#allocation184_spill] sm:$0xff] %v8321_v63  ;;  %v3943_v62 = vcombine.low %v808_v43, %v830_v58  ;;  %v3944_v4 = vcombine.high %v808_v43, %v830_v58  ;;  %v3671_v61 = vcombine.low %v804_v32, %v826_v0 }
 0x1a6   :  { %v3672_v41 = vcombine.high %v804_v32, %v826_v0  ;;  %1148 = vbcast.lane.b32.xlu1 %v1142_v33, 264  ;;  %1144 = vbcast.lane.b32.xlu0 %v1142_v33, 256  ;;  %11955 = vst [vmem:[#allocation187_spill] sm:$0xff] %v8333_v55  ;;  %v8344_v33 = vrot.slane %v3960_v37, %v7343_v50 }
 0x1a7   :  { %v8326_v26 = vrot.slane %v3943_v62, %v7292_v56  ;;  %v8329_v22 = vrot.slane %v3944_v4, %v7292_v56  ;;  %v3679_v58 = vrot.slane %v3671_v61, %v7292_v56  ;;  %v1164_v61 = vrot.slane %v8266_v36, %v7258_v15 }
 0x1a8   :  { %v8337_v0 = vrot.slane %v3672_v41, %v7292_v56  ;;  %v841_v23 = vpop.permute.xlu1 %840  ;;  %v837_v62 = vpop.permute.xlu0 %836  ;;  %11957 = vst [vmem:[#allocation189_spill] sm:$0xff] %v8344_v33  ;;  %v8351_v32 = vrot.slane %v3687_v60, %v7343_v50  ;;  %v8354_v4 = vrot.slane %v3688_v18, %v7343_v50  ;;  %v8360_v37 = vrot.slane %v3976_v40, %v7343_v50 }
 0x1a9   :  { %11953 = vst [vmem:[#allocation185_spill] sm:$0xff] %v8326_v26  ;;  %11954 = vst [vmem:[#allocation186_spill] sm:$0xff] %v8329_v22  ;;  %v3992_v21 = vcombine.high %v8318_v19, %v8326_v26  ;;  %v4008_v10 = vcombine.high %v8321_v63, %v8329_v22  ;;  %v3719_v59 = vcombine.low %v3663_v52, %v3679_v58  ;;  %v8389_v22 = vld [vmem:[#allocation2 + $0x68] sm:$0xff] }
 0x1aa   :  { %11956 = vst [vmem:[#allocation188_spill] sm:$0xff] %v8337_v0  ;;  %v3720_v43 = vcombine.high %v3663_v52, %v3679_v58  ;;  %v3736_v46 = vcombine.high %v8333_v55, %v8337_v0  ;;  %1159 = vbcast.lane.b32.xlu1 %v1153_v6, 264  ;;  %1155 = vbcast.lane.b32.xlu0 %v1153_v6, 256  ;;  %11958 = vst [vmem:[#allocation190_spill] sm:$0xff] %v8351_v32 }
 0x1ab   :  { %11959 = vst [vmem:[#allocation191_spill] sm:$0xff] %v8354_v4  ;;  %v8357_v41 = vrot.slane %v3992_v21, %v7343_v50  ;;  %11961 = vst [vmem:[#allocation193_spill] sm:$0xff] %v8360_v37  ;;  %v8363_v58 = vrot.slane %v3719_v59, %v7343_v50  ;;  %v8372_v60 = vrot.slane %v4008_v10, %v7343_v50 }
 0x1ac   :  { %v852_v52 = vpop.permute.xlu1 %851  ;;  %v8366_v63 = vrot.slane %v3720_v43, %v7343_v50  ;;  %v8369_v6 = vrot.slane %v3736_v46, %v7343_v50  ;;  %v848_v18 = vpop.permute.xlu0 %847  ;;  %v8375_v21 = vrot.slane %v3704_v1, %v7343_v50  ;;  %v1175_v43 = vrot.slane %v8266_v36, %v7262_v17 }
 0x1ad   :  { %11960 = vst [vmem:[#allocation192_spill] sm:$0xff] %v8357_v41  ;;  %11962 = vst [vmem:[#allocation194_spill] sm:$0xff] %v8363_v58 }
 0x1ae   :  { %11963 = vst [vmem:[#allocation195_spill] sm:$0xff] %v8366_v63  ;;  %11964 = vst [vmem:[#allocation196_spill] sm:$0xff] %v8369_v6  ;;  %1170 = vbcast.lane.b32.xlu1 %v1164_v61, 264  ;;  %1166 = vbcast.lane.b32.xlu0 %v1164_v61, 256  ;;  %v1186_v61 = vrot.slane %v8389_v22, %v7237_v3 }
 0x1af   :  { %11965 = vst [vmem:[#allocation197_spill] sm:$0xff] %v8372_v60  ;;  %11966 = vst [vmem:[#allocation198_spill] sm:$0xff] %v8375_v21 }
 0x1b0   :  { %v863_v41 = vpop.permute.xlu1 %862  ;;  %v859_v19 = vpop.permute.xlu0 %858 }
 0x1b1   :  { %v4031_v10 = vcombine.low %v841_v23, %v863_v41  ;;  %v4032_v33 = vcombine.high %v841_v23, %v863_v41  ;;  %v3759_v1 = vcombine.low %v837_v62, %v859_v19  ;;  %v3760_v40 = vcombine.high %v837_v62, %v859_v19 }
 0x1b2   :  { %1181 = vbcast.lane.b32.xlu1 %v1175_v43, 264  ;;  %1177 = vbcast.lane.b32.xlu0 %v1175_v43, 256  ;;  %v1197_v41 = vrot.slane %v8389_v22, %v7234_v2 }
 0x1b3   :  { %v8402_v59 = vrot.slane %v4031_v10, %v7292_v56  ;;  %v8405_v6 = vrot.slane %v4032_v33, %v7292_v56  ;;  %v3767_v62 = vrot.slane %v3759_v1, %v7292_v56  ;;  %v8417_v33 = vrot.slane %v3760_v40, %v7292_v56 }
 0x1b4   :  { %v874_v26 = vpop.permute.xlu1 %873  ;;  %v870_v46 = vpop.permute.xlu0 %869  ;;  %v1208_v40 = vrot.slane %v8389_v22, %v7242_v7 }
 0x1b5   :  { %11967 = vst [vmem:[#allocation199_spill] sm:$0xff] %v8402_v59  ;;  %11968 = vst [vmem:[#allocation200_spill] sm:$0xff] %v8405_v6  ;;  %v4047_v36 = vcombine.low %v852_v52, %v874_v26  ;;  %v4048_v21 = vcombine.high %v852_v52, %v874_v26  ;;  %v3775_v60 = vcombine.low %v848_v18, %v870_v46 }
 0x1b6   :  { %v3776_v23 = vcombine.high %v848_v18, %v870_v46  ;;  %1192 = vbcast.lane.b32.xlu1 %v1186_v61, 264  ;;  %1188 = vbcast.lane.b32.xlu0 %v1186_v61, 256  ;;  %11971 = vst [vmem:[#allocation203_spill] sm:$0xff] %v8417_v33 }
 0x1b7   :  { %v8410_v43 = vrot.slane %v4047_v36, %v7292_v56  ;;  %v8413_v19 = vrot.slane %v4048_v21, %v7292_v56  ;;  %v3783_v26 = vrot.slane %v3775_v60, %v7292_v56 }
 0x1b8   :  { %v8421_v52 = vrot.slane %v3776_v23, %v7292_v56  ;;  %v885_v18 = vpop.permute.xlu1 %884  ;;  %v881_v21 = vpop.permute.xlu0 %880  ;;  %v1219_v23 = vrot.slane %v8389_v22, %v7246_v9 }
 0x1b9   :  { %11969 = vst [vmem:[#allocation201_spill] sm:$0xff] %v8410_v43  ;;  %11970 = vst [vmem:[#allocation202_spill] sm:$0xff] %v8413_v19  ;;  %v4096_v46 = vcombine.high %v8402_v59, %v8410_v43  ;;  %v4112_v10 = vcombine.high %v8405_v6, %v8413_v19  ;;  %v3824_v36 = vcombine.high %v3767_v62, %v3783_v26 }
 0x1ba   :  { %11972 = vst [vmem:[#allocation204_spill] sm:$0xff] %v8421_v52  ;;  %v3840_v1 = vcombine.high %v8417_v33, %v8421_v52  ;;  %1203 = vbcast.lane.b32.xlu1 %v1197_v41, 264  ;;  %1199 = vbcast.lane.b32.xlu0 %v1197_v41, 256  ;;  %v1230_v43 = vrot.slane %v8389_v22, %v7250_v11 }
 0x1bb   :  { %v3823_v63 = vcombine.low %v3767_v62, %v3783_v26 }
 0x1bc   :  { %v896_v60 = vpop.permute.xlu1 %895  ;;  %v892_v61 = vpop.permute.xlu0 %891 }
 0x1be   :  { %1214 = vbcast.lane.b32.xlu1 %v1208_v40, 264  ;;  %1210 = vbcast.lane.b32.xlu0 %v1208_v40, 256 }
 0x1c0   :  { %v907_v37 = vpop.permute.xlu1 %906  ;;  %v903_v19 = vpop.permute.xlu0 %902 }
 0x1c1   :  { %v4063_v59 = vcombine.low %v885_v18, %v907_v37  ;;  %v4064_v6 = vcombine.high %v885_v18, %v907_v37  ;;  %v3791_v33 = vcombine.low %v881_v21, %v903_v19  ;;  %v3792_v52 = vcombine.high %v881_v21, %v903_v19 }
 0x1c2   :  { %1225 = vbcast.lane.b32.xlu1 %v1219_v23, 264  ;;  %1221 = vbcast.lane.b32.xlu0 %v1219_v23, 256  ;;  %v1241_v18 = vrot.slane %v8389_v22, %v7254_v13 }
 0x1c3   :  { %v8436_v41 = vrot.slane %v4063_v59, %v7292_v56  ;;  %v8439_v0 = vrot.slane %v4064_v6, %v7292_v56  ;;  %v3799_v6 = vrot.slane %v3791_v33, %v7292_v56  ;;  %v8451_v59 = vrot.slane %v3792_v52, %v7292_v56 }
 0x1c4   :  { %v918_v55 = vpop.permute.xlu1 %917  ;;  %v914_v27 = vpop.permute.xlu0 %913 }
 0x1c5   :  { %11973 = vst [vmem:[#allocation205_spill] sm:$0xff] %v8436_v41  ;;  %11974 = vst [vmem:[#allocation206_spill] sm:$0xff] %v8439_v0  ;;  %v4079_v8 = vcombine.low %v896_v60, %v918_v55  ;;  %v4080_v40 = vcombine.high %v896_v60, %v918_v55  ;;  %v3807_v53 = vcombine.low %v892_v61, %v914_v27 }
 0x1c6   :  { %v3808_v37 = vcombine.high %v892_v61, %v914_v27  ;;  %1236 = vbcast.lane.b32.xlu1 %v1230_v43, 264  ;;  %1232 = vbcast.lane.b32.xlu0 %v1230_v43, 256  ;;  %11977 = vst [vmem:[#allocation209_spill] sm:$0xff] %v8451_v59  ;;  %v8462_v43 = vrot.slane %v4096_v46, %v7343_v50 }
 0x1c7   :  { %v8444_v23 = vrot.slane %v4079_v8, %v7292_v56  ;;  %v8447_v19 = vrot.slane %v4080_v40, %v7292_v56  ;;  %v3815_v55 = vrot.slane %v3807_v53, %v7292_v56  ;;  %v1252_v53 = vrot.slane %v8389_v22, %v7258_v15 }
 0x1c8   :  { %v8455_v27 = vrot.slane %v3808_v37, %v7292_v56  ;;  %v929_v21 = vpop.permute.xlu1 %928  ;;  %v925_v26 = vpop.permute.xlu0 %924  ;;  %11979 = vst [vmem:[#allocation211_spill] sm:$0xff] %v8462_v43  ;;  %v8469_v61 = vrot.slane %v3823_v63, %v7343_v50  ;;  %v8472_v40 = vrot.slane %v3824_v36, %v7343_v50  ;;  %v8478_v46 = vrot.slane %v4112_v10, %v7343_v50 }
 0x1c9   :  { %11975 = vst [vmem:[#allocation207_spill] sm:$0xff] %v8444_v23  ;;  %11976 = vst [vmem:[#allocation208_spill] sm:$0xff] %v8447_v19  ;;  %v4128_v62 = vcombine.high %v8436_v41, %v8444_v23  ;;  %v4144_v8 = vcombine.high %v8439_v0, %v8447_v19  ;;  %v3855_v33 = vcombine.low %v3799_v6, %v3815_v55  ;;  %v8507_v19 = vld [vmem:[#allocation2 + $0x70] sm:$0xff] }
 0x1ca   :  { %11978 = vst [vmem:[#allocation210_spill] sm:$0xff] %v8455_v27  ;;  %v3856_v60 = vcombine.high %v3799_v6, %v3815_v55  ;;  %v3872_v52 = vcombine.high %v8451_v59, %v8455_v27  ;;  %1247 = vbcast.lane.b32.xlu1 %v1241_v18, 264  ;;  %1243 = vbcast.lane.b32.xlu0 %v1241_v18, 256  ;;  %11980 = vst [vmem:[#allocation212_spill] sm:$0xff] %v8469_v61 }
 0x1cb   :  { %11981 = vst [vmem:[#allocation213_spill] sm:$0xff] %v8472_v40  ;;  %v8475_v37 = vrot.slane %v4128_v62, %v7343_v50  ;;  %11983 = vst [vmem:[#allocation215_spill] sm:$0xff] %v8478_v46  ;;  %v8481_v55 = vrot.slane %v3855_v33, %v7343_v50  ;;  %v8490_v63 = vrot.slane %v4144_v8, %v7343_v50 }
 0x1cc   :  { %v940_v6 = vpop.permute.xlu1 %939  ;;  %v8484_v0 = vrot.slane %v3856_v60, %v7343_v50  ;;  %v8487_v18 = vrot.slane %v3872_v52, %v7343_v50  ;;  %v936_v36 = vpop.permute.xlu0 %935  ;;  %v8493_v62 = vrot.slane %v3840_v1, %v7343_v50  ;;  %v1263_v60 = vrot.slane %v8389_v22, %v7262_v17 }
 0x1cd   :  { %11982 = vst [vmem:[#allocation214_spill] sm:$0xff] %v8475_v37  ;;  %11984 = vst [vmem:[#allocation216_spill] sm:$0xff] %v8481_v55 }
 0x1ce   :  { %11985 = vst [vmem:[#allocation217_spill] sm:$0xff] %v8484_v0  ;;  %11986 = vst [vmem:[#allocation218_spill] sm:$0xff] %v8487_v18  ;;  %1258 = vbcast.lane.b32.xlu1 %v1252_v53, 264  ;;  %1254 = vbcast.lane.b32.xlu0 %v1252_v53, 256  ;;  %v1274_v53 = vrot.slane %v8507_v19, %v7237_v3 }
 0x1cf   :  { %11987 = vst [vmem:[#allocation219_spill] sm:$0xff] %v8490_v63  ;;  %11988 = vst [vmem:[#allocation220_spill] sm:$0xff] %v8493_v62 }
 0x1d0   :  { %v951_v37 = vpop.permute.xlu1 %950  ;;  %v947_v41 = vpop.permute.xlu0 %946 }
 0x1d1   :  { %v4439_v8 = vcombine.low %v929_v21, %v951_v37  ;;  %v4440_v43 = vcombine.high %v929_v21, %v951_v37  ;;  %v4167_v1 = vcombine.low %v925_v26, %v947_v41  ;;  %v4168_v10 = vcombine.high %v925_v26, %v947_v41 }
 0x1d2   :  { %1269 = vbcast.lane.b32.xlu1 %v1263_v60, 264  ;;  %1265 = vbcast.lane.b32.xlu0 %v1263_v60, 256  ;;  %v1285_v37 = vrot.slane %v8507_v19, %v7234_v2 }
 0x1d3   :  { %v8520_v33 = vrot.slane %v4439_v8, %v7292_v56  ;;  %v8523_v18 = vrot.slane %v4440_v43, %v7292_v56  ;;  %v4175_v26 = vrot.slane %v4167_v1, %v7292_v56  ;;  %v8535_v43 = vrot.slane %v4168_v10, %v7292_v56 }
 0x1d4   :  { %v962_v23 = vpop.permute.xlu1 %961  ;;  %v958_v52 = vpop.permute.xlu0 %957  ;;  %v1296_v10 = vrot.slane %v8507_v19, %v7242_v7 }
 0x1d5   :  { %11989 = vst [vmem:[#allocation221_spill] sm:$0xff] %v8520_v33  ;;  %11990 = vst [vmem:[#allocation222_spill] sm:$0xff] %v8523_v18  ;;  %v4455_v22 = vcombine.low %v940_v6, %v962_v23  ;;  %v4456_v62 = vcombine.high %v940_v6, %v962_v23  ;;  %v4183_v63 = vcombine.low %v936_v36, %v958_v52 }
 0x1d6   :  { %v4184_v21 = vcombine.high %v936_v36, %v958_v52  ;;  %1280 = vbcast.lane.b32.xlu1 %v1274_v53, 264  ;;  %1276 = vbcast.lane.b32.xlu0 %v1274_v53, 256  ;;  %11993 = vst [vmem:[#allocation225_spill] sm:$0xff] %v8535_v43 }
 0x1d7   :  { %v8528_v60 = vrot.slane %v4455_v22, %v7292_v56  ;;  %v8531_v41 = vrot.slane %v4456_v62, %v7292_v56  ;;  %v4191_v23 = vrot.slane %v4183_v63, %v7292_v56 }
 0x1d8   :  { %v8539_v6 = vrot.slane %v4184_v21, %v7292_v56  ;;  %v973_v36 = vpop.permute.xlu1 %972  ;;  %v969_v62 = vpop.permute.xlu0 %968  ;;  %v1307_v21 = vrot.slane %v8507_v19, %v7246_v9 }
 0x1d9   :  { %11991 = vst [vmem:[#allocation223_spill] sm:$0xff] %v8528_v60  ;;  %11992 = vst [vmem:[#allocation224_spill] sm:$0xff] %v8531_v41  ;;  %v4504_v52 = vcombine.high %v8520_v33, %v8528_v60  ;;  %v4520_v8 = vcombine.high %v8523_v18, %v8531_v41  ;;  %v4232_v22 = vcombine.high %v4175_v26, %v4191_v23 }
 0x1da   :  { %11994 = vst [vmem:[#allocation226_spill] sm:$0xff] %v8539_v6  ;;  %v4248_v1 = vcombine.high %v8535_v43, %v8539_v6  ;;  %1291 = vbcast.lane.b32.xlu1 %v1285_v37, 264  ;;  %1287 = vbcast.lane.b32.xlu0 %v1285_v37, 256  ;;  %v1318_v60 = vrot.slane %v8507_v19, %v7250_v11 }
 0x1db   :  { %v4231_v31 = vcombine.low %v4175_v26, %v4191_v23 }
 0x1dc   :  { %v984_v63 = vpop.permute.xlu1 %983  ;;  %v980_v53 = vpop.permute.xlu0 %979 }
 0x1de   :  { %1302 = vbcast.lane.b32.xlu1 %v1296_v10, 264  ;;  %1298 = vbcast.lane.b32.xlu0 %v1296_v10, 256 }
 0x1e0   :  { %v995_v46 = vpop.permute.xlu1 %994  ;;  %v991_v41 = vpop.permute.xlu0 %990 }
 0x1e1   :  { %v4471_v33 = vcombine.low %v973_v36, %v995_v46  ;;  %v4472_v18 = vcombine.high %v973_v36, %v995_v46  ;;  %v4199_v59 = vcombine.low %v969_v62, %v991_v41  ;;  %v4200_v27 = vcombine.high %v969_v62, %v991_v41 }
 0x1e2   :  { %1313 = vbcast.lane.b32.xlu1 %v1307_v21, 264  ;;  %1309 = vbcast.lane.b32.xlu0 %v1307_v21, 256  ;;  %v1329_v36 = vrot.slane %v8507_v19, %v7254_v13 }
 0x1e3   :  { %v8554_v37 = vrot.slane %v4471_v33, %v7292_v56  ;;  %v8557_v6 = vrot.slane %v4472_v18, %v7292_v56  ;;  %v4207_v18 = vrot.slane %v4199_v59, %v7292_v56  ;;  %v8569_v33 = vrot.slane %v4200_v27, %v7292_v56 }
 0x1e4   :  { %v1006_v43 = vpop.permute.xlu1 %1005  ;;  %v1002_v40 = vpop.permute.xlu0 %1001 }
 0x1e5   :  { %11995 = vst [vmem:[#allocation227_spill] sm:$0xff] %v8554_v37  ;;  %11996 = vst [vmem:[#allocation228_spill] sm:$0xff] %v8557_v6  ;;  %v4487_v0 = vcombine.low %v984_v63, %v1006_v43  ;;  %v4488_v10 = vcombine.high %v984_v63, %v1006_v43  ;;  %v4215_v4 = vcombine.low %v980_v53, %v1002_v40 }
 0x1e6   :  { %v4216_v46 = vcombine.high %v980_v53, %v1002_v40  ;;  %1324 = vbcast.lane.b32.xlu1 %v1318_v60, 264  ;;  %1320 = vbcast.lane.b32.xlu0 %v1318_v60, 256  ;;  %11999 = vst [vmem:[#allocation231_spill] sm:$0xff] %v8569_v33  ;;  %v8580_v60 = vrot.slane %v4504_v52, %v7343_v50 }
 0x1e7   :  { %v8562_v21 = vrot.slane %v4487_v0, %v7292_v56  ;;  %v8565_v41 = vrot.slane %v4488_v10, %v7292_v56  ;;  %v4223_v43 = vrot.slane %v4215_v4, %v7292_v56  ;;  %v1340_v4 = vrot.slane %v8507_v19, %v7258_v15 }
 0x1e8   :  { %v8573_v40 = vrot.slane %v4216_v46, %v7292_v56  ;;  %v1017_v62 = vpop.permute.xlu1 %1016  ;;  %v1013_v23 = vpop.permute.xlu0 %1012  ;;  %12001 = vst [vmem:[#allocation233_spill] sm:$0xff] %v8580_v60  ;;  %v8587_v53 = vrot.slane %v4231_v31, %v7343_v50  ;;  %v8590_v10 = vrot.slane %v4232_v22, %v7343_v50  ;;  %v8596_v52 = vrot.slane %v4520_v8, %v7343_v50 }
 0x1e9   :  { %11997 = vst [vmem:[#allocation229_spill] sm:$0xff] %v8562_v21  ;;  %11998 = vst [vmem:[#allocation230_spill] sm:$0xff] %v8565_v41  ;;  %v4536_v26 = vcombine.high %v8554_v37, %v8562_v21  ;;  %v4552_v0 = vcombine.high %v8557_v6, %v8565_v41  ;;  %v4263_v59 = vcombine.low %v4207_v18, %v4223_v43  ;;  %v8625_v41 = vld [vmem:[#allocation2 + $0x78] sm:$0xff] }
 0x1ea   :  { %12000 = vst [vmem:[#allocation232_spill] sm:$0xff] %v8573_v40  ;;  %v4264_v63 = vcombine.high %v4207_v18, %v4223_v43  ;;  %v4280_v27 = vcombine.high %v8569_v33, %v8573_v40  ;;  %1335 = vbcast.lane.b32.xlu1 %v1329_v36, 264  ;;  %1331 = vbcast.lane.b32.xlu0 %v1329_v36, 256  ;;  %12002 = vst [vmem:[#allocation234_spill] sm:$0xff] %v8587_v53 }
 0x1eb   :  { %v8593_v46 = vrot.slane %v4536_v26, %v7343_v50  ;;  %12004 = vst [vmem:[#allocation236_spill] sm:$0xff] %v8596_v52  ;;  %v8599_v43 = vrot.slane %v4263_v59, %v7343_v50  ;;  %v8608_v31 = vrot.slane %v4552_v0, %v7343_v50  ;;  %v8611_v26 = vrot.slane %v4248_v1, %v7343_v50 }
 0x1ec   :  { %v1028_v18 = vpop.permute.xlu1 %1027  ;;  %v8602_v6 = vrot.slane %v4264_v63, %v7343_v50  ;;  %v8605_v36 = vrot.slane %v4280_v27, %v7343_v50  ;;  %v1024_v22 = vpop.permute.xlu0 %1023  ;;  %v1351_v63 = vrot.slane %v8507_v19, %v7262_v17 }
 0x1ed   :  { %12003 = vst [vmem:[#allocation235_spill] sm:$0xff] %v8593_v46  ;;  %12005 = vst [vmem:[#allocation237_spill] sm:$0xff] %v8599_v43 }
 0x1ee   :  { %12006 = vst [vmem:[#allocation238_spill] sm:$0xff] %v8605_v36  ;;  %12007 = vst [vmem:[#allocation239_spill] sm:$0xff] %v8608_v31  ;;  %1346 = vbcast.lane.b32.xlu1 %v1340_v4, 264  ;;  %1342 = vbcast.lane.b32.xlu0 %v1340_v4, 256  ;;  %v1362_v4 = vrot.slane %v8625_v41, %v7237_v3 }
 0x1ef   :  { %12008 = vst [vmem:[#allocation240_spill] sm:$0xff] %v8611_v26 }
 0x1f0   :  { %v1039_v46 = vpop.permute.xlu1 %1038  ;;  %v1035_v37 = vpop.permute.xlu0 %1034 }
 0x1f1   :  { %v4575_v0 = vcombine.low %v1017_v62, %v1039_v46  ;;  %v4576_v60 = vcombine.high %v1017_v62, %v1039_v46  ;;  %v4303_v1 = vcombine.low %v1013_v23, %v1035_v37  ;;  %v4304_v8 = vcombine.high %v1013_v23, %v1035_v37 }
 0x1f2   :  { %1357 = vbcast.lane.b32.xlu1 %v1351_v63, 264  ;;  %1353 = vbcast.lane.b32.xlu0 %v1351_v63, 256  ;;  %v1373_v46 = vrot.slane %v8625_v41, %v7234_v2 }
 0x1f3   :  { %v8638_v59 = vrot.slane %v4575_v0, %v7292_v56  ;;  %v8641_v36 = vrot.slane %v4576_v60, %v7292_v56  ;;  %v4311_v23 = vrot.slane %v4303_v1, %v7292_v56  ;;  %v8653_v60 = vrot.slane %v4304_v8, %v7292_v56 }
 0x1f4   :  { %v1050_v21 = vpop.permute.xlu1 %1049  ;;  %v1046_v27 = vpop.permute.xlu0 %1045  ;;  %v1384_v8 = vrot.slane %v8625_v41, %v7242_v7 }
 0x1f5   :  { %12009 = vst [vmem:[#allocation241_spill] sm:$0xff] %v8638_v59  ;;  %12010 = vst [vmem:[#allocation242_spill] sm:$0xff] %v8641_v36  ;;  %v4591_v19 = vcombine.low %v1028_v18, %v1050_v21  ;;  %v4592_v26 = vcombine.high %v1028_v18, %v1050_v21  ;;  %v4319_v31 = vcombine.low %v1024_v22, %v1046_v27 }
 0x1f6   :  { %v4320_v62 = vcombine.high %v1024_v22, %v1046_v27  ;;  %1368 = vbcast.lane.b32.xlu1 %v1362_v4, 264  ;;  %1364 = vbcast.lane.b32.xlu0 %v1362_v4, 256  ;;  %12013 = vst [vmem:[#allocation245_spill] sm:$0xff] %v8653_v60 }
 0x1f7   :  { %v8646_v3 = vrot.slane %v4591_v19, %v7292_v56  ;;  %v8649_v37 = vrot.slane %v4592_v26, %v7292_v56  ;;  %v4327_v21 = vrot.slane %v4319_v31, %v7292_v56  ;;  %v1395_v19 = vrot.slane %v8625_v41, %v7246_v9 }
 0x1f8   :  { %v8657_v18 = vrot.slane %v4320_v62, %v7292_v56  ;;  %v1061_v22 = vpop.permute.xlu1 %1060  ;;  %v1057_v26 = vpop.permute.xlu0 %1056 }
 0x1f9   :  { %12011 = vst [vmem:[#allocation243_spill] sm:$0xff] %v8646_v3  ;;  %12012 = vst [vmem:[#allocation244_spill] sm:$0xff] %v8649_v37  ;;  %v4640_v2 = vcombine.high %v8638_v59, %v8646_v3  ;;  %v4368_v27 = vcombine.high %v4311_v23, %v4327_v21  ;;  %v1406_v59 = vrot.slane %v8625_v41, %v7250_v11 }
 0x1fa   :  { %12014 = vst [vmem:[#allocation246_spill] sm:$0xff] %v8657_v18  ;;  %v4384_v0 = vcombine.high %v8653_v60, %v8657_v18  ;;  %1379 = vbcast.lane.b32.xlu1 %v1373_v46, 264  ;;  %1375 = vbcast.lane.b32.xlu0 %v1373_v46, 256  ;;  %v4367_v11 = vcombine.low %v4311_v23, %v4327_v21 }
 0x1fc   :  { %v1072_v31 = vpop.permute.xlu1 %1071  ;;  %v1068_v1 = vpop.permute.xlu0 %1067 }
 0x1fe   :  { %1390 = vbcast.lane.b32.xlu1 %v1384_v8, 264  ;;  %1386 = vbcast.lane.b32.xlu0 %v1384_v8, 256 }
 0x200   :  { %v1083_v4 = vpop.permute.xlu1 %1082  ;;  %v1079_v52 = vpop.permute.xlu0 %1078 }
 0x201   :  { %v4607_v62 = vcombine.low %v1061_v22, %v1083_v4  ;;  %v4608_v63 = vcombine.high %v1061_v22, %v1083_v4  ;;  %v4335_v3 = vcombine.low %v1057_v26, %v1079_v52  ;;  %v4336_v60 = vcombine.high %v1057_v26, %v1079_v52 }
 0x202   :  { %1401 = vbcast.lane.b32.xlu1 %v1395_v19, 264  ;;  %1397 = vbcast.lane.b32.xlu0 %v1395_v19, 256  ;;  %v1417_v4 = vrot.slane %v8625_v41, %v7254_v13 }
 0x203   :  { %v8672_v46 = vrot.slane %v4607_v62, %v7292_v56  ;;  %v8675_v18 = vrot.slane %v4608_v63, %v7292_v56  ;;  %v4343_v63 = vrot.slane %v4335_v3, %v7292_v56  ;;  %v8687_v26 = vrot.slane %v4336_v60, %v7292_v56 }
 0x204   :  { %v1094_v7 = vpop.permute.xlu1 %1093  ;;  %v1090_v33 = vpop.permute.xlu0 %1089 }
 0x205   :  { %12015 = vst [vmem:[#allocation247_spill] sm:$0xff] %v8672_v46  ;;  %12016 = vst [vmem:[#allocation248_spill] sm:$0xff] %v8675_v18  ;;  %v4623_v9 = vcombine.low %v1072_v31, %v1094_v7  ;;  %v4624_v8 = vcombine.high %v1072_v31, %v1094_v7  ;;  %v4351_v40 = vcombine.low %v1068_v1, %v1090_v33 }
 0x206   :  { %v4352_v22 = vcombine.high %v1068_v1, %v1090_v33  ;;  %1412 = vbcast.lane.b32.xlu1 %v1406_v59, 264  ;;  %1408 = vbcast.lane.b32.xlu0 %v1406_v59, 256  ;;  %v8698_v59 = vrot.slane %v4640_v2, %v7343_v50  ;;  %v8705_v7 = vrot.slane %v4367_v11, %v7343_v50 }
 0x207   :  { %v8680_v19 = vrot.slane %v4623_v9, %v7292_v56  ;;  %v8683_v52 = vrot.slane %v4624_v8, %v7292_v56  ;;  %v4359_v31 = vrot.slane %v4351_v40, %v7292_v56  ;;  %v1428_v40 = vrot.slane %v8625_v41, %v7258_v15 }
 0x208   :  { %v8691_v33 = vrot.slane %v4352_v22, %v7292_v56  ;;  %v1105_v1 = vpop.permute.xlu1 %1104  ;;  %v1101_v21 = vpop.permute.xlu0 %1100  ;;  %12019 = vst [vmem:[#allocation251_spill] sm:$0xff] %v8698_v59  ;;  %12020 = vst [vmem:[#allocation252_spill] sm:$0xff] %v8705_v7  ;;  %v8714_v22 = vrot.slane %v4368_v27, %v7343_v50  ;;  %v8725_v11 = vrot.slane %v4384_v0, %v7343_v50 }
 0x209   :  { %12017 = vst [vmem:[#allocation249_spill] sm:$0xff] %v8680_v19  ;;  %12018 = vst [vmem:[#allocation250_spill] sm:$0xff] %v8683_v52  ;;  %v4672_v13 = vcombine.high %v8672_v46, %v8680_v19  ;;  %v4688_v23 = vcombine.high %v8675_v18, %v8683_v52  ;;  %v4399_v3 = vcombine.low %v4343_v63, %v4359_v31 }
 0x20a   :  { %v4400_v62 = vcombine.high %v4343_v63, %v4359_v31  ;;  %v4416_v60 = vcombine.high %v8687_v26, %v8691_v33  ;;  %1423 = vbcast.lane.b32.xlu1 %v1417_v4, 264  ;;  %1419 = vbcast.lane.b32.xlu0 %v1417_v4, 256  ;;  %v1439_v4 = vrot.slane %v8625_v41, %v7262_v17 }
 0x20b   :  { %v8708_v9 = vrot.slane %v4672_v13, %v7343_v50  ;;  %v8711_v2 = vrot.slane %v4399_v3, %v7343_v50  ;;  %12024 = vst [vmem:[#allocation256_spill] sm:$0xff] %v8725_v11  ;;  %v12025_v17 = vcombine.high %v8641_v36, %v8649_v37  ;;  %v8748_v13 = vrot.slane %v4688_v23, %v7343_v50 }
 0x20c   :  { %v1116_v8 = vpop.permute.xlu1 %1115  ;;  %v8717_v63 = vrot.slane %v4400_v62, %v7343_v50  ;;  %v8720_v31 = vrot.slane %v4416_v60, %v7343_v50  ;;  %v1112_v15 = vpop.permute.xlu0 %1111  ;;  %v1712_v27 = vcombine.high %v7500_v39, %v7506_v44  ;;  %v1576_v23 = vcombine.high %v7372_v12, %v7381_v28 }
 0x20d   :  { %12021 = vst [vmem:[#allocation253_spill] sm:$0xff] %v8708_v9  ;;  %12022 = vst [vmem:[#allocation254_spill] sm:$0xff] %v8711_v2  ;;  %v8741_v41 = vrot.slane %v12025_v17, %v7343_v50 }
 0x20e   :  { %12023 = vst [vmem:[#allocation255_spill] sm:$0xff] %v8720_v31  ;;  %1434 = vbcast.lane.b32.xlu1 %v1428_v40, 264  ;;  %1430 = vbcast.lane.b32.xlu0 %v1428_v40, 256  ;;  %12027 = vst [vmem:[#allocation258_spill] sm:$0xff] %v8748_v13 }
 0x20f   :  { %12026 = vst [vmem:[#allocation257_spill] sm:$0xff] %v8741_v41  ;;  %v2664_v41 = vcombine.high %v7867_v51, %v7873_v24 }
 0x210   :  { %v1127_v3 = vpop.permute.xlu1 %1126  ;;  %v1123_v60 = vpop.permute.xlu0 %1122 }
 0x211   :  { %v4983_v62 = vcombine.low %v1105_v1, %v1127_v3  ;;  %v4984_v18 = vcombine.high %v1105_v1, %v1127_v3  ;;  %v4711_v17 = vcombine.low %v1101_v21, %v1123_v60  ;;  %v4712_v0 = vcombine.high %v1101_v21, %v1123_v60 }
 0x212   :  { %1445 = vbcast.lane.b32.xlu1 %v1439_v4, 264  ;;  %1441 = vbcast.lane.b32.xlu0 %v1439_v4, 256 }
 0x213   :  { %v8759_v1 = vrot.slane %v4983_v62, %v7292_v56  ;;  %v8762_v3 = vrot.slane %v4984_v18, %v7292_v56  ;;  %v2256_v18 = vcombine.high %v7746_v42, %v7752_v35  ;;  %v4719_v62 = vrot.slane %v4711_v17, %v7292_v56 }
 0x214   :  { %v1138_v36 = vpop.permute.xlu1 %1137  ;;  %v1134_v9 = vpop.permute.xlu0 %1133  ;;  %v3344_v42 = vcombine.high %v8230_v45, %v8236_v54 }
 0x215   :  { %12028 = vst [vmem:[#allocation259_spill] sm:$0xff] %v8759_v1  ;;  %12029 = vst [vmem:[#allocation260_spill] sm:$0xff] %v8762_v3  ;;  %v4999_v52 = vcombine.low %v1116_v8, %v1138_v36  ;;  %v5000_v37 = vcombine.high %v1116_v8, %v1138_v36  ;;  %v4727_v40 = vcombine.low %v1112_v15, %v1134_v9 }
 0x216   :  { %v4728_v4 = vcombine.high %v1112_v15, %v1134_v9  ;;  %5817 = vrot.lane.b32.xlu1 %v1712_v27, %s7199_s0  ;;  %5815 = vrot.lane.b32.xlu0 %v1576_v23, %s7199_s0  ;;  %v8776_v36 = vrot.slane %v4712_v0, %v7292_v56  ;;  %v2120_v23 = vcombine.high %v7625_v47, %v7631_v16 }
 0x217   :  { %v8766_v21 = vrot.slane %v4999_v52, %v7292_v56  ;;  %v8769_v60 = vrot.slane %v5000_v37, %v7292_v56  ;;  %v4735_v9 = vrot.slane %v4727_v40, %v7292_v56 }
 0x218   :  { %v8780_v8 = vrot.slane %v4728_v4, %v7292_v56  ;;  %v1149_v52 = vpop.permute.xlu1 %1148  ;;  %v1145_v27 = vpop.permute.xlu0 %1144  ;;  %v2800_v4 = vcombine.high %v7988_v38, %v7994_v20 }
 0x219   :  { %12030 = vst [vmem:[#allocation261_spill] sm:$0xff] %v8766_v21  ;;  %12031 = vst [vmem:[#allocation262_spill] sm:$0xff] %v8769_v60  ;;  %v5048_v37 = vcombine.high %v8759_v1, %v8766_v21  ;;  %v5064_v15 = vcombine.high %v8762_v3, %v8769_v60  ;;  %v4776_v17 = vcombine.high %v4719_v62, %v4735_v9  ;;  %v12081_v21 = vld [vmem:[#allocation150_spill] sm:$0xff] }
 0x21a   :  { %v4792_v0 = vcombine.high %v8776_v36, %v8780_v8  ;;  %5821 = vrot.lane.b32.xlu1 %v2256_v18, %s7199_s0  ;;  %5819 = vrot.lane.b32.xlu0 %v2120_v23, %s7199_s0  ;;  %v3208_v23 = vcombine.high %v8109_v14, %v8115_v5 }
 0x21c   :  { %v1160_v40 = vpop.permute.xlu1 %1159  ;;  %v1156_v13 = vpop.permute.xlu0 %1155 }
 0x21e   :  { %5825 = vrot.lane.b32.xlu1 %v2800_v4, %s7199_s0  ;;  %5823 = vrot.lane.b32.xlu0 %v2664_v41, %s7199_s0  ;;  %v3888_v41 = vcombine.high %v8469_v61, %v8481_v55  ;;  %v3752_v4 = vcombine.high %v8351_v32, %v8363_v58 }
 0x220   :  { %v1171_v35 = vpop.permute.xlu1 %1170  ;;  %v1167_v39 = vpop.permute.xlu0 %1166 }
 0x221   :  { %v5015_v44 = vcombine.low %v1149_v52, %v1171_v35  ;;  %v5016_v18 = vcombine.high %v1149_v52, %v1171_v35  ;;  %v4743_v20 = vcombine.low %v1145_v27, %v1167_v39  ;;  %v4744_v38 = vcombine.high %v1145_v27, %v1167_v39 }
 0x222   :  { %5829 = vrot.lane.b32.xlu1 %v3344_v42, %s7199_s0  ;;  %5827 = vrot.lane.b32.xlu0 %v3208_v23, %s7199_s0  ;;  %v4775_v39 = vcombine.low %v4719_v62, %v4735_v9 }
 0x223   :  { %v8809_v54 = vrot.slane %v5015_v44, %v7292_v56  ;;  %v8812_v35 = vrot.slane %v5016_v18, %v7292_v56  ;;  %v4432_v44 = vcombine.high %v8705_v7, %v8711_v2  ;;  %v4751_v18 = vrot.slane %v4743_v20, %v7292_v56 }
 0x224   :  { %v1182_v24 = vpop.permute.xlu1 %1181  ;;  %v1178_v42 = vpop.permute.xlu0 %1177  ;;  %v8839_v20 = vrot.slane %v5048_v37, %v7343_v50  ;;  %v8855_v37 = vrot.slane %v5064_v15, %v7343_v50 }
 0x225   :  { %12032 = vst [vmem:[#allocation263_spill] sm:$0xff] %v8809_v54  ;;  %12033 = vst [vmem:[#allocation264_spill] sm:$0xff] %v8812_v35  ;;  %v5031_v52 = vcombine.low %v1160_v40, %v1182_v24  ;;  %v5032_v45 = vcombine.high %v1160_v40, %v1182_v24  ;;  %v4759_v5 = vcombine.low %v1156_v13, %v1178_v42 }
 0x226   :  { %v4760_v23 = vcombine.high %v1156_v13, %v1178_v42  ;;  %5833 = vrot.lane.b32.xlu1 %v3888_v41, %s7199_s0  ;;  %5831 = vrot.lane.b32.xlu0 %v3752_v4, %s7199_s0  ;;  %v8826_v24 = vrot.slane %v4744_v38, %v7292_v56  ;;  %v4296_v4 = vcombine.high %v8587_v53, %v8599_v43 }
 0x227   :  { %v8816_v27 = vrot.slane %v5031_v52, %v7292_v56  ;;  %v8819_v55 = vrot.slane %v5032_v45, %v7292_v56  ;;  %v4767_v13 = vrot.slane %v4759_v5, %v7292_v56  ;;  %12036 = vst [vmem:[#allocation267_spill] sm:$0xff] %v8839_v20  ;;  %v8846_v42 = vrot.slane %v4775_v39, %v7343_v50 }
 0x228   :  { %v8830_v62 = vrot.slane %v4760_v23, %v7292_v56  ;;  %v1193_v9 = vpop.permute.xlu1 %1192  ;;  %v1189_v41 = vpop.permute.xlu0 %1188  ;;  %v8849_v23 = vrot.slane %v4776_v17, %v7343_v50  ;;  %12039 = vst [vmem:[#allocation270_spill] sm:$0xff] %v8855_v37 }
 0x229   :  { %12034 = vst [vmem:[#allocation265_spill] sm:$0xff] %v8816_v27  ;;  %12035 = vst [vmem:[#allocation266_spill] sm:$0xff] %v8819_v55  ;;  %v5080_v45 = vcombine.high %v8809_v54, %v8816_v27  ;;  %v5096_v40 = vcombine.high %v8812_v35, %v8819_v55  ;;  %v4807_v38 = vcombine.low %v4751_v18, %v4767_v13 }
 0x22a   :  { %v4808_v52 = vcombine.high %v4751_v18, %v4767_v13  ;;  %v4824_v5 = vcombine.high %v8826_v24, %v8830_v62  ;;  %5837 = vrot.lane.b32.xlu1 %v4432_v44, %s7199_s0  ;;  %5835 = vrot.lane.b32.xlu0 %v4296_v4, %s7199_s0  ;;  %12037 = vst [vmem:[#allocation268_spill] sm:$0xff] %v8846_v42 }
 0x22b   :  { %v8852_v2 = vrot.slane %v5080_v45, %v7343_v50  ;;  %v8858_v13 = vrot.slane %v4807_v38, %v7343_v50  ;;  %v8867_v39 = vrot.slane %v5096_v40, %v7343_v50  ;;  %v8870_v45 = vrot.slane %v4792_v0, %v7343_v50 }
 0x22c   :  { %v1204_v18 = vpop.permute.xlu1 %1203  ;;  %v8861_v44 = vrot.slane %v4808_v52, %v7343_v50  ;;  %v8864_v4 = vrot.slane %v4824_v5, %v7343_v50  ;;  %v1200_v17 = vpop.permute.xlu0 %1199 }
 0x22d   :  { %12038 = vst [vmem:[#allocation269_spill] sm:$0xff] %v8852_v2  ;;  %12040 = vst [vmem:[#allocation271_spill] sm:$0xff] %v8858_v13  ;;  %v4840_v52 = vcombine.high %v8846_v42, %v8858_v13 }
 0x22e   :  { %12041 = vst [vmem:[#allocation272_spill] sm:$0xff] %v8867_v39 }
 0x22f   :  { %5839 = vrot.lane.b32.xlu0 %v4840_v52, %s7199_s0 }
 0x230   :  { %v1215_v38 = vpop.permute.xlu1 %1214  ;;  %v1211_v13 = vpop.permute.xlu0 %1210 }
 0x231   :  { %v5119_v43 = vcombine.low %v1193_v9, %v1215_v38  ;;  %v5120_v40 = vcombine.high %v1193_v9, %v1215_v38  ;;  %v4847_v42 = vcombine.low %v1189_v41, %v1211_v13  ;;  %v4848_v7 = vcombine.high %v1189_v41, %v1211_v13 }
 0x233   :  { %v8894_v0 = vrot.slane %v5119_v43, %v7292_v56  ;;  %v8897_v15 = vrot.slane %v5120_v40, %v7292_v56  ;;  %v4855_v41 = vrot.slane %v4847_v42, %v7292_v56  ;;  %v8907_v13 = vrot.slane %v4848_v7, %v7292_v56 }
 0x234   :  { %v1226_v53 = vpop.permute.xlu1 %1225  ;;  %v1222_v32 = vpop.permute.xlu0 %1221 }
 0x235   :  { %12042 = vst [vmem:[#allocation273_spill] sm:$0xff] %v8894_v0  ;;  %12043 = vst [vmem:[#allocation274_spill] sm:$0xff] %v8897_v15  ;;  %v5135_v52 = vcombine.low %v1204_v18, %v1226_v53  ;;  %v5136_v58 = vcombine.high %v1204_v18, %v1226_v53  ;;  %v4863_v14 = vcombine.low %v1200_v17, %v1222_v32 }
 0x236   :  { %v4864_v61 = vcombine.high %v1200_v17, %v1222_v32 }
 0x237   :  { %v8900_v51 = vrot.slane %v5135_v52, %v7292_v56  ;;  %v8903_v9 = vrot.slane %v5136_v58, %v7292_v56  ;;  %v4871_v43 = vrot.slane %v4863_v14, %v7292_v56 }
 0x238   :  { %v8911_v38 = vrot.slane %v4864_v61, %v7292_v56  ;;  %v1237_v53 = vpop.permute.xlu1 %1236  ;;  %v1233_v17 = vpop.permute.xlu0 %1232 }
 0x239   :  { %12044 = vst [vmem:[#allocation275_spill] sm:$0xff] %v8900_v51  ;;  %12045 = vst [vmem:[#allocation276_spill] sm:$0xff] %v8903_v9  ;;  %v5184_v32 = vcombine.high %v8894_v0, %v8900_v51  ;;  %v5200_v18 = vcombine.high %v8897_v15, %v8903_v9  ;;  %v4912_v58 = vcombine.high %v4855_v41, %v4871_v43 }
 0x23a   :  { %v4928_v42 = vcombine.high %v8907_v13, %v8911_v38  ;;  %v4911_v3 = vcombine.low %v4855_v41, %v4871_v43 }
 0x23c   :  { %v1248_v40 = vpop.permute.xlu1 %1247  ;;  %v1244_v7 = vpop.permute.xlu0 %1243 }
 0x240   :  { %v1259_v52 = vpop.permute.xlu1 %1258  ;;  %v1255_v39 = vpop.permute.xlu0 %1254 }
 0x241   :  { %v5151_v5 = vcombine.low %v1237_v53, %v1259_v52  ;;  %v5152_v14 = vcombine.high %v1237_v53, %v1259_v52  ;;  %v4879_v61 = vcombine.low %v1233_v17, %v1255_v39  ;;  %v4880_v37 = vcombine.high %v1233_v17, %v1255_v39 }
 0x243   :  { %v8920_v47 = vrot.slane %v5151_v5, %v7292_v56  ;;  %v8923_v28 = vrot.slane %v5152_v14, %v7292_v56  ;;  %v4887_v39 = vrot.slane %v4879_v61, %v7292_v56  ;;  %v8933_v5 = vrot.slane %v4880_v37, %v7292_v56 }
 0x244   :  { %v1270_v16 = vpop.permute.xlu1 %1269  ;;  %v1266_v9 = vpop.permute.xlu0 %1265  ;;  %v8958_v14 = vrot.slane %v5200_v18, %v7343_v50 }
 0x245   :  { %12046 = vst [vmem:[#allocation277_spill] sm:$0xff] %v8920_v47  ;;  %12047 = vst [vmem:[#allocation278_spill] sm:$0xff] %v8923_v28  ;;  %v5167_v12 = vcombine.low %v1248_v40, %v1270_v16  ;;  %v5168_v15 = vcombine.high %v1248_v40, %v1270_v16  ;;  %v4895_v35 = vcombine.low %v1244_v7, %v1266_v9 }
 0x246   :  { %v4896_v55 = vcombine.high %v1244_v7, %v1266_v9  ;;  %12053 = vst [vmem:[#allocation284_spill] sm:$0xff] %v8958_v14 }
 0x247   :  { %v8926_v60 = vrot.slane %v5167_v12, %v7292_v56  ;;  %v8929_v53 = vrot.slane %v5168_v15, %v7292_v56  ;;  %v4903_v17 = vrot.slane %v4895_v35, %v7292_v56  ;;  %v8944_v15 = vrot.slane %v5184_v32, %v7343_v50 }
 0x248   :  { %v8937_v52 = vrot.slane %v4896_v55, %v7292_v56  ;;  %v1281_v16 = vpop.permute.xlu1 %1280  ;;  %v1277_v41 = vpop.permute.xlu0 %1276  ;;  %v8949_v35 = vrot.slane %v4911_v3, %v7343_v50  ;;  %v8952_v55 = vrot.slane %v4912_v58, %v7343_v50 }
 0x249   :  { %12048 = vst [vmem:[#allocation279_spill] sm:$0xff] %v8926_v60  ;;  %12049 = vst [vmem:[#allocation280_spill] sm:$0xff] %v8929_v53  ;;  %v5216_v9 = vcombine.high %v8920_v47, %v8926_v60  ;;  %v5232_v12 = vcombine.high %v8923_v28, %v8929_v53  ;;  %v4943_v43 = vcombine.low %v4887_v39, %v4903_v17 }
 0x24a   :  { %12050 = vst [vmem:[#allocation281_spill] sm:$0xff] %v8944_v15  ;;  %v4944_v40 = vcombine.high %v4887_v39, %v4903_v17  ;;  %v4960_v37 = vcombine.high %v8933_v5, %v8937_v52  ;;  %12051 = vst [vmem:[#allocation282_spill] sm:$0xff] %v8949_v35 }
 0x24b   :  { %v8955_v7 = vrot.slane %v5216_v9, %v7343_v50  ;;  %v8961_v32 = vrot.slane %v4943_v43, %v7343_v50  ;;  %v8970_v3 = vrot.slane %v5232_v12, %v7343_v50  ;;  %v8973_v9 = vrot.slane %v4928_v42, %v7343_v50 }
 0x24c   :  { %v1292_v61 = vpop.permute.xlu1 %1291  ;;  %v8964_v39 = vrot.slane %v4944_v40, %v7343_v50  ;;  %v8967_v17 = vrot.slane %v4960_v37, %v7343_v50  ;;  %v1288_v58 = vpop.permute.xlu0 %1287 }
 0x24d   :  { %12052 = vst [vmem:[#allocation283_spill] sm:$0xff] %v8955_v7  ;;  %12054 = vst [vmem:[#allocation285_spill] sm:$0xff] %v8961_v32  ;;  %v4976_v40 = vcombine.high %v8949_v35, %v8961_v32 }
 0x24e   :  { %12055 = vst [vmem:[#allocation286_spill] sm:$0xff] %v8967_v17  ;;  %12056 = vst [vmem:[#allocation287_spill] sm:$0xff] %v8970_v3 }
 0x24f   :  { %12057 = vst [vmem:[#allocation288_spill] sm:$0xff] %v8973_v9  ;;  %5841 = vrot.lane.b32.xlu1 %v4976_v40, %s7199_s0 }
 0x250   :  { %v1303_v43 = vpop.permute.xlu1 %1302  ;;  %v1299_v32 = vpop.permute.xlu0 %1298 }
 0x251   :  { %v5527_v7 = vcombine.low %v1281_v16, %v1303_v43  ;;  %v5528_v12 = vcombine.high %v1281_v16, %v1303_v43  ;;  %v5256_v35 = vcombine.high %v1277_v41, %v1299_v32  ;;  %v5255_v20 = vcombine.low %v1277_v41, %v1299_v32 }
 0x253   :  { %v8997_v15 = vrot.slane %v5527_v7, %v7292_v56  ;;  %v9000_v42 = vrot.slane %v5528_v12, %v7292_v56  ;;  %v9009_v16 = vrot.slane %v5256_v35, %v7292_v56  ;;  %v9024_v51 = vrot.slane %v5255_v20, %v7292_v56 }
 0x254   :  { %v1314_v28 = vpop.permute.xlu1 %1313  ;;  %v1310_v59 = vpop.permute.xlu0 %1309 }
 0x255   :  { %12058 = vst [vmem:[#allocation289_spill] sm:$0xff] %v8997_v15  ;;  %12059 = vst [vmem:[#allocation290_spill] sm:$0xff] %v9000_v42  ;;  %v5543_v18 = vcombine.low %v1292_v61, %v1314_v28  ;;  %v5544_v40 = vcombine.high %v1292_v61, %v1314_v28  ;;  %v5272_v2 = vcombine.high %v1288_v58, %v1310_v59 }
 0x256   :  { %v5271_v14 = vcombine.low %v1288_v58, %v1310_v59 }
 0x257   :  { %v9003_v53 = vrot.slane %v5543_v18, %v7292_v56  ;;  %v9006_v37 = vrot.slane %v5544_v40, %v7292_v56  ;;  %v9012_v43 = vrot.slane %v5272_v2, %v7292_v56 }
 0x258   :  { %v1325_v7 = vpop.permute.xlu1 %1324  ;;  %v1321_v61 = vpop.permute.xlu0 %1320  ;;  %v9021_v0 = vrot.slane %v5271_v14, %v7292_v56 }
 0x259   :  { %12060 = vst [vmem:[#allocation291_spill] sm:$0xff] %v9003_v53  ;;  %12061 = vst [vmem:[#allocation292_spill] sm:$0xff] %v9006_v37  ;;  %v5592_v12 = vcombine.high %v8997_v15, %v9003_v53  ;;  %v5608_v28 = vcombine.high %v9000_v42, %v9006_v37  ;;  %v5336_v18 = vcombine.high %v9009_v16, %v9012_v43 }
 0x25a   :  { %v5319_v14 = vcombine.low %v9024_v51, %v9021_v0 }
 0x25c   :  { %v1336_v3 = vpop.permute.xlu1 %1335  ;;  %v1332_v40 = vpop.permute.xlu0 %1331 }
 0x260   :  { %v1347_v35 = vpop.permute.xlu1 %1346  ;;  %v1343_v2 = vpop.permute.xlu0 %1342 }
 0x261   :  { %v5559_v47 = vcombine.low %v1325_v7, %v1347_v35  ;;  %v5560_v60 = vcombine.high %v1325_v7, %v1347_v35  ;;  %v5287_v46 = vcombine.low %v1321_v61, %v1343_v2  ;;  %v5288_v42 = vcombine.high %v1321_v61, %v1343_v2 }
 0x263   :  { %v9027_v19 = vrot.slane %v5559_v47, %v7292_v56  ;;  %v9030_v15 = vrot.slane %v5560_v60, %v7292_v56  ;;  %v9041_v47 = vrot.slane %v5287_v46, %v7292_v56  ;;  %v9044_v60 = vrot.slane %v5288_v42, %v7292_v56 }
 0x264   :  { %v1358_v37 = vpop.permute.xlu1 %1357  ;;  %v1354_v32 = vpop.permute.xlu0 %1353  ;;  %v9057_v46 = vrot.slane %v5592_v12, %v7343_v50 }
 0x265   :  { %12062 = vst [vmem:[#allocation293_spill] sm:$0xff] %v9027_v19  ;;  %12063 = vst [vmem:[#allocation294_spill] sm:$0xff] %v9030_v15  ;;  %v5575_v59 = vcombine.low %v1336_v3, %v1358_v37  ;;  %v5576_v41 = vcombine.high %v1336_v3, %v1358_v37  ;;  %v5303_v58 = vcombine.low %v1332_v40, %v1354_v32 }
 0x266   :  { %v5304_v7 = vcombine.high %v1332_v40, %v1354_v32  ;;  %12066 = vst [vmem:[#allocation297_spill] sm:$0xff] %v9057_v46 }
 0x267   :  { %v9035_v20 = vrot.slane %v5575_v59, %v7292_v56  ;;  %v9038_v61 = vrot.slane %v5576_v41, %v7292_v56  ;;  %v9047_v3 = vrot.slane %v5303_v58, %v7292_v56  ;;  %v9067_v58 = vrot.slane %v5608_v28, %v7343_v50 }
 0x268   :  { %v9050_v37 = vrot.slane %v5304_v7, %v7292_v56  ;;  %v1369_v40 = vpop.permute.xlu1 %1368  ;;  %v1365_v59 = vpop.permute.xlu0 %1364 }
 0x269   :  { %12064 = vst [vmem:[#allocation295_spill] sm:$0xff] %v9035_v20  ;;  %12065 = vst [vmem:[#allocation296_spill] sm:$0xff] %v9038_v61  ;;  %v5624_v35 = vcombine.high %v9027_v19, %v9035_v20  ;;  %v5640_v2 = vcombine.high %v9030_v15, %v9038_v61  ;;  %v5351_v42 = vcombine.low %v9041_v47, %v9047_v3 }
 0x26a   :  { %v5368_v41 = vcombine.high %v9044_v60, %v9050_v37  ;;  %12068 = vst [vmem:[#allocation299_spill] sm:$0xff] %v9067_v58  ;;  %v9070_v19 = vrot.slane %v5319_v14, %v7343_v50 }
 0x26b   :  { %v9064_v32 = vrot.slane %v5624_v35, %v7343_v50  ;;  %v9073_v15 = vrot.slane %v5351_v42, %v7343_v50  ;;  %v9079_v61 = vrot.slane %v5640_v2, %v7343_v50  ;;  %v9082_v35 = vrot.slane %v5336_v18, %v7343_v50 }
 0x26c   :  { %v1380_v7 = vpop.permute.xlu1 %1379  ;;  %12069 = vst [vmem:[#allocation300_spill] sm:$0xff] %v9070_v19  ;;  %v9076_v12 = vrot.slane %v5368_v41, %v7343_v50  ;;  %v1376_v20 = vpop.permute.xlu0 %1375  ;;  %v12074_v41 = vcombine.low %v7384_v29, %v7387_v30 }
 0x26d   :  { %12067 = vst [vmem:[#allocation298_spill] sm:$0xff] %v9064_v32  ;;  %12070 = vst [vmem:[#allocation301_spill] sm:$0xff] %v9073_v15  ;;  %v5384_v42 = vcombine.high %v9070_v19, %v9073_v15 }
 0x26e   :  { %12071 = vst [vmem:[#allocation302_spill] sm:$0xff] %v9076_v12  ;;  %12072 = vst [vmem:[#allocation303_spill] sm:$0xff] %v9079_v61 }
 0x26f   :  { %12073 = vst [vmem:[#allocation304_spill] sm:$0xff] %v9082_v35  ;;  %5843 = vrot.lane.b32.xlu0 %v5384_v42, %s7199_s0 }
 0x270   :  { %v1391_v18 = vpop.permute.xlu1 %1390  ;;  %v1387_v54 = vpop.permute.xlu0 %1386 }
 0x271   :  { %v5663_v32 = vcombine.low %v1369_v40, %v1391_v18  ;;  %v5664_v46 = vcombine.high %v1369_v40, %v1391_v18  ;;  %v5392_v27 = vcombine.high %v1365_v59, %v1387_v54 }
 0x273   :  { %5879 = vrot.lane.b32.xlu0 %v12074_v41, %s7200_s13  ;;  %v9106_v42 = vrot.slane %v5663_v32, %v7292_v56  ;;  %v9109_v2 = vrot.slane %v5664_v46, %v7292_v56  ;;  %v9118_v58 = vrot.slane %v5392_v27, %v7292_v56  ;;  %v12079_v46 = vcombine.low %v7634_v48, %v7637_v49 }
 0x274   :  { %v1402_v53 = vpop.permute.xlu1 %1401  ;;  %v1398_v14 = vpop.permute.xlu0 %1397 }
 0x275   :  { %12075 = vst [vmem:[#allocation305_spill] sm:$0xff] %v9106_v42  ;;  %12076 = vst [vmem:[#allocation306_spill] sm:$0xff] %v9109_v2  ;;  %v5679_v28 = vcombine.low %v1380_v7, %v1402_v53  ;;  %v5680_v15 = vcombine.high %v1380_v7, %v1402_v53  ;;  %v5408_v61 = vcombine.high %v1376_v20, %v1398_v14 }
 0x276   :  { %v5407_v1 = vcombine.low %v1376_v20, %v1398_v14  ;;  %v12083_v20 = vld [vmem:[#allocation191_spill] sm:$0xff] }
 0x277   :  { %v9112_v40 = vrot.slane %v5679_v28, %v7292_v56  ;;  %v9115_v18 = vrot.slane %v5680_v15, %v7292_v56  ;;  %v9121_v41 = vrot.slane %v5408_v61, %v7292_v56  ;;  %5883 = vrot.lane.b32.xlu0 %v12079_v46, %s7200_s13  ;;  %v12080_v61 = vcombine.low %v7876_v25, %v7879_v34 }
 0x278   :  { %v1413_v53 = vpop.permute.xlu1 %1412  ;;  %v1409_v15 = vpop.permute.xlu0 %1408  ;;  %v5391_v46 = vcombine.low %v1365_v59, %v1387_v54  ;;  %v9142_v9 = vrot.slane %v5407_v1, %v7292_v56  ;;  %v12084_v54 = vld [vmem:[#allocation195_spill] sm:$0xff] }
 0x279   :  { %12077 = vst [vmem:[#allocation307_spill] sm:$0xff] %v9112_v40  ;;  %12078 = vst [vmem:[#allocation308_spill] sm:$0xff] %v9115_v18  ;;  %v5728_v32 = vcombine.high %v9106_v42, %v9112_v40  ;;  %v5744_v7 = vcombine.high %v9109_v2, %v9115_v18  ;;  %v5472_v27 = vcombine.high %v9118_v58, %v9121_v41 }
 0x27a   :  { %v12082_v42 = vcombine.low %v8118_v57, %v12081_v21  ;;  %v9145_v31 = vrot.slane %v5391_v46, %v7292_v56  ;;  %v12085_v59 = vcombine.low %v12083_v20, %v12084_v54  ;;  %v5352_v46 = vcombine.high %v9041_v47, %v9047_v3 }
 0x27b   :  { %5887 = vrot.lane.b32.xlu0 %v12080_v61, %s7200_s13 }
 0x27c   :  { %v1424_v28 = vpop.permute.xlu1 %1423  ;;  %v1420_v19 = vpop.permute.xlu0 %1419 }
 0x27f   :  { %5891 = vrot.lane.b32.xlu0 %v12082_v42, %s7200_s13 }
 0x280   :  { %v1435_v40 = vpop.permute.xlu1 %1434  ;;  %v1431_v17 = vpop.permute.xlu0 %1430 }
 0x281   :  { %v5695_v2 = vcombine.low %v1413_v53, %v1435_v40  ;;  %v5696_v18 = vcombine.high %v1413_v53, %v1435_v40  ;;  %v5423_v61 = vcombine.low %v1409_v15, %v1431_v17  ;;  %v5424_v11 = vcombine.high %v1409_v15, %v1431_v17 }
 0x282   :  { %v5320_v15 = vcombine.high %v9024_v51, %v9021_v0  ;;  %v12087_v51 = vcombine.low %v8590_v10, %v8602_v6 }
 0x283   :  { %5895 = vrot.lane.b32.xlu0 %v12085_v59, %s7200_s13  ;;  %v9152_v42 = vrot.slane %v5695_v2, %v7292_v56  ;;  %v9155_v40 = vrot.slane %v5696_v18, %v7292_v56  ;;  %v5455_v59 = vcombine.low %v9145_v31, %v9142_v9 }
 0x284   :  { %v1446_v14 = vpop.permute.xlu1 %1445  ;;  %v1442_v12 = vpop.permute.xlu0 %1441 }
 0x285   :  { %12086 = vst [vmem:[#allocation150_spill] sm:$0xff] %v9155_v40  ;;  %v5711_v53 = vcombine.low %v1424_v28, %v1446_v14  ;;  %v5712_v1 = vcombine.high %v1424_v28, %v1446_v14  ;;  %v5439_v35 = vcombine.low %v1420_v19, %v1442_v12  ;;  %v5440_v17 = vcombine.high %v1420_v19, %v1442_v12 }
 0x286   :  { %v5431_v28 = vrot.slane %v5423_v61, %v7292_v56  ;;  %v9171_v14 = vrot.slane %v5424_v11, %v7292_v56  ;;  %v9186_v12 = vrot.slane %v5728_v32, %v7343_v50 }
 0x287   :  { %v9164_v2 = vrot.slane %v5711_v53, %v7292_v56  ;;  %v9167_v18 = vrot.slane %v5712_v1, %v7292_v56  ;;  %v5447_v47 = vrot.slane %v5439_v35, %v7292_v56  ;;  %v9175_v19 = vrot.slane %v5440_v17, %v7292_v56  ;;  %5899 = vrot.lane.b32.xlu0 %v12087_v51, %s7200_s13 }
 0x288   :  { %v5366_v56 = vrot.slane %v5352_v46, %v7343_v50  ;;  %v12088_v53 = vcombine.low %v8849_v23, %v8861_v44  ;;  %v5334_v1 = vrot.slane %v5320_v15, %v7343_v50  ;;  %v9200_v17 = vrot.slane %v5455_v59, %v7343_v50  ;;  %v12098_v15 = vld [vmem:[#allocation86_spill] sm:$0xff] }
 0x289   :  { %v5760_v0 = vcombine.high %v9152_v42, %v9164_v2  ;;  %v5776_v3 = vcombine.high %v9155_v40, %v9167_v18  ;;  %v5487_v11 = vcombine.low %v5431_v28, %v5447_v47  ;;  %v5504_v35 = vcombine.high %v9171_v14, %v9175_v19 }
 0x28a   :  { %12089 = vst [vmem:[#allocation191_spill] sm:$0xff] %v9200_v17  ;;  %v9209_v46 = vrot.slane %v5472_v27, %v7343_v50  ;;  %v5385_v40 = vcombine.low %v5334_v1, %v5366_v56  ;;  %v12095_v27 = vld [vmem:[#allocation45_spill] sm:$0xff] }
 0x28b   :  { %v9192_v61 = vrot.slane %v5760_v0, %v7343_v50  ;;  %5903 = vrot.lane.b32.xlu0 %v12088_v53, %s7200_s13  ;;  %v9203_v32 = vrot.slane %v5487_v11, %v7343_v50  ;;  %v9206_v51 = vrot.slane %v5504_v35, %v7343_v50  ;;  %v9220_v11 = vrot.slane %v5744_v7, %v7343_v50  ;;  %v12099_v35 = vld [vmem:[#allocation87_spill] sm:$0xff] }
 0x28c   :  { %v9229_v0 = vrot.slane %v5776_v3, %v7343_v50  ;;  %v12097_v3 = vcombine.high %v7634_v48, %v7637_v49  ;;  %v12100_v7 = vcombine.low %v12098_v15, %v12099_v35  ;;  %v12105_v48 = vcombine.high %v8118_v57, %v12081_v21  ;;  %v12106_v49 = vld [vmem:[#allocation171_spill] sm:$0xff] }
 0x28d   :  { %12090 = vst [vmem:[#allocation195_spill] sm:$0xff] %v9203_v32  ;;  %v5520_v53 = vcombine.high %v9200_v17, %v9203_v32  ;;  %12091 = vst [vmem:[#allocation309_spill] sm:$0xff] %v9220_v11  ;;  %v5456_v57 = vcombine.high %v9145_v31, %v9142_v9  ;;  %v12113_v21 = vcombine.high %v8590_v10, %v8602_v6  ;;  %v12121_v9 = vld [vmem:[#allocation60_spill] sm:$0xff]  ;;  %v12251_v17 = vld [vmem:[#allocation286_spill] sm:$0xff] }
 0x28e   :  { %12092 = vst [vmem:[#allocation310_spill] sm:$0xff] %v9229_v0  ;;  %v12119_v31 = vcombine.high %v8849_v23, %v8861_v44  ;;  %v12120_v6 = vcombine.low %v8952_v55, %v8964_v39  ;;  %v12123_v23 = vld [vmem:[#allocation54_spill] sm:$0xff]  ;;  %v12124_v44 = vld [vmem:[#allocation55_spill] sm:$0xff]  ;;  %v12250_v32 = vld [vmem:[#allocation288_spill] sm:$0xff] }
 0x28f   :  { %5907 = vrot.lane.b32.xlu0 %v5385_v40, %s7200_s13  ;;  %5845 = vrot.lane.b32.xlu1 %v5520_v53, %s7199_s0  ;;  %v12093_v40 = vcombine.high %v7384_v29, %v7387_v30  ;;  %v12094_v53 = vld [vmem:[#allocation44_spill] sm:$0xff]  ;;  %v12101_v29 = vcombine.high %v7876_v25, %v7879_v34  ;;  %v12109_v25 = vcombine.high %v12083_v20, %v12084_v54  ;;  %v12110_v34 = vld [vmem:[#allocation213_spill] sm:$0xff]  ;;  %v12115_v20 = vld [vmem:[#allocation18_spill] sm:$0xff] }
 0x290   :  { %v12096_v59 = vcombine.low %v12094_v53, %v12095_v27  ;;  %v12102_v30 = vld [vmem:[#allocation128_spill] sm:$0xff]  ;;  %v12116_v54 = vld [vmem:[#allocation19_spill] sm:$0xff]  ;;  %v9301_v10 = vrot.slane %v5456_v57, %v7343_v50 }
 0x293   :  { %5943 = vrot.lane.b32.xlu0 %v12093_v40, %s7201_s14  ;;  %5881 = vrot.lane.b32.xlu1 %v12096_v59, %s7200_s13  ;;  %v12103_v40 = vld [vmem:[#allocation129_spill] sm:$0xff]  ;;  %v12107_v59 = vld [vmem:[#allocation172_spill] sm:$0xff] }
 0x294   :  { %v12104_v0 = vcombine.low %v12102_v30, %v12103_v40 }
 0x297   :  { %5947 = vrot.lane.b32.xlu0 %v12097_v3, %s7201_s14  ;;  %5885 = vrot.lane.b32.xlu1 %v12100_v7, %s7200_s13  ;;  %v12108_v3 = vcombine.low %v12106_v49, %v12107_v59  ;;  %v12111_v7 = vld [vmem:[#allocation217_spill] sm:$0xff] }
 0x29b   :  { %5951 = vrot.lane.b32.xlu0 %v12101_v29, %s7201_s14  ;;  %5889 = vrot.lane.b32.xlu1 %v12104_v0, %s7200_s13  ;;  %v12112_v29 = vcombine.low %v12110_v34, %v12111_v7  ;;  %v5488_v0 = vcombine.high %v5431_v28, %v5447_v47  ;;  %v12117_v28 = vld [vmem:[#allocation12_spill] sm:$0xff]  ;;  %v12118_v47 = vld [vmem:[#allocation13_spill] sm:$0xff] }
 0x29f   :  { %5955 = vrot.lane.b32.xlu0 %v12105_v48, %s7201_s14  ;;  %5893 = vrot.lane.b32.xlu1 %v12108_v3, %s7200_s13  ;;  %v12114_v48 = vcombine.low %v8714_v22, %v8717_v63  ;;  %v1559_v3 = vcombine.low %v12116_v54, %v12115_v20 }
 0x2a1   :  { %v9308_v54 = vrot.slane %v1559_v3, %v7343_v50  ;;  %v12127_v3 = vld [vmem:[#allocation97_spill] sm:$0xff] }
 0x2a3   :  { %5959 = vrot.lane.b32.xlu0 %v12109_v25, %s7201_s14  ;;  %5897 = vrot.lane.b32.xlu1 %v12112_v29, %s7200_s13  ;;  %v9288_v25 = vrot.slane %v5488_v0, %v7343_v50  ;;  %v1527_v29 = vcombine.low %v12118_v47, %v12117_v28  ;;  %v2071_v28 = vcombine.low %v12124_v44, %v12123_v23  ;;  %v12125_v47 = vld [vmem:[#allocation103_spill] sm:$0xff]  ;;  %v12131_v23 = vld [vmem:[#allocation144_spill] sm:$0xff] }
 0x2a5   :  { %v5521_v20 = vcombine.low %v9301_v10, %v9288_v25  ;;  %v9315_v57 = vrot.slane %v1527_v29, %v7343_v50  ;;  %v9332_v29 = vrot.slane %v2071_v28, %v7343_v50  ;;  %v12135_v28 = vld [vmem:[#allocation188_spill] sm:$0xff] }
 0x2a7   :  { %5963 = vrot.lane.b32.xlu0 %v12113_v21, %s7201_s14  ;;  %5901 = vrot.lane.b32.xlu1 %v12114_v48, %s7200_s13  ;;  %v12122_v21 = vld [vmem:[#allocation61_spill] sm:$0xff]  ;;  %v5386_v48 = vcombine.high %v5334_v1, %v5366_v56  ;;  %v1579_v56 = vcombine.low %v9315_v57, %v9308_v54 }
 0x2a8   :  { %v2103_v0 = vcombine.low %v12122_v21, %v12121_v9  ;;  %v12128_v9 = vld [vmem:[#allocation96_spill] sm:$0xff] }
 0x2a9   :  { %v2615_v21 = vcombine.low %v12128_v9, %v12127_v3  ;;  %v12133_v3 = vld [vmem:[#allocation138_spill] sm:$0xff]  ;;  %v12136_v9 = vld [vmem:[#allocation187_spill] sm:$0xff] }
 0x2aa   :  { %v9322_v1 = vrot.slane %v2103_v0, %v7343_v50 }
 0x2ab   :  { %5967 = vrot.lane.b32.xlu0 %v12119_v31, %s7201_s14  ;;  %5905 = vrot.lane.b32.xlu1 %v12120_v6, %s7200_s13  ;;  %v12126_v31 = vld [vmem:[#allocation102_spill] sm:$0xff] }
 0x2ac   :  { %v2647_v6 = vcombine.low %v12126_v31, %v12125_v47  ;;  %v2123_v0 = vcombine.low %v9332_v29, %v9322_v1  ;;  %v12132_v31 = vld [vmem:[#allocation139_spill] sm:$0xff] }
 0x2ae   :  { %v9339_v47 = vrot.slane %v2647_v6, %v7343_v50 }
 0x2af   :  { %5971 = vrot.lane.b32.xlu0 %v5386_v48, %s7201_s14  ;;  %5909 = vrot.lane.b32.xlu1 %v5521_v20, %s7200_s13  ;;  %v12129_v48 = vcombine.high %v12094_v53, %v12095_v27  ;;  %v12130_v20 = vld [vmem:[#allocation145_spill] sm:$0xff]  ;;  %v12134_v27 = vcombine.high %v12098_v15, %v12099_v35  ;;  %v9349_v53 = vrot.slane %v2615_v21, %v7343_v50  ;;  %v12140_v21 = vld [vmem:[#allocation232_spill] sm:$0xff] }
 0x2b0   :  { %v3191_v44 = vcombine.low %v12131_v23, %v12130_v20  ;;  %v9353_v20 = vpop.permute.xlu0 %5815  ;;  %v12139_v15 = vcombine.high %v12102_v30, %v12103_v40  ;;  %v12144_v30 = vcombine.high %v12106_v49, %v12107_v59  ;;  %v12145_v49 = vcombine.high %v12110_v34, %v12111_v7  ;;  %v12148_v7 = vld [vmem:[#allocation39_spill] sm:$0xff] }
 0x2b1   :  { %v2667_v6 = vcombine.low %v9349_v53, %v9339_v47  ;;  %v12146_v34 = vcombine.high %v8714_v22, %v8717_v63  ;;  %v12152_v22 = vcombine.high %v8952_v55, %v8964_v39  ;;  %v12157_v39 = vld [vmem:[#allocation123_spill] sm:$0xff] }
 0x2b2   :  { %v9358_v23 = vrot.slane %v3191_v44, %v7343_v50 }
 0x2b3   :  { %6007 = vrot.lane.b32.xlu0 %v1579_v56, %s7196_s10  ;;  %5945 = vrot.lane.b32.xlu1 %v12129_v48, %s7201_s14  ;;  %v3159_v56 = vcombine.low %v12133_v3, %v12132_v31  ;;  %v3735_v48 = vcombine.low %v12136_v9, %v12135_v28  ;;  %v12138_v31 = vld [vmem:[#allocation181_spill] sm:$0xff] }
 0x2b4   :  { %v9379_v11 = vpop.permute.xlu0 %5819 }
 0x2b5   :  { %v9368_v35 = vrot.slane %v3159_v56, %v7343_v50  ;;  %v9375_v9 = vrot.slane %v3735_v48, %v7343_v50  ;;  %v4823_v56 = vcombine.low %v8826_v24, %v8830_v62  ;;  %v5367_v24 = vcombine.low %v9044_v60, %v9050_v37  ;;  %v12147_v37 = vld [vmem:[#allocation38_spill] sm:$0xff] }
 0x2b7   :  { %6011 = vrot.lane.b32.xlu0 %v2123_v0, %s7196_s10  ;;  %5949 = vrot.lane.b32.xlu1 %v12134_v27, %s7201_s14  ;;  %v12137_v0 = vld [vmem:[#allocation182_spill] sm:$0xff]  ;;  %v12141_v27 = vld [vmem:[#allocation231_spill] sm:$0xff]  ;;  %v3211_v44 = vcombine.low %v9368_v35, %v9358_v23 }
 0x2b8   :  { %v3703_v3 = vcombine.low %v12138_v31, %v12137_v0  ;;  %v4279_v28 = vcombine.low %v12141_v27, %v12140_v21  ;;  %v12142_v0 = vld [vmem:[#allocation226_spill] sm:$0xff]  ;;  %v12143_v31 = vld [vmem:[#allocation225_spill] sm:$0xff]  ;;  %v4791_v21 = vcombine.low %v8776_v36, %v8780_v8  ;;  %v9408_v62 = vpop.permute.xlu0 %5823  ;;  %v9413_v36 = vrot.slane %v4823_v56, %v7343_v50 }
 0x2b9   :  { %v5335_v8 = vcombine.low %v9009_v16, %v9012_v43  ;;  %v1695_v27 = vcombine.low %v12148_v7, %v12147_v37  ;;  %v12149_v16 = vld [vmem:[#allocation32_spill] sm:$0xff]  ;;  %v12150_v43 = vld [vmem:[#allocation33_spill] sm:$0xff] }
 0x2ba   :  { %v9387_v40 = vrot.slane %v3703_v3, %v7343_v50  ;;  %v9423_v60 = vrot.slane %v4791_v21, %v7343_v50  ;;  %v5522_v21 = vcombine.high %v9301_v10, %v9288_v25  ;;  %v1580_v25 = vcombine.high %v9315_v57, %v9308_v54 }
 0x2bb   :  { %6015 = vrot.lane.b32.xlu0 %v2667_v6, %s7196_s10  ;;  %5953 = vrot.lane.b32.xlu1 %v12139_v15, %s7201_s14  ;;  %v4247_v6 = vcombine.low %v12143_v31, %v12142_v0  ;;  %v9394_v15 = vrot.slane %v4279_v28, %v7343_v50  ;;  %v1663_v0 = vcombine.low %v12150_v43, %v12149_v16  ;;  %v12161_v16 = vld [vmem:[#allocation116_spill] sm:$0xff] }
 0x2bc   :  { %v3755_v48 = vcombine.low %v9387_v40, %v9375_v9  ;;  %v4843_v28 = vcombine.low %v9423_v60, %v9413_v36  ;;  %v9434_v31 = vpop.permute.xlu0 %5827  ;;  %v9442_v63 = vrot.slane %v5335_v8, %v7343_v50  ;;  %v12158_v8 = vld [vmem:[#allocation122_spill] sm:$0xff]  ;;  %v2124_v57 = vcombine.high %v9332_v29, %v9322_v1  ;;  %v12168_v1 = vld [vmem:[#allocation209_spill] sm:$0xff] }
 0x2bd   :  { %v9404_v59 = vrot.slane %v4247_v6, %v7343_v50  ;;  %12151 = vst [vmem:[#allocation44_spill] sm:$0xff] %v9434_v31  ;;  %v12153_v6 = vld [vmem:[#allocation80_spill] sm:$0xff]  ;;  %v9458_v55 = vrot.slane %v1663_v0, %v7343_v50  ;;  %v2783_v37 = vcombine.low %v12158_v8, %v12157_v39  ;;  %v12167_v39 = vld [vmem:[#allocation210_spill] sm:$0xff]  ;;  %v2668_v8 = vcombine.high %v9349_v53, %v9339_v47 }
 0x2be   :  { %v3871_v29 = vcombine.low %v12168_v1, %v12167_v39  ;;  %v4415_v47 = vcombine.low %v8687_v26, %v8691_v33  ;;  %v4959_v26 = vcombine.low %v8933_v5, %v8937_v52  ;;  %v5503_v5 = vcombine.low %v9171_v14, %v9175_v19 }
 0x2bf   :  { %6019 = vrot.lane.b32.xlu0 %v3211_v44, %s7196_s10  ;;  %5957 = vrot.lane.b32.xlu1 %v12144_v30, %s7201_s14  ;;  %v4299_v3 = vcombine.low %v9404_v59, %v9394_v15  ;;  %v9430_v44 = vrot.slane %v5367_v24, %v7343_v50  ;;  %v12154_v30 = vld [vmem:[#allocation81_spill] sm:$0xff]  ;;  %v12155_v24 = vld [vmem:[#allocation74_spill] sm:$0xff]  ;;  %v4844_v19 = vcombine.high %v9423_v60, %v9413_v36 }
 0x2c0   :  { %v2239_v56 = vcombine.low %v12154_v30, %v12153_v6  ;;  %v9462_v7 = vpop.permute.xlu0 %5831  ;;  %v12163_v6 = vld [vmem:[#allocation165_spill] sm:$0xff]  ;;  %v4423_v1 = vrot.slane %v4415_v47, %v7343_v50 }
 0x2c1   :  { %12159 = vst [vmem:[#allocation45_spill] sm:$0xff] %v9462_v7 }
 0x2c3   :  { %6023 = vrot.lane.b32.xlu0 %v3755_v48, %s7196_s10  ;;  %5961 = vrot.lane.b32.xlu1 %v12145_v49, %s7201_s14  ;;  %v5387_v48 = vcombine.low %v9442_v63, %v9430_v44  ;;  %v9451_v49 = vrot.slane %v1695_v27, %v7343_v50  ;;  %v9469_v27 = vrot.slane %v2239_v56, %v7343_v50 }
 0x2c4   :  { %v9485_v56 = vrot.slane %v2783_v37, %v7343_v50 }
 0x2c5   :  { %v1715_v10 = vcombine.low %v9458_v55, %v9451_v49  ;;  %v1716_v60 = vcombine.high %v9458_v55, %v9451_v49 }
 0x2c7   :  { %6027 = vrot.lane.b32.xlu0 %v4299_v3, %s7196_s10  ;;  %5965 = vrot.lane.b32.xlu1 %v12146_v34, %s7201_s14  ;;  %v12156_v3 = vld [vmem:[#allocation75_spill] sm:$0xff] }
 0x2c8   :  { %v2207_v34 = vcombine.low %v12156_v3, %v12155_v24  ;;  %v9489_v3 = vpop.permute.xlu0 %5835 }
 0x2c9   :  { %12166 = vst [vmem:[#allocation86_spill] sm:$0xff] %v9489_v3 }
 0x2ca   :  { %v9476_v0 = vrot.slane %v2207_v34, %v7343_v50 }
 0x2cb   :  { %6031 = vrot.lane.b32.xlu0 %v4843_v28, %s7196_s10  ;;  %5969 = vrot.lane.b32.xlu1 %v12152_v22, %s7201_s14  ;;  %v12160_v28 = vld [vmem:[#allocation117_spill] sm:$0xff]  ;;  %v12162_v22 = vld [vmem:[#allocation166_spill] sm:$0xff] }
 0x2cc   :  { %v2751_v43 = vcombine.low %v12161_v16, %v12160_v28  ;;  %v3327_v54 = vcombine.low %v12163_v6, %v12162_v22  ;;  %v2259_v30 = vcombine.low %v9476_v0, %v9469_v27  ;;  %v12170_v28 = vld [vmem:[#allocation203_spill] sm:$0xff]  ;;  %v9507_v22 = vpop.permute.xlu1 %5817  ;;  %v9514_v53 = vpop.permute.xlu0 %5839  ;;  %v3212_v6 = vcombine.high %v9368_v35, %v9358_v23 }
 0x2cd   :  { %12171 = vst [vmem:[#allocation87_spill] sm:$0xff] %v9507_v22  ;;  %12172 = vst [vmem:[#allocation128_spill] sm:$0xff] %v9514_v53  ;;  %v3756_v23 = vcombine.high %v9387_v40, %v9375_v9  ;;  %v4300_v9 = vcombine.high %v9404_v59, %v9394_v15  ;;  %v5511_v59 = vrot.slane %v5503_v5, %v7343_v50  ;;  %v12190_v5 = vld [vmem:[#allocation108_spill] sm:$0xff] }
 0x2ce   :  { %v9494_v34 = vrot.slane %v2751_v43, %v7343_v50 }
 0x2cf   :  { %6035 = vrot.lane.b32.xlu0 %v5387_v48, %s7196_s10  ;;  %5973 = vrot.lane.b32.xlu1 %v5522_v21, %s7201_s14  ;;  %v12164_v48 = vld [vmem:[#allocation160_spill] sm:$0xff]  ;;  %v12165_v21 = vld [vmem:[#allocation159_spill] sm:$0xff] }
 0x2d0   :  { %v3295_v24 = vcombine.low %v12165_v21, %v12164_v48  ;;  %v2803_v37 = vcombine.low %v9494_v34, %v9485_v56  ;;  %v12174_v48 = vld [vmem:[#allocation245_spill] sm:$0xff]  ;;  %v9527_v33 = vpop.permute.xlu1 %5821 }
 0x2d1   :  { %12175 = vst [vmem:[#allocation129_spill] sm:$0xff] %v9527_v33 }
 0x2d2   :  { %v3303_v43 = vrot.slane %v3295_v24, %v7343_v50 }
 0x2d3   :  { %6071 = vrot.lane.b32.xlu0 %v1580_v25, %s7202_s15  ;;  %6009 = vrot.lane.b32.xlu1 %v1715_v10, %s7196_s10  ;;  %v9503_v25 = vrot.slane %v3327_v54, %v7343_v50  ;;  %v12169_v10 = vld [vmem:[#allocation204_spill] sm:$0xff] }
 0x2d4   :  { %v3839_v16 = vcombine.low %v12170_v28, %v12169_v10 }
 0x2d5   :  { %v3347_v54 = vcombine.low %v3303_v43, %v9503_v25 }
 0x2d6   :  { %v3847_v24 = vrot.slane %v3839_v16, %v7343_v50  ;;  %v5388_v16 = vcombine.high %v9442_v63, %v9430_v44  ;;  %v2260_v63 = vcombine.high %v9476_v0, %v9469_v27 }
 0x2d7   :  { %6075 = vrot.lane.b32.xlu0 %v2124_v57, %s7202_s15  ;;  %6013 = vrot.lane.b32.xlu1 %v2259_v30, %s7196_s10  ;;  %v3879_v57 = vrot.slane %v3871_v29, %v7343_v50  ;;  %v12173_v30 = vld [vmem:[#allocation246_spill] sm:$0xff]  ;;  %v4927_v29 = vcombine.low %v8907_v13, %v8911_v38  ;;  %v5471_v13 = vcombine.low %v9118_v58, %v9121_v41  ;;  %v9548_v38 = vpop.permute.xlu1 %5825 }
 0x2d8   :  { %v4383_v21 = vcombine.low %v12174_v48, %v12173_v30  ;;  %12176 = vst [vmem:[#allocation171_spill] sm:$0xff] %v9548_v38  ;;  %v12181_v30 = vld [vmem:[#allocation24_spill] sm:$0xff] }
 0x2d9   :  { %v3891_v35 = vcombine.low %v3847_v24, %v3879_v57  ;;  %v4935_v10 = vrot.slane %v4927_v29, %v7343_v50  ;;  %v5479_v58 = vrot.slane %v5471_v13, %v7343_v50  ;;  %v12189_v29 = vld [vmem:[#allocation109_spill] sm:$0xff]  ;;  %v12194_v13 = vld [vmem:[#allocation152_spill] sm:$0xff] }
 0x2db   :  { %6079 = vrot.lane.b32.xlu0 %v2668_v8, %s7202_s15  ;;  %6017 = vrot.lane.b32.xlu1 %v2803_v37, %s7196_s10  ;;  %v4391_v8 = vrot.slane %v4383_v21, %v7343_v50  ;;  %v4967_v37 = vrot.slane %v4959_v26, %v7343_v50  ;;  %v9561_v41 = vpop.permute.xlu1 %5829  ;;  %v5523_v47 = vcombine.low %v5479_v58, %v5511_v59  ;;  %v12184_v21 = vld [vmem:[#allocation67_spill] sm:$0xff]  ;;  %v12185_v26 = vld [vmem:[#allocation66_spill] sm:$0xff] }
 0x2dc   :  { %12177 = vst [vmem:[#allocation172_spill] sm:$0xff] %v9561_v41 }
 0x2dd   :  { %v4435_v40 = vcombine.low %v4391_v8, %v4423_v1  ;;  %v4979_v15 = vcombine.low %v4935_v10, %v4967_v37 }
 0x2df   :  { %6083 = vrot.lane.b32.xlu0 %v3212_v6, %s7202_s15  ;;  %6021 = vrot.lane.b32.xlu1 %v3347_v54, %s7196_s10  ;;  %v9573_v6 = vpop.permute.xlu1 %5833  ;;  %v12180_v54 = vld [vmem:[#allocation25_spill] sm:$0xff] }
 0x2e0   :  { %12179 = vst [vmem:[#allocation217_spill] sm:$0xff] %v9573_v6  ;;  %v12182_v48 = vcombine.low %v12180_v54, %v12181_v30 }
 0x2e1   :  { %v9529_v39 = vpop.permute.xlu0 %5843 }
 0x2e3   :  { %6087 = vrot.lane.b32.xlu0 %v3756_v23, %s7202_s15  ;;  %6025 = vrot.lane.b32.xlu1 %v3891_v35, %s7196_s10  ;;  %v12186_v23 = vcombine.low %v12184_v21, %v12185_v26  ;;  %v9589_v49 = vpop.permute.xlu1 %5837  ;;  %v2804_v35 = vcombine.high %v9494_v34, %v9485_v56 }
 0x2e4   :  { %12187 = vst [vmem:[#allocation19_spill] sm:$0xff] %v9589_v49  ;;  %v12220_v49 = vld [vmem:[#allocation88_spill] sm:$0xff] }
 0x2e5   :  { %v9541_v52 = vpop.permute.xlu0 %5879 }
 0x2e7   :  { %6091 = vrot.lane.b32.xlu0 %v4300_v9, %s7202_s15  ;;  %6029 = vrot.lane.b32.xlu1 %v4435_v40, %s7196_s10  ;;  %v12191_v9 = vcombine.low %v12189_v29, %v12190_v5  ;;  %v9600_v27 = vpop.permute.xlu1 %5841  ;;  %v3348_v40 = vcombine.high %v3303_v43, %v9503_v25 }
 0x2e8   :  { %12192 = vst [vmem:[#allocation13_spill] sm:$0xff] %v9600_v27  ;;  %v12214_v27 = vld [vmem:[#allocation46_spill] sm:$0xff] }
 0x2e9   :  { %v9553_v14 = vpop.permute.xlu0 %5883 }
 0x2eb   :  { %6095 = vrot.lane.b32.xlu0 %v4844_v19, %s7202_s15  ;;  %6033 = vrot.lane.b32.xlu1 %v4979_v15, %s7196_s10  ;;  %v12195_v19 = vld [vmem:[#allocation151_spill] sm:$0xff] }
 0x2ec   :  { %v12196_v15 = vcombine.low %v12194_v13, %v12195_v19 }
 0x2ed   :  { %v9563_v28 = vpop.permute.xlu0 %5887 }
 0x2ef   :  { %6099 = vrot.lane.b32.xlu0 %v5388_v16, %s7202_s15  ;;  %6037 = vrot.lane.b32.xlu1 %v5523_v47, %s7196_s10  ;;  %v3892_v16 = vcombine.high %v3847_v24, %v3879_v57  ;;  %v12198_v47 = vld [vmem:[#allocation198_spill] sm:$0xff] }
 0x2f1   :  { %v9569_v36 = vpop.permute.xlu0 %5891 }
 0x2f2   :  { %12178 = vst [vmem:[#allocation213_spill] sm:$0xff] %v9569_v36 }
 0x2f3   :  { %6135 = vrot.lane.b32.xlu0 %v12182_v48, %s7203_s16  ;;  %6073 = vrot.lane.b32.xlu1 %v1716_v60, %s7202_s15  ;;  %v12199_v60 = vld [vmem:[#allocation196_spill] sm:$0xff] }
 0x2f4   :  { %v12200_v48 = vcombine.low %v12198_v47, %v12199_v60 }
 0x2f5   :  { %v9580_v44 = vpop.permute.xlu0 %5895 }
 0x2f6   :  { %12183 = vst [vmem:[#allocation18_spill] sm:$0xff] %v9580_v44 }
 0x2f7   :  { %6139 = vrot.lane.b32.xlu0 %v12186_v23, %s7203_s16  ;;  %6077 = vrot.lane.b32.xlu1 %v2260_v63, %s7202_s15  ;;  %v4436_v63 = vcombine.high %v4391_v8, %v4423_v1  ;;  %v12202_v23 = vld [vmem:[#allocation240_spill] sm:$0xff] }
 0x2f9   :  { %v9591_v55 = vpop.permute.xlu0 %5899 }
 0x2fa   :  { %12188 = vst [vmem:[#allocation12_spill] sm:$0xff] %v9591_v55 }
 0x2fb   :  { %6143 = vrot.lane.b32.xlu0 %v12191_v9, %s7203_s16  ;;  %6081 = vrot.lane.b32.xlu1 %v2804_v35, %s7202_s15  ;;  %v12203_v35 = vld [vmem:[#allocation238_spill] sm:$0xff] }
 0x2fc   :  { %v12204_v9 = vcombine.low %v12202_v23, %v12203_v35  ;;  %v12244_v33 = vcombine.high %v12202_v23, %v12203_v35  ;;  %v12253_v23 = vcombine.high %v8870_v45, %v8864_v4  ;;  %v12255_v35 = vld [vmem:[#allocation50_spill] sm:$0xff] }
 0x2fd   :  { %v9602_v0 = vpop.permute.xlu0 %5903 }
 0x2fe   :  { %12193 = vst [vmem:[#allocation60_spill] sm:$0xff] %v9602_v0 }
 0x2ff   :  { %6147 = vrot.lane.b32.xlu0 %v12196_v15, %s7203_s16  ;;  %6085 = vrot.lane.b32.xlu1 %v3348_v40, %s7202_s15  ;;  %v4980_v40 = vcombine.high %v4935_v10, %v4967_v37  ;;  %v12206_v15 = vcombine.low %v8870_v45, %v8864_v4 }
 0x301   :  { %v9610_v56 = vpop.permute.xlu1 %5845  ;;  %v9612_v34 = vpop.permute.xlu0 %5907 }
 0x302   :  { %12197 = vst [vmem:[#allocation61_spill] sm:$0xff] %v9610_v56  ;;  %v12252_v56 = vcombine.low %v12250_v32, %v12251_v17 }
 0x303   :  { %6151 = vrot.lane.b32.xlu0 %v12200_v48, %s7203_s16  ;;  %6089 = vrot.lane.b32.xlu1 %v3892_v16, %s7202_s15  ;;  %v5524_v16 = vcombine.high %v5479_v58, %v5511_v59  ;;  %v12208_v48 = vld [vmem:[#allocation304_spill] sm:$0xff]  ;;  %v12216_v59 = vcombine.high %v12180_v54, %v12181_v30  ;;  %v12225_v54 = vld [vmem:[#allocation131_spill] sm:$0xff]  ;;  %v12226_v30 = vld [vmem:[#allocation130_spill] sm:$0xff] }
 0x305   :  { %v9619_v25 = vpop.permute.xlu1 %5881  ;;  %v9621_v43 = vpop.permute.xlu0 %5943 }
 0x306   :  { %12201 = vst [vmem:[#allocation54_spill] sm:$0xff] %v9619_v25  ;;  %v12246_v25 = vld [vmem:[#allocation14_spill] sm:$0xff] }
 0x307   :  { %6155 = vrot.lane.b32.xlu0 %v12204_v9, %s7203_s16  ;;  %6093 = vrot.lane.b32.xlu1 %v4436_v63, %s7202_s15  ;;  %v12209_v63 = vld [vmem:[#allocation302_spill] sm:$0xff] }
 0x308   :  { %v12210_v9 = vcombine.low %v12208_v48, %v12209_v63  ;;  %v12260_v4 = vcombine.high %v12208_v48, %v12209_v63 }
 0x309   :  { %v9628_v57 = vpop.permute.xlu1 %5885  ;;  %v9630_v24 = vpop.permute.xlu0 %5947 }
 0x30a   :  { %12205 = vst [vmem:[#allocation55_spill] sm:$0xff] %v9628_v57 }
 0x30b   :  { %6159 = vrot.lane.b32.xlu0 %v12206_v15, %s7203_s16  ;;  %6097 = vrot.lane.b32.xlu1 %v4980_v40, %s7202_s15  ;;  %v12213_v15 = vld [vmem:[#allocation47_spill] sm:$0xff] }
 0x30c   :  { %v12215_v40 = vcombine.low %v12213_v15, %v12214_v27  ;;  %v12267_v63 = vcombine.high %v12213_v15, %v12214_v27 }
 0x30d   :  { %v9637_v1 = vpop.permute.xlu1 %5889  ;;  %v9639_v8 = vpop.permute.xlu0 %5951 }
 0x30e   :  { %12207 = vst [vmem:[#allocation103_spill] sm:$0xff] %v9637_v1 }
 0x30f   :  { %6163 = vrot.lane.b32.xlu0 %v12210_v9, %s7203_s16  ;;  %6101 = vrot.lane.b32.xlu1 %v5524_v16, %s7202_s15  ;;  %v12219_v16 = vld [vmem:[#allocation89_spill] sm:$0xff] }
 0x310   :  { %v12221_v6 = vcombine.low %v12219_v16, %v12220_v49  ;;  %v12274_v15 = vcombine.high %v12219_v16, %v12220_v49  ;;  %v12281_v16 = vcombine.high %v12225_v54, %v12226_v30 }
 0x311   :  { %v9646_v37 = vpop.permute.xlu1 %5893  ;;  %v9648_v10 = vpop.permute.xlu0 %5955 }
 0x312   :  { %12211 = vst [vmem:[#allocation102_spill] sm:$0xff] %v9646_v37  ;;  %12212 = vst [vmem:[#allocation97_spill] sm:$0xff] %v9648_v10  ;;  %v12222_v37 = vcombine.high %v12184_v21, %v12185_v26  ;;  %v12231_v21 = vld [vmem:[#allocation174_spill] sm:$0xff]  ;;  %v12232_v26 = vld [vmem:[#allocation173_spill] sm:$0xff] }
 0x313   :  { %6137 = vrot.lane.b32.xlu1 %v12215_v40, %s7203_s16  ;;  %6199 = vrot.lane.b32.xlu0 %v12216_v59, %s7204_s17  ;;  %v12227_v59 = vcombine.low %v12225_v54, %v12226_v30  ;;  %v12288_v30 = vcombine.high %v12231_v21, %v12232_v26  ;;  %v12427_v10 = vld [vmem:[#allocation283_spill] sm:$0xff] }
 0x315   :  { %v9658_v58 = vpop.permute.xlu1 %5897  ;;  %v9660_v9 = vpop.permute.xlu0 %5959 }
 0x316   :  { %12217 = vst [vmem:[#allocation96_spill] sm:$0xff] %v9658_v58  ;;  %12218 = vst [vmem:[#allocation145_spill] sm:$0xff] %v9660_v9  ;;  %v12228_v58 = vcombine.high %v12189_v29, %v12190_v5  ;;  %v12236_v29 = vld [vmem:[#allocation220_spill] sm:$0xff]  ;;  %v12237_v5 = vld [vmem:[#allocation218_spill] sm:$0xff] }
 0x317   :  { %6141 = vrot.lane.b32.xlu1 %v12221_v6, %s7203_s16  ;;  %6203 = vrot.lane.b32.xlu0 %v12222_v37, %s7204_s17  ;;  %v12233_v37 = vcombine.low %v12231_v21, %v12232_v26  ;;  %v12294_v26 = vcombine.high %v12236_v29, %v12237_v5 }
 0x319   :  { %v9670_v40 = vpop.permute.xlu1 %5901  ;;  %v9672_v41 = vpop.permute.xlu0 %5963 }
 0x31a   :  { %12223 = vst [vmem:[#allocation144_spill] sm:$0xff] %v9670_v40  ;;  %12224 = vst [vmem:[#allocation139_spill] sm:$0xff] %v9672_v41  ;;  %v12234_v40 = vcombine.high %v12194_v13, %v12195_v19  ;;  %v12241_v13 = vld [vmem:[#allocation256_spill] sm:$0xff]  ;;  %v12242_v19 = vld [vmem:[#allocation255_spill] sm:$0xff] }
 0x31b   :  { %6145 = vrot.lane.b32.xlu1 %v12227_v59, %s7203_s16  ;;  %6207 = vrot.lane.b32.xlu0 %v12228_v58, %s7204_s17  ;;  %v12238_v58 = vcombine.low %v12236_v29, %v12237_v5  ;;  %v12300_v5 = vcombine.high %v12241_v13, %v12242_v19 }
 0x31d   :  { %v9682_v6 = vpop.permute.xlu1 %5905  ;;  %v9684_v1 = vpop.permute.xlu0 %5967 }
 0x31e   :  { %12229 = vst [vmem:[#allocation138_spill] sm:$0xff] %v9682_v6  ;;  %12230 = vst [vmem:[#allocation188_spill] sm:$0xff] %v9684_v1  ;;  %v12239_v6 = vcombine.high %v12198_v47, %v12199_v60  ;;  %v12248_v60 = vld [vmem:[#allocation10_spill] sm:$0xff] }
 0x31f   :  { %6149 = vrot.lane.b32.xlu1 %v12233_v37, %s7203_s16  ;;  %6211 = vrot.lane.b32.xlu0 %v12234_v40, %s7204_s17  ;;  %v12243_v40 = vcombine.low %v12241_v13, %v12242_v19  ;;  %v12306_v19 = vcombine.high %v12250_v32, %v12251_v17  ;;  %v12313_v32 = vcombine.high %v9209_v46, %v9206_v51 }
 0x321   :  { %v9694_v59 = vpop.permute.xlu1 %5909  ;;  %v9696_v38 = vpop.permute.xlu0 %5971 }
 0x322   :  { %12235 = vst [vmem:[#allocation187_spill] sm:$0xff] %v9694_v59 }
 0x323   :  { %6153 = vrot.lane.b32.xlu1 %v12238_v58, %s7203_s16  ;;  %6215 = vrot.lane.b32.xlu0 %v12239_v6, %s7204_s17  ;;  %v12245_v58 = vld [vmem:[#allocation16_spill] sm:$0xff] }
 0x324   :  { %v1815_v22 = vcombine.low %v12246_v25, %v12245_v58  ;;  %v12249_v6 = vld [vmem:[#allocation8_spill] sm:$0xff] }
 0x325   :  { %v9706_v37 = vpop.permute.xlu1 %5945  ;;  %v9708_v57 = vpop.permute.xlu0 %6007  ;;  %v12257_v58 = vld [vmem:[#allocation56_spill] sm:$0xff] }
 0x326   :  { %12240 = vst [vmem:[#allocation182_spill] sm:$0xff] %v9706_v37  ;;  %v1783_v37 = vcombine.low %v12249_v6, %v12248_v60  ;;  %v9743_v60 = vrot.slane %v1815_v22, %v7343_v50  ;;  %v12261_v6 = vld [vmem:[#allocation94_spill] sm:$0xff] }
 0x327   :  { %6157 = vrot.lane.b32.xlu1 %v12243_v40, %s7203_s16  ;;  %6219 = vrot.lane.b32.xlu0 %v12244_v33, %s7204_s17  ;;  %v12254_v33 = vld [vmem:[#allocation52_spill] sm:$0xff]  ;;  %v12256_v40 = vld [vmem:[#allocation58_spill] sm:$0xff] }
 0x328   :  { %v2327_v25 = vcombine.low %v12255_v35, %v12254_v33  ;;  %v9754_v45 = vrot.slane %v1783_v37, %v7343_v50  ;;  %v12263_v35 = vld [vmem:[#allocation100_spill] sm:$0xff] }
 0x329   :  { %v9720_v59 = vpop.permute.xlu1 %5949  ;;  %v9722_v47 = vpop.permute.xlu0 %6011 }
 0x32a   :  { %12247 = vst [vmem:[#allocation181_spill] sm:$0xff] %v9720_v59  ;;  %v2359_v59 = vcombine.low %v12257_v58, %v12256_v40  ;;  %v12264_v40 = vld [vmem:[#allocation98_spill] sm:$0xff]  ;;  %v9767_v53 = vrot.slane %v2327_v25, %v7343_v50  ;;  %v1848_v44 = vcombine.high %v9754_v45, %v9743_v60 }
 0x32b   :  { %6161 = vrot.lane.b32.xlu1 %v12252_v56, %s7203_s16  ;;  %6223 = vrot.lane.b32.xlu0 %v12253_v23, %s7204_s17  ;;  %v12259_v56 = vcombine.low %v9209_v46, %v9206_v51  ;;  %v12262_v23 = vld [vmem:[#allocation92_spill] sm:$0xff]  ;;  %v2903_v22 = vcombine.low %v12264_v40, %v12263_v35  ;;  %v12269_v25 = vld [vmem:[#allocation134_spill] sm:$0xff] }
 0x32c   :  { %v2871_v33 = vcombine.low %v12262_v23, %v12261_v6  ;;  %v9770_v48 = vrot.slane %v2359_v59, %v7343_v50  ;;  %v12268_v6 = vld [vmem:[#allocation136_spill] sm:$0xff]  ;;  %v12270_v35 = vld [vmem:[#allocation142_spill] sm:$0xff] }
 0x32d   :  { %v9738_v1 = vpop.permute.xlu1 %5953  ;;  %v9740_v0 = vpop.permute.xlu0 %6015  ;;  %v3415_v23 = vcombine.low %v12269_v25, %v12268_v6  ;;  %v12271_v59 = vld [vmem:[#allocation140_spill] sm:$0xff]  ;;  %v12277_v6 = vld [vmem:[#allocation185_spill] sm:$0xff]  ;;  %v12278_v25 = vld [vmem:[#allocation183_spill] sm:$0xff] }
 0x32e   :  { %12258 = vst [vmem:[#allocation232_spill] sm:$0xff] %v9738_v1  ;;  %v9778_v37 = vrot.slane %v2871_v33, %v7343_v50  ;;  %v3447_v40 = vcombine.low %v12271_v59, %v12270_v35  ;;  %v2391_v27 = vcombine.low %v9767_v53, %v9770_v48  ;;  %v3991_v35 = vcombine.low %v12278_v25, %v12277_v6  ;;  %v12285_v6 = vld [vmem:[#allocation227_spill] sm:$0xff] }
 0x32f   :  { %6165 = vrot.lane.b32.xlu1 %v12259_v56, %s7203_s16  ;;  %6227 = vrot.lane.b32.xlu0 %v12260_v4, %s7204_s17  ;;  %v1847_v56 = vcombine.low %v9754_v45, %v9743_v60  ;;  %v9781_v4 = vrot.slane %v2903_v22, %v7343_v50  ;;  %v12275_v22 = vld [vmem:[#allocation179_spill] sm:$0xff]  ;;  %v9809_v55 = vrot.slane %v3415_v23, %v7343_v50 }
 0x330   :  { %v9812_v49 = vrot.slane %v3447_v40, %v7343_v50  ;;  %v9833_v54 = vrot.slane %v3991_v35, %v7343_v50  ;;  %v12322_v45 = vld [vmem:[#allocation163_spill] sm:$0xff] }
 0x331   :  { %v9760_v58 = vpop.permute.xlu1 %5957  ;;  %v9762_v1 = vpop.permute.xlu0 %6019  ;;  %v2935_v33 = vcombine.low %v9778_v37, %v9781_v4 }
 0x332   :  { %12265 = vst [vmem:[#allocation231_spill] sm:$0xff] %v9760_v58  ;;  %12266 = vst [vmem:[#allocation226_spill] sm:$0xff] %v9762_v1  ;;  %v3479_v40 = vcombine.low %v9809_v55, %v9812_v49 }
 0x333   :  { %6201 = vrot.lane.b32.xlu1 %v12267_v63, %s7204_s17  ;;  %6263 = vrot.lane.b32.xlu0 %v1847_v56, %s7205_s18  ;;  %v12276_v56 = vld [vmem:[#allocation177_spill] sm:$0xff] }
 0x334   :  { %v3959_v63 = vcombine.low %v12276_v56, %v12275_v22  ;;  %v12284_v56 = vld [vmem:[#allocation229_spill] sm:$0xff] }
 0x335   :  { %v9787_v58 = vpop.permute.xlu1 %5961  ;;  %v9789_v41 = vpop.permute.xlu0 %6023  ;;  %v4535_v25 = vcombine.low %v12285_v6, %v12284_v56  ;;  %v12291_v56 = vld [vmem:[#allocation265_spill] sm:$0xff]  ;;  %v12292_v6 = vld [vmem:[#allocation263_spill] sm:$0xff] }
 0x336   :  { %12272 = vst [vmem:[#allocation225_spill] sm:$0xff] %v9787_v58  ;;  %12273 = vst [vmem:[#allocation38_spill] sm:$0xff] %v9789_v41  ;;  %v5079_v35 = vcombine.low %v12292_v6, %v12291_v56 }
 0x337   :  { %6205 = vrot.lane.b32.xlu1 %v12274_v15, %s7204_s17  ;;  %6267 = vrot.lane.b32.xlu0 %v2391_v27, %s7205_s18  ;;  %v12282_v27 = vld [vmem:[#allocation223_spill] sm:$0xff]  ;;  %v12283_v15 = vld [vmem:[#allocation221_spill] sm:$0xff] }
 0x338   :  { %v4503_v22 = vcombine.low %v12283_v15, %v12282_v27  ;;  %v12289_v27 = vld [vmem:[#allocation261_spill] sm:$0xff]  ;;  %v12290_v15 = vld [vmem:[#allocation259_spill] sm:$0xff]  ;;  %v9875_v29 = vrot.slane %v5079_v35, %v7343_v50 }
 0x339   :  { %v9804_v59 = vpop.permute.xlu1 %5965  ;;  %v9806_v58 = vpop.permute.xlu0 %6027 }
 0x33a   :  { %12279 = vst [vmem:[#allocation39_spill] sm:$0xff] %v9804_v59  ;;  %12280 = vst [vmem:[#allocation32_spill] sm:$0xff] %v9806_v58  ;;  %v9830_v58 = vrot.slane %v3959_v63, %v7343_v50  ;;  %v5047_v63 = vcombine.low %v12290_v15, %v12289_v27  ;;  %v12297_v27 = vld [vmem:[#allocation295_spill] sm:$0xff]  ;;  %v12298_v15 = vld [vmem:[#allocation293_spill] sm:$0xff] }
 0x33b   :  { %6209 = vrot.lane.b32.xlu1 %v12281_v16, %s7204_s17  ;;  %6271 = vrot.lane.b32.xlu0 %v2935_v33, %s7205_s18  ;;  %v9841_v33 = vrot.slane %v4503_v22, %v7343_v50  ;;  %v9844_v16 = vrot.slane %v4535_v25, %v7343_v50  ;;  %v12295_v25 = vld [vmem:[#allocation291_spill] sm:$0xff]  ;;  %v5623_v56 = vcombine.low %v12298_v15, %v12297_v27  ;;  %v12304_v27 = vld [vmem:[#allocation34_spill] sm:$0xff] }
 0x33c   :  { %v4023_v21 = vcombine.low %v9830_v58, %v9833_v54  ;;  %v9872_v3 = vrot.slane %v5047_v63, %v7343_v50 }
 0x33d   :  { %v9823_v59 = vpop.permute.xlu1 %5969  ;;  %v9825_v23 = vpop.permute.xlu0 %6031  ;;  %v4567_v22 = vcombine.low %v9841_v33, %v9844_v16  ;;  %v9896_v13 = vrot.slane %v5623_v56, %v7343_v50 }
 0x33e   :  { %12286 = vst [vmem:[#allocation33_spill] sm:$0xff] %v9823_v59  ;;  %12287 = vst [vmem:[#allocation80_spill] sm:$0xff] %v9825_v23  ;;  %v5111_v35 = vcombine.low %v9872_v3, %v9875_v29 }
 0x33f   :  { %6213 = vrot.lane.b32.xlu1 %v12288_v30, %s7204_s17  ;;  %6275 = vrot.lane.b32.xlu0 %v3479_v40, %s7205_s18  ;;  %v12296_v40 = vld [vmem:[#allocation289_spill] sm:$0xff] }
 0x340   :  { %v5591_v30 = vcombine.low %v12296_v40, %v12295_v25  ;;  %v12303_v40 = vld [vmem:[#allocation36_spill] sm:$0xff] }
 0x341   :  { %v9850_v59 = vpop.permute.xlu1 %5973  ;;  %v9852_v23 = vpop.permute.xlu0 %6035  ;;  %v1951_v15 = vcombine.low %v12304_v27, %v12303_v40  ;;  %v12309_v40 = vld [vmem:[#allocation78_spill] sm:$0xff]  ;;  %v12310_v27 = vld [vmem:[#allocation76_spill] sm:$0xff] }
 0x342   :  { %12293 = vst [vmem:[#allocation81_spill] sm:$0xff] %v9850_v59  ;;  %v9893_v41 = vrot.slane %v5591_v30, %v7343_v50  ;;  %v2495_v30 = vcombine.low %v12310_v27, %v12309_v40 }
 0x343   :  { %6217 = vrot.lane.b32.xlu1 %v12294_v26, %s7204_s17  ;;  %6279 = vrot.lane.b32.xlu0 %v4023_v21, %s7205_s18  ;;  %v12301_v21 = vld [vmem:[#allocation30_spill] sm:$0xff]  ;;  %v12302_v26 = vld [vmem:[#allocation28_spill] sm:$0xff]  ;;  %v9917_v17 = vrot.slane %v1951_v15, %v7343_v50 }
 0x344   :  { %v1919_v25 = vcombine.low %v12302_v26, %v12301_v21  ;;  %v12308_v21 = vld [vmem:[#allocation70_spill] sm:$0xff]  ;;  %v5655_v9 = vcombine.low %v9893_v41, %v9896_v13  ;;  %v9940_v46 = vrot.slane %v2495_v30, %v7343_v50 }
 0x345   :  { %v9867_v6 = vpop.permute.xlu1 %6009  ;;  %v9869_v59 = vpop.permute.xlu0 %6071 }
 0x346   :  { %12299 = vst [vmem:[#allocation74_spill] sm:$0xff] %v9867_v6 }
 0x347   :  { %6221 = vrot.lane.b32.xlu1 %v12300_v5, %s7204_s17  ;;  %6283 = vrot.lane.b32.xlu0 %v4567_v22, %s7205_s18  ;;  %v9904_v22 = vrot.slane %v1919_v25, %v7343_v50  ;;  %v12307_v5 = vld [vmem:[#allocation72_spill] sm:$0xff]  ;;  %v12314_v25 = vld [vmem:[#allocation114_spill] sm:$0xff] }
 0x348   :  { %v2463_v26 = vcombine.low %v12308_v21, %v12307_v5  ;;  %v12316_v5 = vld [vmem:[#allocation120_spill] sm:$0xff]  ;;  %v12317_v21 = vld [vmem:[#allocation118_spill] sm:$0xff] }
 0x349   :  { %v9886_v6 = vpop.permute.xlu1 %6013  ;;  %v9888_v63 = vpop.permute.xlu0 %6075  ;;  %v3039_v40 = vcombine.low %v12317_v21, %v12316_v5  ;;  %v1983_v15 = vcombine.low %v9904_v22, %v9917_v17 }
 0x34a   :  { %12305 = vst [vmem:[#allocation75_spill] sm:$0xff] %v9886_v6  ;;  %v9937_v51 = vrot.slane %v2463_v26, %v7343_v50  ;;  %v12323_v26 = vld [vmem:[#allocation161_spill] sm:$0xff] }
 0x34b   :  { %6225 = vrot.lane.b32.xlu1 %v12306_v19, %s7204_s17  ;;  %6287 = vrot.lane.b32.xlu0 %v5111_v35, %s7205_s18  ;;  %v12315_v35 = vld [vmem:[#allocation112_spill] sm:$0xff]  ;;  %v3583_v5 = vcombine.low %v12323_v26, %v12322_v45  ;;  %v12328_v26 = vld [vmem:[#allocation207_spill] sm:$0xff] }
 0x34c   :  { %v3007_v19 = vcombine.low %v12315_v35, %v12314_v25  ;;  %v12320_v25 = vld [vmem:[#allocation157_spill] sm:$0xff]  ;;  %v12321_v35 = vld [vmem:[#allocation155_spill] sm:$0xff] }
 0x34d   :  { %v9910_v6 = vpop.permute.xlu1 %6017  ;;  %v9912_v56 = vpop.permute.xlu0 %6079  ;;  %v3551_v60 = vcombine.low %v12321_v35, %v12320_v25  ;;  %v12326_v25 = vld [vmem:[#allocation201_spill] sm:$0xff]  ;;  %v12327_v35 = vld [vmem:[#allocation199_spill] sm:$0xff] }
 0x34e   :  { %12311 = vst [vmem:[#allocation123_spill] sm:$0xff] %v9910_v6  ;;  %12312 = vst [vmem:[#allocation122_spill] sm:$0xff] %v9912_v56  ;;  %v4095_v45 = vcombine.low %v12327_v35, %v12326_v25  ;;  %v12335_v25 = vld [vmem:[#allocation247_spill] sm:$0xff] }
 0x34f   :  { %6229 = vrot.lane.b32.xlu1 %v12313_v32, %s7204_s17  ;;  %6291 = vrot.lane.b32.xlu0 %v5655_v9, %s7205_s18  ;;  %v9945_v9 = vrot.slane %v3007_v19, %v7343_v50  ;;  %v9948_v32 = vrot.slane %v3039_v40, %v7343_v50  ;;  %v2936_v40 = vcombine.high %v9778_v37, %v9781_v4  ;;  %v12332_v37 = vld [vmem:[#allocation243_spill] sm:$0xff]  ;;  %v12333_v4 = vld [vmem:[#allocation241_spill] sm:$0xff] }
 0x351   :  { %v9928_v27 = vpop.permute.xlu1 %6021  ;;  %v9930_v6 = vpop.permute.xlu0 %6083  ;;  %v3071_v19 = vcombine.low %v9945_v9, %v9948_v32 }
 0x352   :  { %12318 = vst [vmem:[#allocation117_spill] sm:$0xff] %v9928_v27  ;;  %12319 = vst [vmem:[#allocation116_spill] sm:$0xff] %v9930_v6 }
 0x353   :  { %6265 = vrot.lane.b32.xlu1 %v1983_v15, %s7205_s18  ;;  %6327 = vrot.lane.b32.xlu0 %v1848_v44, %s7206_s19  ;;  %v2527_v15 = vcombine.low %v9937_v51, %v9940_v46  ;;  %v2392_v44 = vcombine.high %v9767_v53, %v9770_v48  ;;  %v9977_v53 = vrot.slane %v3551_v60, %v7343_v50 }
 0x354   :  { %v9980_v48 = vrot.slane %v3583_v5, %v7343_v50  ;;  %v3480_v5 = vcombine.high %v9809_v55, %v9812_v49 }
 0x355   :  { %v9954_v21 = vpop.permute.xlu1 %6025  ;;  %v9956_v30 = vpop.permute.xlu0 %6087 }
 0x356   :  { %12324 = vst [vmem:[#allocation166_spill] sm:$0xff] %v9954_v21  ;;  %12325 = vst [vmem:[#allocation165_spill] sm:$0xff] %v9956_v30  ;;  %v12329_v21 = vld [vmem:[#allocation205_spill] sm:$0xff]  ;;  %v3615_v60 = vcombine.low %v9977_v53, %v9980_v48 }
 0x357   :  { %6269 = vrot.lane.b32.xlu1 %v2527_v15, %s7205_s18  ;;  %6331 = vrot.lane.b32.xlu0 %v2392_v44, %s7206_s19  ;;  %v4127_v27 = vcombine.low %v12329_v21, %v12328_v26  ;;  %v4639_v15 = vcombine.low %v12333_v4, %v12332_v37  ;;  %v12334_v44 = vld [vmem:[#allocation249_spill] sm:$0xff] }
 0x358   :  { %v4671_v21 = vcombine.low %v12335_v25, %v12334_v44  ;;  %v12338_v44 = vld [vmem:[#allocation275_spill] sm:$0xff]  ;;  %v12339_v25 = vld [vmem:[#allocation273_spill] sm:$0xff] }
 0x359   :  { %v9972_v30 = vpop.permute.xlu1 %6029  ;;  %v9974_v6 = vpop.permute.xlu0 %6091  ;;  %v10001_v37 = vrot.slane %v4639_v15, %v7343_v50 }
 0x35a   :  { %12330 = vst [vmem:[#allocation160_spill] sm:$0xff] %v9972_v30  ;;  %12331 = vst [vmem:[#allocation159_spill] sm:$0xff] %v9974_v6  ;;  %v4679_v4 = vrot.slane %v4671_v21, %v7343_v50  ;;  %v12340_v30 = vld [vmem:[#allocation279_spill] sm:$0xff]  ;;  %v4568_v21 = vcombine.high %v9841_v33, %v9844_v16 }
 0x35b   :  { %6273 = vrot.lane.b32.xlu1 %v3071_v19, %s7205_s18  ;;  %6335 = vrot.lane.b32.xlu0 %v2936_v40, %s7206_s19  ;;  %v4103_v19 = vrot.slane %v4095_v45, %v7343_v50  ;;  %v4135_v40 = vrot.slane %v4127_v27, %v7343_v50  ;;  %v4024_v45 = vcombine.high %v9830_v58, %v9833_v54 }
 0x35c   :  { %v4703_v15 = vcombine.low %v10001_v37, %v4679_v4 }
 0x35d   :  { %v9988_v35 = vpop.permute.xlu1 %6033  ;;  %v9990_v26 = vpop.permute.xlu0 %6095  ;;  %v4159_v27 = vcombine.low %v4103_v19, %v4135_v40 }
 0x35e   :  { %12336 = vst [vmem:[#allocation210_spill] sm:$0xff] %v9988_v35  ;;  %12337 = vst [vmem:[#allocation209_spill] sm:$0xff] %v9990_v26  ;;  %v5183_v35 = vcombine.low %v12339_v25, %v12338_v44  ;;  %v12341_v26 = vld [vmem:[#allocation277_spill] sm:$0xff] }
 0x35f   :  { %6277 = vrot.lane.b32.xlu1 %v3615_v60, %s7205_s18  ;;  %6339 = vrot.lane.b32.xlu0 %v3480_v5, %s7206_s19  ;;  %v5215_v6 = vcombine.low %v12341_v26, %v12340_v30  ;;  %v12343_v60 = vld [vmem:[#allocation307_spill] sm:$0xff]  ;;  %v12344_v5 = vld [vmem:[#allocation305_spill] sm:$0xff]  ;;  %v5759_v26 = vcombine.low %v9152_v42, %v9164_v2  ;;  %v5112_v42 = vcombine.high %v9872_v3, %v9875_v29 }
 0x360   :  { %v5727_v30 = vcombine.low %v12344_v5, %v12343_v60  ;;  %v5191_v58 = vrot.slane %v5183_v35, %v7343_v50  ;;  %v1984_v60 = vcombine.high %v9904_v22, %v9917_v17  ;;  %v12351_v5 = vld [vmem:[#allocation21_spill] sm:$0xff]  ;;  %v12357_v22 = vld [vmem:[#allocation64_spill] sm:$0xff] }
 0x361   :  { %v10008_v55 = vpop.permute.xlu1 %6037  ;;  %v10010_v49 = vpop.permute.xlu0 %6099  ;;  %v5223_v54 = vrot.slane %v5215_v6, %v7343_v50 }
 0x362   :  { %12342 = vst [vmem:[#allocation204_spill] sm:$0xff] %v10008_v55  ;;  %v5735_v2 = vrot.slane %v5727_v30, %v7343_v50  ;;  %v12352_v30 = vld [vmem:[#allocation22_spill] sm:$0xff] }
 0x363   :  { %6281 = vrot.lane.b32.xlu1 %v4159_v27, %s7205_s18  ;;  %6343 = vrot.lane.b32.xlu0 %v4024_v45, %s7206_s19  ;;  %v5247_v16 = vcombine.low %v5191_v58, %v5223_v54  ;;  %v5767_v45 = vrot.slane %v5759_v26, %v7343_v50  ;;  %v12353_v26 = vcombine.low %v12351_v5, %v12352_v30 }
 0x365   :  { %v10023_v44 = vpop.permute.xlu1 %6073  ;;  %v10025_v25 = vpop.permute.xlu0 %6135 }
 0x366   :  { %12345 = vst [vmem:[#allocation203_spill] sm:$0xff] %v10023_v44  ;;  %v12375_v44 = vld [vmem:[#allocation235_spill] sm:$0xff] }
 0x367   :  { %6285 = vrot.lane.b32.xlu1 %v4703_v15, %s7205_s18  ;;  %6347 = vrot.lane.b32.xlu0 %v4568_v21, %s7206_s19  ;;  %v5791_v15 = vcombine.low %v5735_v2, %v5767_v45  ;;  %v5656_v21 = vcombine.high %v9893_v41, %v9896_v13 }
 0x369   :  { %v10031_v27 = vpop.permute.xlu1 %6077  ;;  %v10033_v33 = vpop.permute.xlu0 %6139 }
 0x36a   :  { %12346 = vst [vmem:[#allocation246_spill] sm:$0xff] %v10031_v27 }
 0x36b   :  { %6289 = vrot.lane.b32.xlu1 %v5247_v16, %s7205_s18  ;;  %6351 = vrot.lane.b32.xlu0 %v5112_v42, %s7206_s19  ;;  %v2528_v16 = vcombine.high %v9937_v51, %v9940_v46  ;;  %v12356_v42 = vld [vmem:[#allocation62_spill] sm:$0xff] }
 0x36c   :  { %v12358_v17 = vcombine.low %v12356_v42, %v12357_v22 }
 0x36d   :  { %v10041_v6 = vpop.permute.xlu1 %6081  ;;  %v10043_v35 = vpop.permute.xlu0 %6143 }
 0x36e   :  { %12347 = vst [vmem:[#allocation245_spill] sm:$0xff] %v10041_v6  ;;  %12348 = vst [vmem:[#allocation25_spill] sm:$0xff] %v10043_v35  ;;  %v4160_v6 = vcombine.high %v4103_v19, %v4135_v40 }
 0x36f   :  { %6293 = vrot.lane.b32.xlu1 %v5791_v15, %s7205_s18  ;;  %6355 = vrot.lane.b32.xlu0 %v5656_v21, %s7206_s19 }
 0x371   :  { %v10049_v3 = vpop.permute.xlu1 %6085  ;;  %v10051_v29 = vpop.permute.xlu0 %6147 }
 0x372   :  { %12349 = vst [vmem:[#allocation24_spill] sm:$0xff] %v10049_v3  ;;  %12350 = vst [vmem:[#allocation67_spill] sm:$0xff] %v10051_v29  ;;  %v12367_v3 = vld [vmem:[#allocation148_spill] sm:$0xff]  ;;  %v12421_v29 = vld [vmem:[#allocation15_spill] sm:$0xff] }
 0x373   :  { %6329 = vrot.lane.b32.xlu1 %v1984_v60, %s7206_s19  ;;  %6391 = vrot.lane.b32.xlu0 %v12353_v26, %s7207_s20  ;;  %v3072_v60 = vcombine.high %v9945_v9, %v9948_v32  ;;  %v12361_v26 = vld [vmem:[#allocation104_spill] sm:$0xff] }
 0x375   :  { %v10060_v41 = vpop.permute.xlu1 %6089  ;;  %v10062_v13 = vpop.permute.xlu0 %6151 }
 0x376   :  { %12354 = vst [vmem:[#allocation66_spill] sm:$0xff] %v10060_v41  ;;  %12355 = vst [vmem:[#allocation109_spill] sm:$0xff] %v10062_v13  ;;  %v12362_v41 = vld [vmem:[#allocation106_spill] sm:$0xff]  ;;  %v12397_v13 = vcombine.high %v12356_v42, %v12357_v22  ;;  %v12407_v42 = vld [vmem:[#allocation169_spill] sm:$0xff] }
 0x377   :  { %6333 = vrot.lane.b32.xlu1 %v2528_v16, %s7206_s19  ;;  %6395 = vrot.lane.b32.xlu0 %v12358_v17, %s7207_s20  ;;  %v12363_v51 = vcombine.low %v12361_v26, %v12362_v41  ;;  %v3616_v17 = vcombine.high %v9977_v53, %v9980_v48 }
 0x379   :  { %v10071_v15 = vpop.permute.xlu1 %6093  ;;  %v10073_v21 = vpop.permute.xlu0 %6155 }
 0x37a   :  { %12359 = vst [vmem:[#allocation108_spill] sm:$0xff] %v10071_v15  ;;  %12360 = vst [vmem:[#allocation152_spill] sm:$0xff] %v10073_v21  ;;  %v12366_v15 = vld [vmem:[#allocation146_spill] sm:$0xff] }
 0x37b   :  { %6337 = vrot.lane.b32.xlu1 %v3072_v60, %s7206_s19  ;;  %6399 = vrot.lane.b32.xlu0 %v12363_v51, %s7207_s20  ;;  %v12368_v9 = vcombine.low %v12366_v15, %v12367_v3  ;;  %v12370_v51 = vld [vmem:[#allocation189_spill] sm:$0xff]  ;;  %v12389_v21 = vld [vmem:[#allocation42_spill] sm:$0xff] }
 0x37d   :  { %v10082_v46 = vpop.permute.xlu1 %6097  ;;  %v10084_v16 = vpop.permute.xlu0 %6159 }
 0x37e   :  { %12364 = vst [vmem:[#allocation151_spill] sm:$0xff] %v10082_v46  ;;  %12365 = vst [vmem:[#allocation198_spill] sm:$0xff] %v10084_v16  ;;  %v12371_v46 = vld [vmem:[#allocation192_spill] sm:$0xff] }
 0x37f   :  { %6341 = vrot.lane.b32.xlu1 %v3616_v17, %s7206_s19  ;;  %6403 = vrot.lane.b32.xlu0 %v12368_v9, %s7207_s20  ;;  %v12372_v27 = vcombine.low %v12370_v51, %v12371_v46  ;;  %v4704_v17 = vcombine.high %v10001_v37, %v4679_v4  ;;  %v12374_v9 = vld [vmem:[#allocation233_spill] sm:$0xff] }
 0x381   :  { %v10093_v32 = vpop.permute.xlu1 %6101  ;;  %v10095_v60 = vpop.permute.xlu0 %6163 }
 0x382   :  { %12369 = vst [vmem:[#allocation196_spill] sm:$0xff] %v10093_v32  ;;  %v12376_v32 = vcombine.low %v12374_v9, %v12375_v44 }
 0x383   :  { %6345 = vrot.lane.b32.xlu1 %v4160_v6, %s7206_s19  ;;  %6407 = vrot.lane.b32.xlu0 %v12372_v27, %s7207_s20  ;;  %v5248_v6 = vcombine.high %v5191_v58, %v5223_v54  ;;  %v12378_v27 = vld [vmem:[#allocation267_spill] sm:$0xff] }
 0x385   :  { %v10102_v53 = vpop.permute.xlu1 %6137  ;;  %v10104_v48 = vpop.permute.xlu0 %6199 }
 0x386   :  { %12373 = vst [vmem:[#allocation240_spill] sm:$0xff] %v10102_v53  ;;  %v12379_v53 = vld [vmem:[#allocation269_spill] sm:$0xff] }
 0x387   :  { %6349 = vrot.lane.b32.xlu1 %v4704_v17, %s7206_s19  ;;  %6411 = vrot.lane.b32.xlu0 %v12376_v32, %s7207_s20  ;;  %v12380_v55 = vcombine.low %v12378_v27, %v12379_v53  ;;  %v5792_v17 = vcombine.high %v5735_v2, %v5767_v45  ;;  %v12383_v32 = vld [vmem:[#allocation297_spill] sm:$0xff]  ;;  %v12391_v2 = vcombine.high %v12351_v5, %v12352_v30  ;;  %v12400_v5 = vld [vmem:[#allocation124_spill] sm:$0xff]  ;;  %v12401_v30 = vld [vmem:[#allocation126_spill] sm:$0xff] }
 0x389   :  { %v10112_v19 = vpop.permute.xlu1 %6141  ;;  %v10114_v40 = vpop.permute.xlu0 %6203 }
 0x38a   :  { %12377 = vst [vmem:[#allocation238_spill] sm:$0xff] %v10112_v19  ;;  %v12384_v19 = vld [vmem:[#allocation298_spill] sm:$0xff] }
 0x38b   :  { %6353 = vrot.lane.b32.xlu1 %v5248_v6, %s7206_s19  ;;  %6415 = vrot.lane.b32.xlu0 %v12380_v55, %s7207_s20  ;;  %v12385_v16 = vcombine.low %v12383_v32, %v12384_v19  ;;  %v12388_v6 = vld [vmem:[#allocation40_spill] sm:$0xff] }
 0x38c   :  { %v12390_v55 = vcombine.low %v12388_v6, %v12389_v21 }
 0x38d   :  { %v10121_v37 = vpop.permute.xlu1 %6145  ;;  %v10123_v4 = vpop.permute.xlu0 %6207 }
 0x38e   :  { %12381 = vst [vmem:[#allocation304_spill] sm:$0xff] %v10121_v37  ;;  %12382 = vst [vmem:[#allocation302_spill] sm:$0xff] %v10123_v4  ;;  %v12426_v4 = vld [vmem:[#allocation281_spill] sm:$0xff] }
 0x38f   :  { %6357 = vrot.lane.b32.xlu1 %v5792_v17, %s7206_s19  ;;  %6419 = vrot.lane.b32.xlu0 %v12385_v16, %s7207_s20  ;;  %v12394_v16 = vld [vmem:[#allocation82_spill] sm:$0xff]  ;;  %v12428_v35 = vcombine.low %v12426_v4, %v12427_v10 }
 0x391   :  { %v10130_v58 = vpop.permute.xlu1 %6149  ;;  %v10132_v54 = vpop.permute.xlu0 %6211 }
 0x392   :  { %12386 = vst [vmem:[#allocation47_spill] sm:$0xff] %v10130_v58  ;;  %12387 = vst [vmem:[#allocation46_spill] sm:$0xff] %v10132_v54  ;;  %v12395_v58 = vld [vmem:[#allocation84_spill] sm:$0xff] }
 0x393   :  { %6393 = vrot.lane.b32.xlu1 %v12390_v55, %s7207_s20  ;;  %6455 = vrot.lane.b32.xlu0 %v12391_v2, %s7208_s21  ;;  %v12396_v37 = vcombine.low %v12394_v16, %v12395_v58  ;;  %v12402_v2 = vcombine.low %v12400_v5, %v12401_v30 }
 0x395   :  { %v10142_v45 = vpop.permute.xlu1 %6153  ;;  %v10144_v17 = vpop.permute.xlu0 %6215 }
 0x396   :  { %12392 = vst [vmem:[#allocation89_spill] sm:$0xff] %v10142_v45  ;;  %12393 = vst [vmem:[#allocation88_spill] sm:$0xff] %v10144_v17  ;;  %v12403_v45 = vcombine.high %v12361_v26, %v12362_v41  ;;  %v12411_v41 = vld [vmem:[#allocation211_spill] sm:$0xff]  ;;  %v12412_v26 = vld [vmem:[#allocation214_spill] sm:$0xff] }
 0x397   :  { %6397 = vrot.lane.b32.xlu1 %v12396_v37, %s7207_s20  ;;  %6459 = vrot.lane.b32.xlu0 %v12397_v13, %s7208_s21  ;;  %v12406_v13 = vld [vmem:[#allocation167_spill] sm:$0xff] }
 0x398   :  { %v12408_v22 = vcombine.low %v12406_v13, %v12407_v42 }
 0x399   :  { %v10154_v55 = vpop.permute.xlu1 %6157  ;;  %v10156_v54 = vpop.permute.xlu0 %6219 }
 0x39a   :  { %12398 = vst [vmem:[#allocation131_spill] sm:$0xff] %v10154_v55  ;;  %12399 = vst [vmem:[#allocation130_spill] sm:$0xff] %v10156_v54  ;;  %v12409_v55 = vcombine.high %v12366_v15, %v12367_v3  ;;  %v12416_v3 = vld [vmem:[#allocation251_spill] sm:$0xff]  ;;  %v12417_v15 = vld [vmem:[#allocation253_spill] sm:$0xff] }
 0x39b   :  { %6401 = vrot.lane.b32.xlu1 %v12402_v2, %s7207_s20  ;;  %6463 = vrot.lane.b32.xlu0 %v12403_v45, %s7208_s21  ;;  %v12413_v45 = vcombine.low %v12411_v41, %v12412_v26 }
 0x39d   :  { %v10166_v37 = vpop.permute.xlu1 %6161  ;;  %v10168_v17 = vpop.permute.xlu0 %6223 }
 0x39e   :  { %12404 = vst [vmem:[#allocation174_spill] sm:$0xff] %v10166_v37  ;;  %12405 = vst [vmem:[#allocation173_spill] sm:$0xff] %v10168_v17  ;;  %v12414_v37 = vcombine.high %v12370_v51, %v12371_v46  ;;  %v12424_v51 = vld [vmem:[#allocation11_spill] sm:$0xff] }
 0x39f   :  { %6405 = vrot.lane.b32.xlu1 %v12408_v22, %s7207_s20  ;;  %6467 = vrot.lane.b32.xlu0 %v12409_v55, %s7208_s21  ;;  %v12418_v55 = vcombine.low %v12416_v3, %v12417_v15 }
 0x3a1   :  { %v10178_v2 = vpop.permute.xlu1 %6165  ;;  %v10180_v54 = vpop.permute.xlu0 %6227 }
 0x3a2   :  { %12410 = vst [vmem:[#allocation220_spill] sm:$0xff] %v10178_v2  ;;  %v12419_v2 = vcombine.high %v12374_v9, %v12375_v44  ;;  %v12429_v44 = vcombine.high %v12378_v27, %v12379_v53  ;;  %v12430_v9 = vld [vmem:[#allocation53_spill] sm:$0xff]  ;;  %v12437_v53 = vcombine.high %v12383_v32, %v12384_v19  ;;  %v12444_v32 = vcombine.high %v12388_v6, %v12389_v21 }
 0x3a3   :  { %6409 = vrot.lane.b32.xlu1 %v12413_v45, %s7207_s20  ;;  %6471 = vrot.lane.b32.xlu0 %v12414_v37, %s7208_s21  ;;  %v12420_v45 = vld [vmem:[#allocation17_spill] sm:$0xff]  ;;  %v12451_v6 = vcombine.high %v12394_v16, %v12395_v58  ;;  %v12458_v16 = vcombine.high %v12400_v5, %v12401_v30  ;;  %v12465_v30 = vcombine.high %v12406_v13, %v12407_v42 }
 0x3a4   :  { %v1831_v7 = vcombine.low %v12421_v29, %v12420_v45  ;;  %v12425_v37 = vld [vmem:[#allocation9_spill] sm:$0xff]  ;;  %v12471_v42 = vcombine.high %v12411_v41, %v12412_v26  ;;  %v12477_v26 = vcombine.high %v12416_v3, %v12417_v15  ;;  %v12484_v15 = vcombine.high %v12426_v4, %v12427_v10 }
 0x3a5   :  { %v10190_v22 = vpop.permute.xlu1 %6201  ;;  %v10192_v17 = vpop.permute.xlu0 %6263  ;;  %v12433_v45 = vld [vmem:[#allocation57_spill] sm:$0xff]  ;;  %v12491_v4 = vcombine.high %v9186_v12, %v9192_v61 }
 0x3a6   :  { %12415 = vst [vmem:[#allocation218_spill] sm:$0xff] %v10190_v22  ;;  %v1799_v22 = vcombine.low %v12425_v37, %v12424_v51  ;;  %v10227_v51 = vrot.slane %v1831_v7, %v7343_v50  ;;  %v12438_v37 = vld [vmem:[#allocation95_spill] sm:$0xff] }
 0x3a7   :  { %6413 = vrot.lane.b32.xlu1 %v12418_v55, %s7207_s20  ;;  %6475 = vrot.lane.b32.xlu0 %v12419_v2, %s7208_s21  ;;  %v12431_v2 = vld [vmem:[#allocation51_spill] sm:$0xff] }
 0x3a8   :  { %v2343_v29 = vcombine.low %v12431_v2, %v12430_v9  ;;  %v12432_v55 = vld [vmem:[#allocation59_spill] sm:$0xff]  ;;  %v10238_v27 = vrot.slane %v1799_v22, %v7343_v50  ;;  %v12440_v2 = vld [vmem:[#allocation101_spill] sm:$0xff] }
 0x3a9   :  { %v10204_v1 = vpop.permute.xlu1 %6205  ;;  %v10206_v46 = vpop.permute.xlu0 %6267 }
 0x3aa   :  { %12422 = vst [vmem:[#allocation256_spill] sm:$0xff] %v10204_v1  ;;  %12423 = vst [vmem:[#allocation255_spill] sm:$0xff] %v10206_v46  ;;  %v2375_v1 = vcombine.low %v12433_v45, %v12432_v55  ;;  %v12441_v55 = vld [vmem:[#allocation99_spill] sm:$0xff] }
 0x3ab   :  { %6417 = vrot.lane.b32.xlu1 %v12428_v35, %s7207_s20  ;;  %6479 = vrot.lane.b32.xlu0 %v12429_v44, %s7208_s21  ;;  %v12436_v35 = vcombine.low %v9186_v12, %v9192_v61  ;;  %v12439_v44 = vld [vmem:[#allocation93_spill] sm:$0xff]  ;;  %v2919_v7 = vcombine.low %v12441_v55, %v12440_v2  ;;  %v12447_v2 = vld [vmem:[#allocation143_spill] sm:$0xff] }
 0x3ac   :  { %v2887_v9 = vcombine.low %v12439_v44, %v12438_v37  ;;  %v10254_v19 = vrot.slane %v2375_v1, %v7343_v50  ;;  %v12445_v37 = vld [vmem:[#allocation137_spill] sm:$0xff] }
 0x3ad   :  { %v10222_v36 = vpop.permute.xlu1 %6209  ;;  %v10224_v56 = vpop.permute.xlu0 %6271  ;;  %v12448_v1 = vld [vmem:[#allocation141_spill] sm:$0xff] }
 0x3ae   :  { %12434 = vst [vmem:[#allocation16_spill] sm:$0xff] %v10222_v36  ;;  %12435 = vst [vmem:[#allocation14_spill] sm:$0xff] %v10224_v56  ;;  %v10251_v56 = vrot.slane %v2343_v29, %v7343_v50  ;;  %v10262_v22 = vrot.slane %v2887_v9, %v7343_v50  ;;  %v12446_v29 = vld [vmem:[#allocation135_spill] sm:$0xff]  ;;  %v3463_v55 = vcombine.low %v12448_v1, %v12447_v2 }
 0x3af   :  { %6421 = vrot.lane.b32.xlu1 %v12436_v35, %s7207_s20  ;;  %6483 = vrot.lane.b32.xlu0 %v12437_v53, %s7208_s21  ;;  %v1851_v35 = vcombine.low %v10238_v27, %v10227_v51  ;;  %v10265_v53 = vrot.slane %v2919_v7, %v7343_v50  ;;  %v3431_v44 = vcombine.low %v12446_v29, %v12445_v37  ;;  %v12452_v7 = vld [vmem:[#allocation180_spill] sm:$0xff]  ;;  %v12454_v37 = vld [vmem:[#allocation186_spill] sm:$0xff] }
 0x3b0   :  { %v2395_v21 = vcombine.low %v10251_v56, %v10254_v19  ;;  %v12455_v29 = vld [vmem:[#allocation184_spill] sm:$0xff]  ;;  %v10296_v58 = vrot.slane %v3463_v55, %v7343_v50 }
 0x3b1   :  { %v10244_v45 = vpop.permute.xlu1 %6213  ;;  %v10246_v36 = vpop.permute.xlu0 %6275  ;;  %v2939_v9 = vcombine.low %v10262_v22, %v10265_v53  ;;  %v4007_v2 = vcombine.low %v12455_v29, %v12454_v37  ;;  %v12462_v37 = vld [vmem:[#allocation228_spill] sm:$0xff] }
 0x3b2   :  { %12442 = vst [vmem:[#allocation10_spill] sm:$0xff] %v10244_v45  ;;  %12443 = vst [vmem:[#allocation8_spill] sm:$0xff] %v10246_v36 }
 0x3b3   :  { %6457 = vrot.lane.b32.xlu1 %v12444_v32, %s7208_s21  ;;  %6519 = vrot.lane.b32.xlu0 %v1851_v35, %s7209_s22  ;;  %v12453_v35 = vld [vmem:[#allocation178_spill] sm:$0xff]  ;;  %v10317_v5 = vrot.slane %v4007_v2, %v7343_v50 }
 0x3b4   :  { %v3975_v32 = vcombine.low %v12453_v35, %v12452_v7  ;;  %v12461_v35 = vld [vmem:[#allocation230_spill] sm:$0xff] }
 0x3b5   :  { %v10271_v45 = vpop.permute.xlu1 %6217  ;;  %v10273_v36 = vpop.permute.xlu0 %6279  ;;  %v4551_v29 = vcombine.low %v12462_v37, %v12461_v35  ;;  %v12468_v35 = vld [vmem:[#allocation266_spill] sm:$0xff]  ;;  %v12469_v37 = vld [vmem:[#allocation264_spill] sm:$0xff] }
 0x3b6   :  { %12449 = vst [vmem:[#allocation288_spill] sm:$0xff] %v10271_v45  ;;  %12450 = vst [vmem:[#allocation286_spill] sm:$0xff] %v10273_v36  ;;  %v10293_v36 = vrot.slane %v3431_v44, %v7343_v50  ;;  %v5095_v2 = vcombine.low %v12469_v37, %v12468_v35 }
 0x3b7   :  { %6461 = vrot.lane.b32.xlu1 %v12451_v6, %s7208_s21  ;;  %6523 = vrot.lane.b32.xlu0 %v2395_v21, %s7209_s22  ;;  %v12459_v21 = vld [vmem:[#allocation224_spill] sm:$0xff]  ;;  %v12460_v6 = vld [vmem:[#allocation222_spill] sm:$0xff] }
 0x3b8   :  { %v4519_v7 = vcombine.low %v12460_v6, %v12459_v21  ;;  %v3483_v55 = vcombine.low %v10293_v36, %v10296_v58  ;;  %v12466_v21 = vld [vmem:[#allocation262_spill] sm:$0xff]  ;;  %v12467_v6 = vld [vmem:[#allocation260_spill] sm:$0xff]  ;;  %v10359_v41 = vrot.slane %v5095_v2, %v7343_v50 }
 0x3b9   :  { %v10288_v1 = vpop.permute.xlu1 %6221  ;;  %v10290_v45 = vpop.permute.xlu0 %6283 }
 0x3ba   :  { %12456 = vst [vmem:[#allocation52_spill] sm:$0xff] %v10288_v1  ;;  %12457 = vst [vmem:[#allocation50_spill] sm:$0xff] %v10290_v45  ;;  %v10314_v45 = vrot.slane %v3975_v32, %v7343_v50  ;;  %v5063_v32 = vcombine.low %v12467_v6, %v12466_v21  ;;  %v12474_v21 = vld [vmem:[#allocation296_spill] sm:$0xff]  ;;  %v12475_v6 = vld [vmem:[#allocation294_spill] sm:$0xff] }
 0x3bb   :  { %6465 = vrot.lane.b32.xlu1 %v12458_v16, %s7208_s21  ;;  %6527 = vrot.lane.b32.xlu0 %v2939_v9, %s7209_s22  ;;  %v10325_v9 = vrot.slane %v4519_v7, %v7343_v50  ;;  %v10328_v16 = vrot.slane %v4551_v29, %v7343_v50  ;;  %v12472_v29 = vld [vmem:[#allocation292_spill] sm:$0xff]  ;;  %v5639_v35 = vcombine.low %v12475_v6, %v12474_v21  ;;  %v12481_v21 = vld [vmem:[#allocation35_spill] sm:$0xff] }
 0x3bc   :  { %v4027_v13 = vcombine.low %v10314_v45, %v10317_v5  ;;  %v10356_v31 = vrot.slane %v5063_v32, %v7343_v50 }
 0x3bd   :  { %v10307_v1 = vpop.permute.xlu1 %6225  ;;  %v10309_v44 = vpop.permute.xlu0 %6287  ;;  %v4571_v7 = vcombine.low %v10325_v9, %v10328_v16  ;;  %v10380_v3 = vrot.slane %v5639_v35, %v7343_v50 }
 0x3be   :  { %12463 = vst [vmem:[#allocation58_spill] sm:$0xff] %v10307_v1  ;;  %12464 = vst [vmem:[#allocation56_spill] sm:$0xff] %v10309_v44  ;;  %v5115_v2 = vcombine.low %v10356_v31, %v10359_v41 }
 0x3bf   :  { %6469 = vrot.lane.b32.xlu1 %v12465_v30, %s7208_s21  ;;  %6531 = vrot.lane.b32.xlu0 %v3483_v55, %s7209_s22  ;;  %v12473_v55 = vld [vmem:[#allocation290_spill] sm:$0xff] }
 0x3c0   :  { %v5607_v30 = vcombine.low %v12473_v55, %v12472_v29  ;;  %v12480_v55 = vld [vmem:[#allocation37_spill] sm:$0xff] }
 0x3c1   :  { %v10334_v1 = vpop.permute.xlu1 %6229  ;;  %v10336_v44 = vpop.permute.xlu0 %6291  ;;  %v1967_v6 = vcombine.low %v12481_v21, %v12480_v55  ;;  %v12487_v55 = vld [vmem:[#allocation79_spill] sm:$0xff]  ;;  %v12488_v21 = vld [vmem:[#allocation77_spill] sm:$0xff] }
 0x3c2   :  { %12470 = vst [vmem:[#allocation94_spill] sm:$0xff] %v10334_v1  ;;  %v10377_v46 = vrot.slane %v5607_v30, %v7343_v50  ;;  %v2511_v30 = vcombine.low %v12488_v21, %v12487_v55 }
 0x3c3   :  { %6473 = vrot.lane.b32.xlu1 %v12471_v42, %s7208_s21  ;;  %6535 = vrot.lane.b32.xlu0 %v4027_v13, %s7209_s22  ;;  %v12478_v13 = vld [vmem:[#allocation31_spill] sm:$0xff]  ;;  %v12479_v42 = vld [vmem:[#allocation29_spill] sm:$0xff]  ;;  %v10401_v10 = vrot.slane %v1967_v6, %v7343_v50 }
 0x3c4   :  { %v1935_v29 = vcombine.low %v12479_v42, %v12478_v13  ;;  %v12486_v13 = vld [vmem:[#allocation71_spill] sm:$0xff]  ;;  %v10424_v61 = vrot.slane %v2511_v30, %v7343_v50 }
 0x3c5   :  { %v10351_v37 = vpop.permute.xlu1 %6265  ;;  %v10353_v1 = vpop.permute.xlu0 %6327 }
 0x3c6   :  { %12476 = vst [vmem:[#allocation92_spill] sm:$0xff] %v10351_v37 }
 0x3c7   :  { %6477 = vrot.lane.b32.xlu1 %v12477_v26, %s7208_s21  ;;  %6539 = vrot.lane.b32.xlu0 %v4571_v7, %s7209_s22  ;;  %v10388_v7 = vrot.slane %v1935_v29, %v7343_v50  ;;  %v12485_v26 = vld [vmem:[#allocation73_spill] sm:$0xff]  ;;  %v12492_v29 = vld [vmem:[#allocation115_spill] sm:$0xff] }
 0x3c8   :  { %v2479_v42 = vcombine.low %v12486_v13, %v12485_v26  ;;  %v12494_v26 = vld [vmem:[#allocation121_spill] sm:$0xff]  ;;  %v12495_v13 = vld [vmem:[#allocation119_spill] sm:$0xff] }
 0x3c9   :  { %v10370_v37 = vpop.permute.xlu1 %6269  ;;  %v10372_v32 = vpop.permute.xlu0 %6331  ;;  %v3055_v55 = vcombine.low %v12495_v13, %v12494_v26  ;;  %v1987_v6 = vcombine.low %v10388_v7, %v10401_v10 }
 0x3ca   :  { %12482 = vst [vmem:[#allocation100_spill] sm:$0xff] %v10370_v37  ;;  %12483 = vst [vmem:[#allocation98_spill] sm:$0xff] %v10372_v32  ;;  %v5659_v32 = vcombine.low %v10377_v46, %v10380_v3  ;;  %v10421_v12 = vrot.slane %v2479_v42, %v7343_v50  ;;  %v12501_v42 = vld [vmem:[#allocation162_spill] sm:$0xff] }
 0x3cb   :  { %6481 = vrot.lane.b32.xlu1 %v12484_v15, %s7208_s21  ;;  %6543 = vrot.lane.b32.xlu0 %v5115_v2, %s7209_s22  ;;  %v12493_v2 = vld [vmem:[#allocation113_spill] sm:$0xff] }
 0x3cc   :  { %v3023_v15 = vcombine.low %v12493_v2, %v12492_v29  ;;  %v12498_v29 = vld [vmem:[#allocation158_spill] sm:$0xff]  ;;  %v12499_v2 = vld [vmem:[#allocation156_spill] sm:$0xff] }
 0x3cd   :  { %v10394_v37 = vpop.permute.xlu1 %6273  ;;  %v10396_v35 = vpop.permute.xlu0 %6335 }
 0x3ce   :  { %12489 = vst [vmem:[#allocation136_spill] sm:$0xff] %v10394_v37  ;;  %12490 = vst [vmem:[#allocation134_spill] sm:$0xff] %v10396_v35  ;;  %v1852_v35 = vcombine.high %v10238_v27, %v10227_v51  ;;  %v3567_v51 = vcombine.low %v12499_v2, %v12498_v29  ;;  %v12500_v27 = vld [vmem:[#allocation164_spill] sm:$0xff]  ;;  %v12504_v29 = vld [vmem:[#allocation202_spill] sm:$0xff] }
 0x3cf   :  { %6485 = vrot.lane.b32.xlu1 %v12491_v4, %s7208_s21  ;;  %6547 = vrot.lane.b32.xlu0 %v5659_v32, %s7209_s22  ;;  %v10429_v32 = vrot.slane %v3023_v15, %v7343_v50  ;;  %v10432_v4 = vrot.slane %v3055_v55, %v7343_v50  ;;  %v3599_v26 = vcombine.low %v12501_v42, %v12500_v27  ;;  %v12505_v2 = vld [vmem:[#allocation200_spill] sm:$0xff] }
 0x3d0   :  { %v2940_v55 = vcombine.high %v10262_v22, %v10265_v53  ;;  %v4111_v27 = vcombine.low %v12505_v2, %v12504_v29  ;;  %v12506_v42 = vld [vmem:[#allocation208_spill] sm:$0xff]  ;;  %v12511_v53 = vld [vmem:[#allocation242_spill] sm:$0xff] }
 0x3d1   :  { %v10412_v21 = vpop.permute.xlu1 %6277  ;;  %v10414_v37 = vpop.permute.xlu0 %6339  ;;  %v3075_v15 = vcombine.low %v10429_v32, %v10432_v4  ;;  %v12510_v22 = vld [vmem:[#allocation244_spill] sm:$0xff] }
 0x3d2   :  { %12496 = vst [vmem:[#allocation142_spill] sm:$0xff] %v10412_v21  ;;  %12497 = vst [vmem:[#allocation140_spill] sm:$0xff] %v10414_v37  ;;  %v12513_v29 = vld [vmem:[#allocation248_spill] sm:$0xff] }
 0x3d3   :  { %6521 = vrot.lane.b32.xlu1 %v1987_v6, %s7209_s22  ;;  %6583 = vrot.lane.b32.xlu0 %v1852_v35, %s7210_s23  ;;  %v2531_v6 = vcombine.low %v10421_v12, %v10424_v61  ;;  %v2396_v35 = vcombine.high %v10251_v56, %v10254_v19  ;;  %v10461_v56 = vrot.slane %v3567_v51, %v7343_v50 }
 0x3d4   :  { %v10464_v19 = vrot.slane %v3599_v26, %v7343_v50  ;;  %v3484_v26 = vcombine.high %v10293_v36, %v10296_v58  ;;  %v12518_v36 = vld [vmem:[#allocation280_spill] sm:$0xff]  ;;  %v12519_v58 = vld [vmem:[#allocation278_spill] sm:$0xff] }
 0x3d5   :  { %v10438_v13 = vpop.permute.xlu1 %6281  ;;  %v10440_v30 = vpop.permute.xlu0 %6343 }
 0x3d6   :  { %12502 = vst [vmem:[#allocation179_spill] sm:$0xff] %v10438_v13  ;;  %12503 = vst [vmem:[#allocation177_spill] sm:$0xff] %v10440_v30  ;;  %v12507_v13 = vld [vmem:[#allocation206_spill] sm:$0xff]  ;;  %v3619_v51 = vcombine.low %v10461_v56, %v10464_v19 }
 0x3d7   :  { %6525 = vrot.lane.b32.xlu1 %v2531_v6, %s7209_s22  ;;  %6587 = vrot.lane.b32.xlu0 %v2396_v35, %s7210_s23  ;;  %v4143_v21 = vcombine.low %v12507_v13, %v12506_v42  ;;  %v4655_v6 = vcombine.low %v12511_v53, %v12510_v22  ;;  %v12512_v35 = vld [vmem:[#allocation250_spill] sm:$0xff] }
 0x3d8   :  { %v4687_v13 = vcombine.low %v12513_v29, %v12512_v35  ;;  %v12516_v35 = vld [vmem:[#allocation276_spill] sm:$0xff]  ;;  %v12517_v29 = vld [vmem:[#allocation274_spill] sm:$0xff] }
 0x3d9   :  { %v10456_v30 = vpop.permute.xlu1 %6285  ;;  %v10458_v37 = vpop.permute.xlu0 %6347  ;;  %v10489_v22 = vrot.slane %v4655_v6, %v7343_v50  ;;  %v4028_v6 = vcombine.high %v10314_v45, %v10317_v5 }
 0x3da   :  { %12508 = vst [vmem:[#allocation185_spill] sm:$0xff] %v10456_v30  ;;  %12509 = vst [vmem:[#allocation183_spill] sm:$0xff] %v10458_v37  ;;  %v10492_v53 = vrot.slane %v4687_v13, %v7343_v50 }
 0x3db   :  { %6529 = vrot.lane.b32.xlu1 %v3075_v15, %s7209_s22  ;;  %6591 = vrot.lane.b32.xlu0 %v2940_v55, %s7210_s23  ;;  %v10481_v15 = vrot.slane %v4111_v27, %v7343_v50  ;;  %v10484_v55 = vrot.slane %v4143_v21, %v7343_v50  ;;  %v5231_v27 = vcombine.low %v12519_v58, %v12518_v36  ;;  %v12523_v58 = vld [vmem:[#allocation150_spill] sm:$0xff] }
 0x3dc   :  { %v4707_v13 = vcombine.low %v10489_v22, %v10492_v53 }
 0x3dd   :  { %v10472_v2 = vpop.permute.xlu1 %6289  ;;  %v10474_v42 = vpop.permute.xlu0 %6351  ;;  %v10524_v5 = vrot.slane %v5231_v27, %v7343_v50 }
 0x3de   :  { %12514 = vst [vmem:[#allocation223_spill] sm:$0xff] %v10472_v2  ;;  %12515 = vst [vmem:[#allocation221_spill] sm:$0xff] %v10474_v42  ;;  %v5199_v2 = vcombine.low %v12517_v29, %v12516_v35  ;;  %v12521_v35 = vld [vmem:[#allocation308_spill] sm:$0xff]  ;;  %v12522_v29 = vld [vmem:[#allocation306_spill] sm:$0xff] }
 0x3df   :  { %6533 = vrot.lane.b32.xlu1 %v3619_v51, %s7209_s22  ;;  %6595 = vrot.lane.b32.xlu0 %v3484_v26, %s7210_s23  ;;  %v4163_v51 = vcombine.low %v10481_v15, %v10484_v55  ;;  %v4572_v26 = vcombine.high %v10325_v9, %v10328_v16  ;;  %v5743_v36 = vcombine.low %v12522_v29, %v12521_v35  ;;  %v12524_v35 = vld [vmem:[#allocation26_spill] sm:$0xff]  ;;  %v12525_v29 = vld [vmem:[#allocation27_spill] sm:$0xff] }
 0x3e0   :  { %v10521_v45 = vrot.slane %v5199_v2, %v7343_v50 }
 0x3e1   :  { %v10498_v30 = vpop.permute.xlu1 %6293  ;;  %v10500_v21 = vpop.permute.xlu0 %6355  ;;  %v10537_v2 = vrot.slane %v5743_v36, %v7343_v50  ;;  %v12526_v36 = vcombine.low %v12524_v35, %v12525_v29 }
 0x3e2   :  { %12520 = vst [vmem:[#allocation229_spill] sm:$0xff] %v10498_v30  ;;  %v5775_v30 = vcombine.low %v12523_v58, %v9167_v18  ;;  %v5251_v18 = vcombine.low %v10521_v45, %v10524_v5  ;;  %v2532_v58 = vcombine.high %v10421_v12, %v10424_v61  ;;  %v3076_v12 = vcombine.high %v10429_v32, %v10432_v4 }
 0x3e3   :  { %6537 = vrot.lane.b32.xlu1 %v4163_v51, %s7209_s22  ;;  %6599 = vrot.lane.b32.xlu0 %v4028_v6, %s7210_s23  ;;  %v5116_v51 = vcombine.high %v10356_v31, %v10359_v41  ;;  %v5660_v31 = vcombine.high %v10377_v46, %v10380_v3 }
 0x3e4   :  { %v10540_v27 = vrot.slane %v5775_v30, %v7343_v50  ;;  %v1988_v30 = vcombine.high %v10388_v7, %v10401_v10  ;;  %v12529_v7 = vld [vmem:[#allocation69_spill] sm:$0xff] }
 0x3e5   :  { %v10516_v42 = vpop.permute.xlu1 %6329  ;;  %v10518_v37 = vpop.permute.xlu0 %6391 }
 0x3e7   :  { %6541 = vrot.lane.b32.xlu1 %v4707_v13, %s7209_s22  ;;  %6603 = vrot.lane.b32.xlu0 %v4572_v26, %s7210_s23  ;;  %v5795_v26 = vcombine.low %v10537_v2, %v10540_v27 }
 0x3e9   :  { %v10528_v9 = vpop.permute.xlu1 %6333  ;;  %v10530_v16 = vpop.permute.xlu0 %6395 }
 0x3eb   :  { %6545 = vrot.lane.b32.xlu1 %v5251_v18, %s7209_s22  ;;  %6607 = vrot.lane.b32.xlu0 %v5116_v51, %s7210_s23  ;;  %v12528_v18 = vld [vmem:[#allocation68_spill] sm:$0xff] }
 0x3ec   :  { %v12530_v10 = vcombine.low %v12528_v18, %v12529_v7  ;;  %v12531_v51 = vld [vmem:[#allocation300_spill] sm:$0xff] }
 0x3ed   :  { %v10544_v6 = vpop.permute.xlu1 %6337  ;;  %v10546_v13 = vpop.permute.xlu0 %6399 }
 0x3ef   :  { %6549 = vrot.lane.b32.xlu1 %v5795_v26, %s7209_s22  ;;  %6611 = vrot.lane.b32.xlu0 %v5660_v31, %s7210_s23  ;;  %v12532_v26 = vld [vmem:[#allocation301_spill] sm:$0xff] }
 0x3f0   :  { %v12533_v31 = vcombine.low %v12531_v51, %v12532_v26  ;;  %v12538_v26 = vld [vmem:[#allocation20_spill] sm:$0xff] }
 0x3f1   :  { %v10554_v50 = vpop.permute.xlu1 %6341  ;;  %v10556_v41 = vpop.permute.xlu0 %6403 }
 0x3f3   :  { %6585 = vrot.lane.b32.xlu1 %v1988_v30, %s7210_s23  ;;  %6647 = vrot.lane.b32.xlu0 %v12526_v36, %s7211_s24  ;;  %v6774_v30 = vsel %vm6759_vm0, %v12533_v31, %v9529_v39  ;;  %v12535_v39 = vld [vmem:[#allocation110_spill] sm:$0xff]  ;;  %v12539_v31 = vld [vmem:[#allocation23_spill] sm:$0xff] }
 0x3f4   :  { %v6791_v61 = vsel %vm6776_vm1, %v6774_v30, %v9612_v34 }
 0x3f5   :  { %v10565_v46 = vpop.permute.xlu1 %6345  ;;  %v10567_v3 = vpop.permute.xlu0 %6407 }
 0x3f6   :  { %12527 = vst [vmem:[#allocation227_spill] sm:$0xff] %v10565_v46 }
 0x3f7   :  { %6589 = vrot.lane.b32.xlu1 %v2532_v58, %s7210_s23  ;;  %6651 = vrot.lane.b32.xlu0 %v12530_v10, %s7211_s24  ;;  %v6808_v58 = vsel %vm6793_vm2, %v6791_v61, %v9696_v38  ;;  %v12536_v10 = vld [vmem:[#allocation111_spill] sm:$0xff]  ;;  %v3620_v61 = vcombine.high %v10461_v56, %v10464_v19  ;;  %v12545_v19 = vld [vmem:[#allocation65_spill] sm:$0xff] }
 0x3f8   :  { %v12537_v51 = vcombine.low %v12535_v39, %v12536_v10  ;;  %v6825_v34 = vsel %vm6810_vm3, %v6808_v58, %v9852_v23  ;;  %v12542_v58 = vld [vmem:[#allocation154_spill] sm:$0xff] }
 0x3f9   :  { %v10581_v36 = vpop.permute.xlu1 %6349  ;;  %v10583_v46 = vpop.permute.xlu0 %6411  ;;  %v6842_v4 = vsel %vm6827_vm4, %v6825_v34, %v10010_v49 }
 0x3fa   :  { %12534 = vst [vmem:[#allocation261_spill] sm:$0xff] %v10581_v36  ;;  %v12540_v36 = vcombine.low %v12538_v26, %v12539_v31  ;;  %v6859_v23 = vsel %vm6844_vm5, %v6842_v4, %v10095_v60  ;;  %v12544_v60 = vld [vmem:[#allocation63_spill] sm:$0xff] }
 0x3fb   :  { %6593 = vrot.lane.b32.xlu1 %v3076_v12, %s7210_s23  ;;  %6655 = vrot.lane.b32.xlu0 %v12537_v51, %s7211_s24  ;;  %v6876_v49 = vsel %vm6861_vm6, %v6859_v23, %v10180_v54  ;;  %v12546_v51 = vcombine.low %v12544_v60, %v12545_v19  ;;  %v12553_v60 = vld [vmem:[#allocation255_spill] sm:$0xff]  ;;  %v12554_v19 = vld [vmem:[#allocation236_spill] sm:$0xff] }
 0x3fc   :  { %v6760_v32 = vsel %vm6759_vm0, %v12540_v36, %v9353_v20  ;;  %v12541_v36 = vld [vmem:[#allocation153_spill] sm:$0xff]  ;;  %v6893_v26 = vsel %vm6878_vm7, %v6876_v49, %v10336_v44 }
 0x3fd   :  { %v6777_v38 = vsel %vm6776_vm1, %v6760_v32, %v9541_v52  ;;  %v10607_v30 = vpop.permute.xlu1 %6353  ;;  %v10609_v12 = vpop.permute.xlu0 %6415  ;;  %v12543_v56 = vcombine.low %v12541_v36, %v12542_v58 }
 0x3fe   :  { %v6794_v20 = vsel %vm6793_vm2, %v6777_v38, %v9621_v43  ;;  %v4164_v43 = vcombine.high %v10481_v15, %v10484_v55  ;;  %v6910_v15 = vsel %vm6895_vm8, %v6893_v26, %v10500_v21  ;;  %v12547_v21 = vld [vmem:[#allocation193_spill] sm:$0xff]  ;;  %v12561_v26 = vld [vmem:[#allocation122_spill] sm:$0xff] }
 0x3ff   :  { %v6811_v52 = vsel %vm6810_vm3, %v6794_v20, %v9708_v57  ;;  %6597 = vrot.lane.b32.xlu1 %v3620_v61, %s7210_s23  ;;  %6659 = vrot.lane.b32.xlu0 %v12543_v56, %s7211_s24  ;;  %v6762_v57 = vsel %vm6759_vm0, %v12546_v51, %v9379_v11  ;;  %v12548_v38 = vld [vmem:[#allocation197_spill] sm:$0xff]  ;;  %v12558_v51 = vld [vmem:[#allocation147_spill] sm:$0xff] }
 0x400   :  { %v6828_v54 = vsel %vm6827_vm4, %v6811_v52, %v9869_v59  ;;  %v6779_v31 = vsel %vm6776_vm1, %v6762_v57, %v9553_v14  ;;  %v12549_v4 = vcombine.low %v12547_v21, %v12548_v38  ;;  %v12559_v57 = vld [vmem:[#allocation149_spill] sm:$0xff] }
 0x401   :  { %v6845_v32 = vsel %vm6844_vm5, %v6828_v54, %v10025_v25  ;;  %v10643_v55 = vpop.permute.xlu1 %6357  ;;  %v6420_v11 = vpop.permute.xlu0 %6419  ;;  %v6796_v59 = vsel %vm6793_vm2, %v6779_v31, %v9630_v24  ;;  %v12550_v24 = vld [vmem:[#allocation105_spill] sm:$0xff] }
 0x402   :  { %v6862_v44 = vsel %vm6861_vm6, %v6845_v32, %v10104_v48  ;;  %v10650_v34 = vsel %vm6912_vm9, %v6910_v15, %v6420_v11  ;;  %v6813_v14 = vsel %vm6810_vm3, %v6796_v59, %v9722_v47  ;;  %v12551_v48 = vld [vmem:[#allocation107_spill] sm:$0xff]  ;;  %v12563_v15 = vld [vmem:[#allocation213_spill] sm:$0xff] }
 0x403   :  { %v6879_v25 = vsel %vm6878_vm7, %v6862_v44, %v10192_v17  ;;  %6601 = vrot.lane.b32.xlu1 %v4164_v43, %s7210_s23  ;;  %6663 = vrot.lane.b32.xlu0 %v12549_v4, %s7211_s24  ;;  %v12552_v61 = vcombine.low %v12550_v24, %v12551_v48  ;;  %v6830_v47 = vsel %vm6827_vm4, %v6813_v14, %v9888_v63  ;;  %v12564_v59 = vld [vmem:[#allocation25_spill] sm:$0xff] }
 0x404   :  { %v6896_v17 = vsel %vm6895_vm8, %v6879_v25, %v10353_v1  ;;  %v6847_v52 = vsel %vm6844_vm5, %v6830_v47, %v10033_v33  ;;  %v5252_v24 = vcombine.high %v10521_v45, %v10524_v5  ;;  %v12565_v48 = vld [vmem:[#allocation97_spill] sm:$0xff]  ;;  %v12570_v45 = vld [vmem:[#allocation272_spill] sm:$0xff] }
 0x405   :  { %v6764_v20 = vsel %vm6759_vm0, %v12552_v61, %v9408_v62  ;;  %v6913_v49 = vsel %vm6912_vm9, %v6896_v17, %v10518_v37  ;;  %v10676_v56 = vpop.permute.xlu1 %6393  ;;  %v6456_v43 = vpop.permute.xlu0 %6455  ;;  %v4708_v62 = vcombine.high %v10489_v22, %v10492_v53  ;;  %v6864_v1 = vsel %vm6861_vm6, %v6847_v52, %v10114_v40  ;;  %v12555_v22 = vld [vmem:[#allocation239_spill] sm:$0xff] }
 0x406   :  { %v6781_v23 = vsel %vm6776_vm1, %v6764_v20, %v9563_v28  ;;  %v10685_v28 = vsel %vm6929_vm10, %v6913_v49, %v6456_v43  ;;  %v6881_v37 = vsel %vm6878_vm7, %v6864_v1, %v12553_v60  ;;  %v12556_v53 = vcombine.low %v12554_v19, %v12555_v22  ;;  %v12566_v20 = vld [vmem:[#allocation302_spill] sm:$0xff] }
 0x407   :  { %v6798_v63 = vsel %vm6793_vm2, %v6781_v23, %v9639_v8  ;;  %6605 = vrot.lane.b32.xlu1 %v4708_v62, %s7210_s23  ;;  %v12557_v8 = vld [vmem:[#allocation44_spill] sm:$0xff]  ;;  %v12560_v40 = vcombine.low %v12558_v51, %v12559_v57  ;;  %v12567_v23 = vld [vmem:[#allocation226_spill] sm:$0xff]  ;;  %v12572_v62 = vld [vmem:[#allocation45_spill] sm:$0xff] }
 0x408   :  { %v6815_v33 = vsel %vm6810_vm3, %v6798_v63, %v9740_v0  ;;  %6667 = vrot.lane.b32.xlu0 %v12556_v53, %s7211_s24  ;;  %v12562_v0 = vld [vmem:[#allocation98_spill] sm:$0xff] }
 0x409   :  { %v6766_v54 = vsel %vm6759_vm0, %v12560_v40, %v12557_v8  ;;  %v6832_v31 = vsel %vm6827_vm4, %v6815_v33, %v12561_v26  ;;  %v6898_v32 = vsel %vm6895_vm8, %v6881_v37, %v12562_v0  ;;  %v10711_v25 = vpop.permute.xlu1 %6397  ;;  %v6460_v4 = vpop.permute.xlu0 %6459  ;;  %v12568_v49 = vld [vmem:[#allocation14_spill] sm:$0xff]  ;;  %v12576_v37 = vld [vmem:[#allocation116_spill] sm:$0xff] }
 0x40a   :  { %v6783_v11 = vsel %vm6776_vm1, %v6766_v54, %v12563_v15  ;;  %v6849_v44 = vsel %vm6844_vm5, %v6832_v31, %v12564_v59  ;;  %v6915_v14 = vsel %vm6912_vm9, %v6898_v32, %v10530_v16  ;;  %v12569_v43 = vld [vmem:[#allocation270_spill] sm:$0xff]  ;;  %v12579_v54 = vld [vmem:[#allocation67_spill] sm:$0xff]  ;;  %v5796_v15 = vcombine.high %v10537_v2, %v10540_v27 }
 0x40b   :  { %v6800_v61 = vsel %vm6793_vm2, %v6783_v11, %v12565_v48  ;;  %v6866_v47 = vsel %vm6861_vm6, %v6849_v44, %v12566_v20  ;;  %v10720_v17 = vsel %vm6929_vm10, %v6915_v14, %v6460_v4  ;;  %6609 = vrot.lane.b32.xlu1 %v5252_v24, %s7210_s23  ;;  %v12571_v5 = vcombine.low %v12569_v43, %v12570_v45  ;;  %v12573_v63 = vld [vmem:[#allocation190_spill] sm:$0xff]  ;;  %v12580_v11 = vld [vmem:[#allocation145_spill] sm:$0xff]  ;;  %v12584_v20 = vld [vmem:[#allocation299_spill] sm:$0xff] }
 0x40c   :  { %v6817_v52 = vsel %vm6810_vm3, %v6800_v61, %v12567_v23  ;;  %v6883_v16 = vsel %vm6878_vm7, %v6866_v47, %v12568_v49  ;;  %v12574_v1 = vld [vmem:[#allocation194_spill] sm:$0xff]  ;;  %v12583_v61 = vld [vmem:[#allocation8_spill] sm:$0xff]  ;;  %v12585_v2 = vld [vmem:[#allocation303_spill] sm:$0xff] }
 0x40d   :  { %6671 = vrot.lane.b32.xlu0 %v12571_v5, %s7211_s24  ;;  %v12575_v33 = vcombine.low %v12573_v63, %v12574_v1  ;;  %v6834_v53 = vsel %vm6827_vm4, %v6817_v52, %v12576_v37  ;;  %v12577_v8 = vld [vmem:[#allocation134_spill] sm:$0xff]  ;;  %v10746_v0 = vpop.permute.xlu1 %6401  ;;  %v6464_v32 = vpop.permute.xlu0 %6463  ;;  %v12586_v27 = vcombine.low %v12584_v20, %v12585_v2  ;;  %v12589_v52 = vld [vmem:[#allocation237_spill] sm:$0xff]  ;;  %v12592_v63 = vld [vmem:[#allocation140_spill] sm:$0xff] }
 0x40e   :  { %v6900_v51 = vsel %vm6895_vm8, %v6883_v16, %v12577_v8  ;;  %v12578_v57 = vld [vmem:[#allocation18_spill] sm:$0xff]  ;;  %v6851_v26 = vsel %vm6844_vm5, %v6834_v53, %v12579_v54  ;;  %v12591_v5 = vld [vmem:[#allocation165_spill] sm:$0xff] }
 0x40f   :  { %v6768_v60 = vsel %vm6759_vm0, %v12575_v33, %v12572_v62  ;;  %v6917_v31 = vsel %vm6912_vm9, %v6900_v51, %v10546_v13  ;;  %v12581_v44 = vld [vmem:[#allocation46_spill] sm:$0xff]  ;;  %6613 = vrot.lane.b32.xlu1 %v5796_v15, %s7210_s23  ;;  %v12593_v33 = vld [vmem:[#allocation12_spill] sm:$0xff]  ;;  %v12594_v37 = vld [vmem:[#allocation109_spill] sm:$0xff] }
 0x410   :  { %v6785_v40 = vsel %vm6776_vm1, %v6768_v60, %v12578_v57  ;;  %v6868_v14 = vsel %vm6861_vm6, %v6851_v26, %v12581_v44  ;;  %v10755_v4 = vsel %vm6929_vm10, %v6917_v31, %v6464_v32  ;;  %v12582_v24 = vld [vmem:[#allocation38_spill] sm:$0xff]  ;;  %v12596_v26 = vld [vmem:[#allocation88_spill] sm:$0xff] }
 0x411   :  { %v6802_v59 = vsel %vm6793_vm2, %v6785_v40, %v12580_v11  ;;  %v6885_v13 = vsel %vm6878_vm7, %v6868_v14, %v12583_v61  ;;  %6675 = vrot.lane.b32.xlu0 %v12586_v27, %s7211_s24  ;;  %v12587_v47 = vld [vmem:[#allocation86_spill] sm:$0xff]  ;;  %v10781_v51 = vpop.permute.xlu1 %6405  ;;  %v6468_v57 = vpop.permute.xlu0 %6467  ;;  %v12595_v40 = vld [vmem:[#allocation139_spill] sm:$0xff]  ;;  %v12597_v15 = vld [vmem:[#allocation32_spill] sm:$0xff] }
 0x412   :  { %v6819_v48 = vsel %vm6810_vm3, %v6802_v59, %v12582_v24  ;;  %v12588_v23 = vld [vmem:[#allocation234_spill] sm:$0xff]  ;;  %v6902_v1 = vsel %vm6895_vm8, %v6885_v13, %v12592_v63  ;;  %v12600_v14 = vld [vmem:[#allocation49_spill] sm:$0xff]  ;;  %v12603_v61 = vld [vmem:[#allocation128_spill] sm:$0xff] }
 0x413   :  { %v12590_v49 = vcombine.low %v12588_v23, %v12589_v52  ;;  %v6836_v62 = vsel %vm6827_vm4, %v6819_v48, %v12591_v5  ;;  %v6919_v8 = vsel %vm6912_vm9, %v6902_v1, %v10556_v41  ;;  %v12598_v59 = vld [vmem:[#allocation286_spill] sm:$0xff]  ;;  %v12599_v41 = vld [vmem:[#allocation48_spill] sm:$0xff]  ;;  %v12602_v48 = vcombine.high %v12524_v35, %v12525_v29  ;;  %v12605_v27 = vld [vmem:[#allocation271_spill] sm:$0xff] }
 0x414   :  { %v6853_v53 = vsel %vm6844_vm5, %v6836_v62, %v12594_v37  ;;  %v10788_v32 = vsel %vm6929_vm10, %v6919_v8, %v6468_v57  ;;  %v12601_v24 = vcombine.low %v12599_v41, %v12600_v14  ;;  %v12604_v13 = vld [vmem:[#allocation268_spill] sm:$0xff]  ;;  %v12607_v52 = vld [vmem:[#allocation159_spill] sm:$0xff]  ;;  %v12612_v8 = vld [vmem:[#allocation130_spill] sm:$0xff] }
 0x415   :  { %v6770_v16 = vsel %vm6759_vm0, %v12590_v49, %v12587_v47  ;;  %v6870_v31 = vsel %vm6861_vm6, %v6853_v53, %v12596_v26  ;;  %6711 = vrot.lane.b32.xlu0 %v12602_v48, %s7212_s25  ;;  %v12606_v47 = vcombine.low %v12604_v13, %v12605_v27  ;;  %v12609_v62 = vld [vmem:[#allocation60_spill] sm:$0xff]  ;;  %v10817_v29 = vpop.permute.xlu1 %6409  ;;  %v12621_v27 = vld [vmem:[#allocation61_spill] sm:$0xff] }
 0x416   :  { %v6787_v60 = vsel %vm6776_vm1, %v6770_v16, %v12593_v33  ;;  %v6887_v44 = vsel %vm6878_vm7, %v6870_v31, %v12598_v59  ;;  %6649 = vrot.lane.b32.xlu1 %v12601_v24, %s7211_s24  ;;  %v12608_v16 = vld [vmem:[#allocation177_spill] sm:$0xff]  ;;  %v12610_v1 = vld [vmem:[#allocation152_spill] sm:$0xff]  ;;  %v12614_v31 = vld [vmem:[#allocation50_spill] sm:$0xff] }
 0x417   :  { %v6804_v54 = vsel %vm6793_vm2, %v6787_v60, %v12595_v40  ;;  %v6772_v23 = vsel %vm6759_vm0, %v12606_v47, %v12603_v61  ;;  %v6904_v5 = vsel %vm6895_vm8, %v6887_v44, %v12608_v16  ;;  %v6472_v60 = vpop.permute.xlu0 %6471  ;;  %v12611_v37 = vld [vmem:[#allocation188_spill] sm:$0xff]  ;;  %v12618_v44 = vcombine.high %v12528_v18, %v12529_v7  ;;  %v12619_v24 = vld [vmem:[#allocation209_spill] sm:$0xff]  ;;  %v12620_v61 = vld [vmem:[#allocation183_spill] sm:$0xff] }
 0x418   :  { %v6821_v11 = vsel %vm6810_vm3, %v6804_v54, %v12597_v15  ;;  %v6789_v63 = vsel %vm6776_vm1, %v6772_v23, %v12609_v62  ;;  %v6921_v35 = vsel %vm6912_vm9, %v6904_v5, %v10567_v3  ;;  %v12613_v54 = vld [vmem:[#allocation80_spill] sm:$0xff]  ;;  %v12615_v3 = vld [vmem:[#allocation90_spill] sm:$0xff]  ;;  %v12622_v47 = vld [vmem:[#allocation191_spill] sm:$0xff] }
 0x419   :  { %v6838_v49 = vsel %vm6827_vm4, %v6821_v11, %v12607_v52  ;;  %v6806_v53 = vsel %vm6793_vm2, %v6789_v63, %v12611_v37  ;;  %v10824_v40 = vsel %vm6929_vm10, %v6921_v35, %v6472_v60  ;;  %v12616_v11 = vld [vmem:[#allocation91_spill] sm:$0xff]  ;;  %6715 = vrot.lane.b32.xlu0 %v12618_v44, %s7212_s25  ;;  %v12625_v16 = vld [vmem:[#allocation198_spill] sm:$0xff]  ;;  %v10851_v18 = vpop.permute.xlu1 %6413  ;;  %v12628_v37 = vld [vmem:[#allocation81_spill] sm:$0xff] }
 0x41a   :  { %v6855_v33 = vsel %vm6844_vm5, %v6838_v49, %v12610_v1  ;;  %v6823_v26 = vsel %vm6810_vm3, %v6806_v53, %v12613_v54  ;;  %v12617_v59 = vcombine.low %v12615_v3, %v12616_v11  ;;  %v12623_v23 = vld [vmem:[#allocation195_spill] sm:$0xff]  ;;  %v12631_v54 = vld [vmem:[#allocation133_spill] sm:$0xff] }
 0x41b   :  { %v6872_v57 = vsel %vm6861_vm6, %v6855_v33, %v12612_v8  ;;  %v6840_v48 = vsel %vm6827_vm4, %v6823_v26, %v12619_v24  ;;  %v12624_v52 = vcombine.low %v12622_v47, %v12623_v23  ;;  %v6476_v7 = vpop.permute.xlu0 %6475  ;;  %v12626_v63 = vld [vmem:[#allocation187_spill] sm:$0xff]  ;;  %v12627_v33 = vld [vmem:[#allocation173_spill] sm:$0xff]  ;;  %v12629_v8 = vld [vmem:[#allocation56_spill] sm:$0xff] }
 0x41c   :  { %v6889_v15 = vsel %vm6878_vm7, %v6872_v57, %v12614_v31  ;;  %6653 = vrot.lane.b32.xlu1 %v12617_v59, %s7211_s24  ;;  %v6857_v5 = vsel %vm6844_vm5, %v6840_v48, %v12625_v16  ;;  %v12633_v31 = vcombine.high %v12535_v39, %v12536_v10  ;;  %v12635_v59 = vld [vmem:[#allocation41_spill] sm:$0xff]  ;;  %v12636_v44 = vld [vmem:[#allocation43_spill] sm:$0xff]  ;;  %v12640_v23 = vld [vmem:[#allocation54_spill] sm:$0xff] }
 0x41d   :  { %v6906_v13 = vsel %vm6895_vm8, %v6889_v15, %v12620_v61  ;;  %v6775_v49 = vsel %vm6759_vm0, %v12624_v52, %v12621_v27  ;;  %v6874_v35 = vsel %vm6861_vm6, %v6857_v5, %v12627_v33  ;;  %v12634_v15 = vld [vmem:[#allocation87_spill] sm:$0xff]  ;;  %v12637_v24 = vcombine.low %v12635_v59, %v12636_v44  ;;  %v12638_v61 = vld [vmem:[#allocation204_spill] sm:$0xff]  ;;  %v12639_v27 = vld [vmem:[#allocation221_spill] sm:$0xff]  ;;  %v10887_v10 = vpop.permute.xlu1 %6417 }
 0x41e   :  { %v6923_v62 = vsel %vm6912_vm9, %v6906_v13, %v10583_v46  ;;  %v6792_v1 = vsel %vm6776_vm1, %v6775_v49, %v12626_v63  ;;  %v6891_v57 = vsel %vm6878_vm7, %v6874_v35, %v12629_v8  ;;  %v12630_v46 = vld [vmem:[#allocation132_spill] sm:$0xff]  ;;  %6719 = vrot.lane.b32.xlu0 %v12633_v31, %s7212_s25  ;;  %v12644_v35 = vld [vmem:[#allocation74_spill] sm:$0xff]  ;;  %v12649_v31 = vcombine.high %v12541_v36, %v12542_v58  ;;  %v12651_v59 = vld [vmem:[#allocation83_spill] sm:$0xff] }
 0x41f   :  { %v10858_v60 = vsel %vm6929_vm10, %v6923_v62, %v6476_v7  ;;  %v6809_v53 = vsel %vm6793_vm2, %v6792_v1, %v12628_v37  ;;  %v12632_v26 = vcombine.low %v12630_v46, %v12631_v54  ;;  %v6761_v48 = vsel %vm6759_vm0, %v12637_v24, %v12634_v15  ;;  %v12641_v49 = vld [vmem:[#allocation196_spill] sm:$0xff]  ;;  %v6480_v5 = vpop.permute.xlu0 %6479  ;;  %v12642_v62 = vld [vmem:[#allocation182_spill] sm:$0xff]  ;;  %v12650_v15 = vld [vmem:[#allocation129_spill] sm:$0xff] }
 0x420   :  { %v6826_v13 = vsel %vm6810_vm3, %v6809_v53, %v12638_v61  ;;  %v6908_v47 = vsel %vm6895_vm8, %v6891_v57, %v12639_v27  ;;  %v6778_v52 = vsel %vm6776_vm1, %v6761_v48, %v12640_v23  ;;  %v12643_v63 = vld [vmem:[#allocation220_spill] sm:$0xff]  ;;  %v12645_v53 = vld [vmem:[#allocation94_spill] sm:$0xff]  ;;  %v12652_v44 = vld [vmem:[#allocation85_spill] sm:$0xff] }
 0x421   :  { %6657 = vrot.lane.b32.xlu1 %v12632_v26, %s7211_s24  ;;  %v6843_v16 = vsel %vm6827_vm4, %v6826_v13, %v12641_v49  ;;  %v6925_v39 = vsel %vm6912_vm9, %v6908_v47, %v10609_v12  ;;  %v6795_v7 = vsel %vm6793_vm2, %v6778_v52, %v12642_v62  ;;  %v12646_v12 = vld [vmem:[#allocation175_spill] sm:$0xff]  ;;  %v12647_v57 = vld [vmem:[#allocation176_spill] sm:$0xff]  ;;  %v12653_v24 = vcombine.low %v12651_v59, %v12652_v44  ;;  %v12655_v27 = vld [vmem:[#allocation229_spill] sm:$0xff]  ;;  %v6422_v58 = vpop.permute.xlu1 %6421 }
 0x422   :  { %v6860_v1 = vsel %vm6844_vm5, %v6843_v16, %v12643_v63  ;;  %v10894_v33 = vsel %vm6929_vm10, %v6925_v39, %v6480_v5  ;;  %v6812_v37 = vsel %vm6810_vm3, %v6795_v7, %v12644_v35  ;;  %v12648_v26 = vcombine.low %v12646_v12, %v12647_v57  ;;  %6723 = vrot.lane.b32.xlu0 %v12649_v31, %s7212_s25  ;;  %v12654_v61 = vld [vmem:[#allocation203_spill] sm:$0xff]  ;;  %v12657_v49 = vld [vmem:[#allocation240_spill] sm:$0xff]  ;;  %v12658_v5 = vld [vmem:[#allocation181_spill] sm:$0xff] }
 0x423   :  { %v6877_v8 = vsel %vm6861_vm6, %v6860_v1, %v12645_v53  ;;  %v6763_v48 = vsel %vm6759_vm0, %v12653_v24, %v12650_v15  ;;  %v6829_v13 = vsel %vm6827_vm4, %v6812_v37, %v12654_v61  ;;  %v12656_v23 = vld [vmem:[#allocation55_spill] sm:$0xff]  ;;  %v6484_v39 = vpop.permute.xlu0 %6483  ;;  %v12659_v7 = vld [vmem:[#allocation218_spill] sm:$0xff]  ;;  %v12665_v59 = vcombine.high %v12547_v21, %v12548_v38 }
 0x424   :  { %v6894_v47 = vsel %vm6878_vm7, %v6877_v8, %v12655_v27  ;;  %v6780_v52 = vsel %vm6776_vm1, %v6763_v48, %v12656_v23  ;;  %v6846_v16 = vsel %vm6844_vm5, %v6829_v13, %v12657_v49  ;;  %v10932_v35 = vsel %vm6929_vm10, %v10650_v34, %v6484_v39  ;;  %v12660_v37 = vld [vmem:[#allocation75_spill] sm:$0xff]  ;;  %v12661_v8 = vld [vmem:[#allocation92_spill] sm:$0xff]  ;;  %v12667_v34 = vld [vmem:[#allocation125_spill] sm:$0xff] }
 0x425   :  { %6661 = vrot.lane.b32.xlu1 %v12648_v26, %s7211_s24  ;;  %v6911_v36 = vsel %vm6895_vm8, %v6894_v47, %v10643_v55  ;;  %v6797_v62 = vsel %vm6793_vm2, %v6780_v52, %v12658_v5  ;;  %v6863_v63 = vsel %vm6861_vm6, %v6846_v16, %v12659_v7  ;;  %v12662_v26 = vld [vmem:[#allocation215_spill] sm:$0xff]  ;;  %v12670_v13 = vld [vmem:[#allocation246_spill] sm:$0xff]  ;;  %v6458_v16 = vpop.permute.xlu1 %6457  ;;  %v12674_v5 = vld [vmem:[#allocation256_spill] sm:$0xff] }
 0x426   :  { %v10928_v1 = vsel %vm6912_vm9, %v6911_v36, %v6422_v58  ;;  %v6814_v53 = vsel %vm6810_vm3, %v6797_v62, %v12660_v37  ;;  %v6880_v55 = vsel %vm6878_vm7, %v6863_v63, %v12661_v8  ;;  %v12663_v31 = vld [vmem:[#allocation219_spill] sm:$0xff]  ;;  %6727 = vrot.lane.b32.xlu0 %v12665_v59, %s7212_s25  ;;  %v12672_v49 = vld [vmem:[#allocation238_spill] sm:$0xff]  ;;  %v12673_v58 = vld [vmem:[#allocation232_spill] sm:$0xff]  ;;  %v12680_v59 = vcombine.high %v12554_v19, %v12555_v22 }
 0x427   :  { %v12664_v15 = vcombine.low %v12662_v26, %v12663_v31  ;;  %v12666_v44 = vld [vmem:[#allocation171_spill] sm:$0xff]  ;;  %v6831_v27 = vsel %vm6827_vm4, %v6814_v53, %v12670_v13  ;;  %v6897_v47 = vsel %vm6895_vm8, %v6880_v55, %v10516_v42  ;;  %v6520_v36 = vpop.permute.xlu0 %6519  ;;  %v12676_v53 = vld [vmem:[#allocation100_spill] sm:$0xff]  ;;  %v12677_v8 = vld [vmem:[#allocation257_spill] sm:$0xff] }
 0x428   :  { %v12668_v24 = vld [vmem:[#allocation127_spill] sm:$0xff]  ;;  %v6848_v21 = vsel %vm6844_vm5, %v6831_v27, %v12672_v49  ;;  %v6914_v38 = vsel %vm6912_vm9, %v6897_v47, %v10676_v56  ;;  %v10970_v42 = vsel %vm6946_vm11, %v10685_v28, %v6520_v36  ;;  %v12678_v55 = vld [vmem:[#allocation258_spill] sm:$0xff]  ;;  %v12689_v36 = vld [vmem:[#allocation16_spill] sm:$0xff] }
 0x429   :  { %6665 = vrot.lane.b32.xlu1 %v12664_v15, %s7211_s24  ;;  %v12669_v48 = vcombine.low %v12667_v34, %v12668_v24  ;;  %v12671_v23 = vld [vmem:[#allocation103_spill] sm:$0xff]  ;;  %v6865_v62 = vsel %vm6861_vm6, %v6848_v21, %v12674_v5  ;;  %v10966_v7 = vsel %vm6929_vm10, %v6914_v38, %v6458_v16  ;;  %v12679_v15 = vcombine.low %v12677_v8, %v12678_v55  ;;  %v12682_v34 = vld [vmem:[#allocation168_spill] sm:$0xff]  ;;  %v12683_v28 = vld [vmem:[#allocation170_spill] sm:$0xff]  ;;  %v6462_v22 = vpop.permute.xlu1 %6461 }
 0x42a   :  { %v12675_v63 = vld [vmem:[#allocation123_spill] sm:$0xff]  ;;  %v6882_v56 = vsel %vm6878_vm7, %v6865_v62, %v12676_v53  ;;  %6731 = vrot.lane.b32.xlu0 %v12680_v59, %s7212_s25  ;;  %v12684_v24 = vcombine.low %v12682_v34, %v12683_v28  ;;  %v12686_v47 = vld [vmem:[#allocation102_spill] sm:$0xff]  ;;  %v12690_v5 = vld [vmem:[#allocation117_spill] sm:$0xff] }
 0x42b   :  { %v6765_v61 = vsel %vm6759_vm0, %v12669_v48, %v12666_v44  ;;  %v12681_v44 = vld [vmem:[#allocation172_spill] sm:$0xff]  ;;  %v6899_v27 = vsel %vm6895_vm8, %v6882_v56, %v10528_v9  ;;  %v6524_v21 = vpop.permute.xlu0 %6523  ;;  %v12688_v38 = vld [vmem:[#allocation231_spill] sm:$0xff]  ;;  %v12696_v59 = vld [vmem:[#allocation217_spill] sm:$0xff] }
 0x42c   :  { %v6782_v52 = vsel %vm6776_vm1, %v6765_v61, %v12671_v23  ;;  %v6767_v48 = vsel %vm6759_vm0, %v12684_v24, %v12681_v44  ;;  %v12685_v61 = vld [vmem:[#allocation245_spill] sm:$0xff]  ;;  %v6916_v19 = vsel %vm6912_vm9, %v6899_v27, %v10711_v25  ;;  %v11008_v9 = vsel %vm6946_vm11, %v10720_v17, %v6524_v21  ;;  %v12693_v53 = vld [vmem:[#allocation287_spill] sm:$0xff]  ;;  %v12697_v44 = vld [vmem:[#allocation212_spill] sm:$0xff] }
 0x42d   :  { %v6799_v39 = vsel %vm6793_vm2, %v6782_v52, %v12673_v58  ;;  %6669 = vrot.lane.b32.xlu1 %v12679_v15, %s7211_s24  ;;  %v6784_v23 = vsel %vm6776_vm1, %v6767_v48, %v12686_v47  ;;  %v12687_v52 = vld [vmem:[#allocation304_spill] sm:$0xff]  ;;  %v12695_v15 = vcombine.high %v12569_v43, %v12570_v45  ;;  %v12702_v47 = vld [vmem:[#allocation47_spill] sm:$0xff]  ;;  %v6466_v45 = vpop.permute.xlu1 %6465 }
 0x42e   :  { %v6816_v37 = vsel %vm6810_vm3, %v6799_v39, %v12675_v63  ;;  %v6801_v16 = vsel %vm6793_vm2, %v6784_v23, %v12688_v38  ;;  %v11004_v39 = vsel %vm6929_vm10, %v6916_v19, %v6462_v22  ;;  %v12691_v63 = vld [vmem:[#allocation136_spill] sm:$0xff]  ;;  %v12704_v22 = vld [vmem:[#allocation10_spill] sm:$0xff] }
 0x42f   :  { %v6833_v13 = vsel %vm6827_vm4, %v6816_v37, %v12685_v61  ;;  %v6818_v62 = vsel %vm6810_vm3, %v6801_v16, %v12690_v5  ;;  %v12692_v37 = vld [vmem:[#allocation284_spill] sm:$0xff]  ;;  %6735 = vrot.lane.b32.xlu0 %v12695_v15, %s7212_s25  ;;  %v12705_v16 = vld [vmem:[#allocation166_spill] sm:$0xff]  ;;  %v12707_v5 = vld [vmem:[#allocation309_spill] sm:$0xff] }
 0x430   :  { %v6850_v49 = vsel %vm6844_vm5, %v6833_v13, %v12687_v52  ;;  %v12694_v56 = vcombine.low %v12692_v37, %v12693_v53  ;;  %v12698_v17 = vld [vmem:[#allocation216_spill] sm:$0xff]  ;;  %v6528_v52 = vpop.permute.xlu0 %6527 }
 0x431   :  { %v6867_v58 = vsel %vm6861_vm6, %v6850_v49, %v12689_v36  ;;  %v12699_v34 = vcombine.low %v12697_v44, %v12698_v17  ;;  %v12700_v24 = vld [vmem:[#allocation24_spill] sm:$0xff]  ;;  %v12703_v49 = vld [vmem:[#allocation225_spill] sm:$0xff]  ;;  %v12715_v17 = vld [vmem:[#allocation66_spill] sm:$0xff] }
 0x432   :  { %v6884_v25 = vsel %vm6878_vm7, %v6867_v58, %v12691_v63  ;;  %6673 = vrot.lane.b32.xlu1 %v12694_v56, %s7211_s24  ;;  %v6835_v48 = vsel %vm6827_vm4, %v6818_v62, %v12700_v24  ;;  %v12701_v13 = vld [vmem:[#allocation96_spill] sm:$0xff]  ;;  %v12706_v58 = vld [vmem:[#allocation142_spill] sm:$0xff]  ;;  %v12711_v56 = vld [vmem:[#allocation19_spill] sm:$0xff] }
 0x433   :  { %v6769_v28 = vsel %vm6759_vm0, %v12699_v34, %v12696_v59  ;;  %v6901_v61 = vsel %vm6895_vm8, %v6884_v25, %v10544_v6  ;;  %v6852_v23 = vsel %vm6844_vm5, %v6835_v48, %v12702_v47  ;;  %v11046_v6 = vsel %vm6946_vm11, %v10755_v4, %v6528_v52  ;;  %v12708_v62 = vld [vmem:[#allocation310_spill] sm:$0xff]  ;;  %v12712_v15 = vld [vmem:[#allocation252_spill] sm:$0xff]  ;;  %v12718_v47 = vld [vmem:[#allocation39_spill] sm:$0xff] }
 0x434   :  { %v6786_v27 = vsel %vm6776_vm1, %v6769_v28, %v12701_v13  ;;  %v6918_v43 = vsel %vm6912_vm9, %v6901_v61, %v10746_v0  ;;  %v6869_v21 = vsel %vm6861_vm6, %v6852_v23, %v12704_v22  ;;  %v12709_v63 = vcombine.low %v12707_v5, %v12708_v62  ;;  %v12713_v4 = vld [vmem:[#allocation254_spill] sm:$0xff]  ;;  %v12716_v24 = vld [vmem:[#allocation144_spill] sm:$0xff]  ;;  %v12717_v61 = vld [vmem:[#allocation89_spill] sm:$0xff] }
 0x435   :  { %v6803_v19 = vsel %vm6793_vm2, %v6786_v27, %v12703_v49  ;;  %v11042_v38 = vsel %vm6929_vm10, %v6918_v43, %v6466_v45  ;;  %v6886_v0 = vsel %vm6878_vm7, %v6869_v21, %v12706_v58  ;;  %v12710_v25 = vcombine.high %v12584_v20, %v12585_v2  ;;  %v6470_v2 = vpop.permute.xlu1 %6469  ;;  %v6532_v27 = vpop.permute.xlu0 %6531  ;;  %v12719_v43 = vld [vmem:[#allocation288_spill] sm:$0xff]  ;;  %v12721_v22 = vld [vmem:[#allocation179_spill] sm:$0xff]  ;;  %v12725_v58 = vld [vmem:[#allocation285_spill] sm:$0xff] }
 0x436   :  { %v6820_v36 = vsel %vm6810_vm3, %v6803_v19, %v12705_v16  ;;  %6677 = vrot.lane.b32.xlu1 %v12709_v63, %s7211_s24  ;;  %v12714_v59 = vcombine.low %v12712_v15, %v12713_v4  ;;  %v6903_v28 = vsel %vm6895_vm8, %v6886_v0, %v10554_v50  ;;  %v11082_v50 = vsel %vm6946_vm11, %v10788_v32, %v6532_v27  ;;  %v12720_v49 = vld [vmem:[#allocation160_spill] sm:$0xff]  ;;  %v12723_v16 = vld [vmem:[#allocation13_spill] sm:$0xff]  ;;  %v12729_v4 = vld [vmem:[#allocation138_spill] sm:$0xff] }
 0x437   :  { %6739 = vrot.lane.b32.xlu0 %v12710_v25, %s7212_s25  ;;  %v6837_v34 = vsel %vm6827_vm4, %v6820_v36, %v12715_v17  ;;  %v6920_v20 = vsel %vm6912_vm9, %v6903_v28, %v10781_v51  ;;  %v12722_v21 = vcombine.high %v12599_v41, %v12600_v14  ;;  %v12724_v36 = vld [vmem:[#allocation282_spill] sm:$0xff]  ;;  %v12727_v25 = vld [vmem:[#allocation108_spill] sm:$0xff]  ;;  %v12731_v28 = vld [vmem:[#allocation33_spill] sm:$0xff] }
 0x438   :  { %v6771_v44 = vsel %vm6759_vm0, %v12714_v59, %v12711_v56  ;;  %v6854_v13 = vsel %vm6844_vm5, %v6837_v34, %v12717_v61  ;;  %v6937_v52 = vsel %vm6929_vm10, %v6920_v20, %v6470_v2  ;;  %v12726_v0 = vcombine.low %v12724_v36, %v12725_v58  ;;  %v12728_v56 = vld [vmem:[#allocation227_spill] sm:$0xff]  ;;  %v12733_v2 = vld [vmem:[#allocation210_spill] sm:$0xff] }
 0x439   :  { %v6788_v48 = vsel %vm6776_vm1, %v6771_v44, %v12716_v24  ;;  %v6871_v45 = vsel %vm6861_vm6, %v6854_v13, %v12719_v43  ;;  %v12730_v44 = vld [vmem:[#allocation131_spill] sm:$0xff]  ;;  %v6474_v14 = vpop.permute.xlu1 %6473  ;;  %v6536_v34 = vpop.permute.xlu0 %6535  ;;  %v12739_v36 = vld [vmem:[#allocation58_spill] sm:$0xff] }
 0x43a   :  { %v6805_v23 = vsel %vm6793_vm2, %v6788_v48, %v12718_v47  ;;  %v6888_v51 = vsel %vm6878_vm7, %v6871_v45, %v12721_v22  ;;  %6713 = vrot.lane.b32.xlu1 %v12722_v21, %s7212_s25  ;;  %v6773_v63 = vsel %vm6759_vm0, %v12726_v0, %v12723_v16  ;;  %v12732_v48 = vld [vmem:[#allocation52_spill] sm:$0xff]  ;;  %v11114_v20 = vsel %vm6946_vm11, %v10824_v40, %v6536_v34  ;;  %v12734_v47 = vld [vmem:[#allocation185_spill] sm:$0xff]  ;;  %v12736_v43 = vld [vmem:[#allocation151_spill] sm:$0xff] }
 0x43b   :  { %v6822_v19 = vsel %vm6810_vm3, %v6805_v23, %v12720_v49  ;;  %v6905_v15 = vsel %vm6895_vm8, %v6888_v51, %v12728_v56  ;;  %v6790_v59 = vsel %vm6776_vm1, %v6773_v63, %v12729_v4  ;;  %v12735_v23 = vcombine.high %v12615_v3, %v12616_v11  ;;  %v12737_v49 = vld [vmem:[#allocation261_spill] sm:$0xff]  ;;  %v12738_v22 = vld [vmem:[#allocation174_spill] sm:$0xff]  ;;  %v12740_v0 = vld [vmem:[#allocation223_spill] sm:$0xff] }
 0x43c   :  { %v6839_v32 = vsel %vm6827_vm4, %v6822_v19, %v12727_v25  ;;  %v6922_v41 = vsel %vm6912_vm9, %v6905_v15, %v10817_v29  ;;  %v6807_v24 = vsel %vm6793_vm2, %v6790_v59, %v12731_v28  ;;  %v12741_v25 = vcombine.high %v12630_v46, %v12631_v54 }
 0x43d   :  { %v6856_v17 = vsel %vm6844_vm5, %v6839_v32, %v12730_v44  ;;  %v6939_v13 = vsel %vm6929_vm10, %v6922_v41, %v6474_v14  ;;  %v6824_v27 = vsel %vm6810_vm3, %v6807_v24, %v12733_v2  ;;  %v6478_v21 = vpop.permute.xlu1 %6477  ;;  %v6540_v16 = vpop.permute.xlu0 %6539  ;;  %v12742_v59 = vcombine.high %v12646_v12, %v12647_v57 }
 0x43e   :  { %v6873_v61 = vsel %vm6861_vm6, %v6856_v17, %v12732_v48  ;;  %6717 = vrot.lane.b32.xlu1 %v12735_v23, %s7212_s25  ;;  %v6841_v45 = vsel %vm6827_vm4, %v6824_v27, %v12736_v43  ;;  %v11137_v11 = vsel %vm6946_vm11, %v10858_v60, %v6540_v16  ;;  %v12743_v44 = vcombine.high %v12662_v26, %v12663_v31 }
 0x43f   :  { %v6890_v29 = vsel %vm6878_vm7, %v6873_v61, %v12734_v47  ;;  %v6858_v40 = vsel %vm6844_vm5, %v6841_v45, %v12738_v22  ;;  %v12744_v57 = vcombine.high %v12677_v8, %v12678_v55  ;;  %v12745_v26 = vcombine.high %v12692_v37, %v12693_v53 }
 0x440   :  { %v6907_v19 = vsel %vm6895_vm8, %v6890_v29, %v12737_v49  ;;  %v6875_v58 = vsel %vm6861_vm6, %v6858_v40, %v12739_v36  ;;  %v12746_v8 = vcombine.high %v12707_v5, %v12708_v62  ;;  %vm7095_vm0 = vcmask 523520  }
 0x441   :  { %v6924_v51 = vsel %vm6912_vm9, %v6907_v19, %v10851_v18  ;;  %v6892_v63 = vsel %vm6878_vm7, %v6875_v58, %v12740_v0  ;;  %v6482_v56 = vpop.permute.xlu1 %6481  ;;  %v6544_v15 = vpop.permute.xlu0 %6543 }
 0x442   :  { %v6941_v3 = vsel %vm6929_vm10, %v6924_v51, %v6478_v21  ;;  %6721 = vrot.lane.b32.xlu1 %v12741_v25, %s7212_s25  ;;  %v6909_v18 = vsel %vm6895_vm8, %v6892_v63, %v10607_v30  ;;  %v11152_v60 = vsel %vm6946_vm11, %v10894_v33, %v6544_v15 }
 0x443   :  { %v6926_v32 = vsel %vm6912_vm9, %v6909_v18, %v10887_v10 }
 0x444   :  { %v6943_v4 = vsel %vm6929_vm10, %v6926_v32, %v6482_v56 }
 0x445   :  { %v6486_v46 = vpop.permute.xlu1 %6485  ;;  %v6548_v54 = vpop.permute.xlu0 %6547 }
 0x446   :  { %6725 = vrot.lane.b32.xlu1 %v12742_v59, %s7212_s25  ;;  %v6945_v30 = vsel %vm6929_vm10, %v10928_v1, %v6486_v46  ;;  %v11162_v10 = vsel %vm6946_vm11, %v10932_v35, %v6548_v54 }
 0x449   :  { %v6522_v33 = vpop.permute.xlu1 %6521  ;;  %v6584_v17 = vpop.permute.xlu0 %6583 }
 0x44a   :  { %6729 = vrot.lane.b32.xlu1 %v12743_v44, %s7212_s25  ;;  %v11170_v12 = vsel %vm6946_vm11, %v10966_v7, %v6522_v33  ;;  %v6964_v0 = vsel %vm6963_vm12, %v10970_v42, %v6584_v17 }
 0x44d   :  { %v6526_v1 = vpop.permute.xlu1 %6525  ;;  %v6588_v41 = vpop.permute.xlu0 %6587 }
 0x44e   :  { %6733 = vrot.lane.b32.xlu1 %v12744_v57, %s7212_s25  ;;  %v11178_v35 = vsel %vm6946_vm11, %v11004_v39, %v6526_v1  ;;  %v6966_v56 = vsel %vm6963_vm12, %v11008_v9, %v6588_v41 }
 0x451   :  { %v6530_v31 = vpop.permute.xlu1 %6529  ;;  %v6592_v14 = vpop.permute.xlu0 %6591 }
 0x452   :  { %6737 = vrot.lane.b32.xlu1 %v12745_v26, %s7212_s25  ;;  %v11186_v7 = vsel %vm6946_vm11, %v11042_v38, %v6530_v31  ;;  %v6968_v46 = vsel %vm6963_vm12, %v11046_v6, %v6592_v14 }
 0x455   :  { %v6534_v55 = vpop.permute.xlu1 %6533  ;;  %v6596_v34 = vpop.permute.xlu0 %6595 }
 0x456   :  { %6741 = vrot.lane.b32.xlu1 %v12746_v8, %s7212_s25  ;;  %v11193_v39 = vsel %vm6946_vm11, %v6937_v52, %v6534_v55  ;;  %v6970_v9 = vsel %vm6963_vm12, %v11082_v50, %v6596_v34 }
 0x459   :  { %v6538_v28 = vpop.permute.xlu1 %6537  ;;  %v6600_v24 = vpop.permute.xlu0 %6599 }
 0x45a   :  { %v11196_v37 = vsel %vm6946_vm11, %v6939_v13, %v6538_v28  ;;  %v6972_v6 = vsel %vm6963_vm12, %v11114_v20, %v6600_v24 }
 0x45d   :  { %v6542_v53 = vpop.permute.xlu1 %6541  ;;  %v11198_v48 = vpop.permute.xlu0 %6603 }
 0x45e   :  { %v11201_v38 = vsel %vm6946_vm11, %v6941_v3, %v6542_v53  ;;  %v6974_v50 = vsel %vm6963_vm12, %v11137_v11, %v11198_v48 }
 0x461   :  { %v6546_v61 = vpop.permute.xlu1 %6545  ;;  %v11203_v2 = vpop.permute.xlu0 %6607 }
 0x462   :  { %v11206_v5 = vsel %vm6946_vm11, %v6943_v4, %v6546_v61  ;;  %v6976_v24 = vsel %vm6963_vm12, %v11152_v60, %v11203_v2 }
 0x465   :  { %v6550_v62 = vpop.permute.xlu1 %6549  ;;  %v11208_v52 = vpop.permute.xlu0 %6611 }
 0x466   :  { %v11211_v27 = vsel %vm6946_vm11, %v6945_v30, %v6550_v62  ;;  %v6978_v48 = vsel %vm6963_vm12, %v11162_v10, %v11208_v52 }
 0x469   :  { %v11213_v13 = vpop.permute.xlu1 %6585  ;;  %v6648_v47 = vpop.permute.xlu0 %6647 }
 0x46a   :  { %v6981_v63 = vsel %vm6980_vm13, %v6964_v0, %v6648_v47  ;;  %v6965_v2 = vsel %vm6963_vm12, %v11170_v12, %v11213_v13 }
 0x46d   :  { %v11215_v29 = vpop.permute.xlu1 %6589  ;;  %v6652_v23 = vpop.permute.xlu0 %6651 }
 0x46e   :  { %v6983_v15 = vsel %vm6980_vm13, %v6966_v56, %v6652_v23  ;;  %v6967_v10 = vsel %vm6963_vm12, %v11178_v35, %v11215_v29 }
 0x471   :  { %v11217_v43 = vpop.permute.xlu1 %6593  ;;  %v6656_v45 = vpop.permute.xlu0 %6655 }
 0x472   :  { %v6985_v54 = vsel %vm6980_vm13, %v6968_v46, %v6656_v45  ;;  %v6969_v12 = vsel %vm6963_vm12, %v11186_v7, %v11217_v43 }
 0x475   :  { %v11219_v49 = vpop.permute.xlu1 %6597  ;;  %v6660_v19 = vpop.permute.xlu0 %6659 }
 0x476   :  { %v6987_v17 = vsel %vm6980_vm13, %v6970_v9, %v6660_v19  ;;  %v6971_v35 = vsel %vm6963_vm12, %v11193_v39, %v11219_v49 }
 0x479   :  { %v11221_v22 = vpop.permute.xlu1 %6601  ;;  %v6664_v40 = vpop.permute.xlu0 %6663 }
 0x47a   :  { %v6989_v26 = vsel %vm6980_vm13, %v6972_v6, %v6664_v40  ;;  %v6973_v7 = vsel %vm6963_vm12, %v11196_v37, %v11221_v22 }
 0x47d   :  { %v11223_v51 = vpop.permute.xlu1 %6605  ;;  %v6668_v21 = vpop.permute.xlu0 %6667 }
 0x47e   :  { %v6991_v55 = vsel %vm6980_vm13, %v6974_v50, %v6668_v21  ;;  %v6975_v39 = vsel %vm6963_vm12, %v11201_v38, %v11223_v51 }
 0x481   :  { %v11225_v16 = vpop.permute.xlu1 %6609  ;;  %v6672_v36 = vpop.permute.xlu0 %6671 }
 0x482   :  { %v6993_v53 = vsel %vm6980_vm13, %v6976_v24, %v6672_v36  ;;  %v6977_v37 = vsel %vm6963_vm12, %v11206_v5, %v11225_v16 }
 0x485   :  { %v11227_v58 = vpop.permute.xlu1 %6613  ;;  %v6676_v3 = vpop.permute.xlu0 %6675 }
 0x486   :  { %v6995_v47 = vsel %vm6980_vm13, %v6978_v48, %v6676_v3  ;;  %v6979_v38 = vsel %vm6963_vm12, %v11211_v27, %v11227_v58 }
 0x489   :  { %v6650_v25 = vpop.permute.xlu1 %6649  ;;  %v6712_v18 = vpop.permute.xlu0 %6711 }
 0x48a   :  { %v6998_v32 = vsel %vm6997_vm14, %v6981_v63, %v6712_v18  ;;  %v6982_v19 = vsel %vm6980_vm13, %v6965_v2, %v6650_v25 }
 0x48b   :  { %7015 = vst.msk [vmem:[#allocation5] sm:$0xff] %vm7014_vm15, %v6998_v32  ;;  %7047 = vrot.lane.b32.xlu0 %v6998_v32, %s7213_s26 }
 0x48d   :  { %v6716_v59 = vpop.permute.xlu0 %6715 }
 0x48e   :  { %v6654_v4 = vpop.permute.xlu1 %6653  ;;  %v7000_v42 = vsel %vm6997_vm14, %v6983_v15, %v6716_v59 }
 0x48f   :  { %7017 = vst.msk [vmem:[#allocation5 + $0x10] sm:$0xff] %vm7014_vm15, %v7000_v42  ;;  %7051 = vrot.lane.b32.xlu0 %v7000_v42, %s7213_s26  ;;  %v6984_v52 = vsel %vm6980_vm13, %v6967_v10, %v6654_v4 }
 0x491   :  { %v6720_v44 = vpop.permute.xlu0 %6719 }
 0x492   :  { %v7002_v33 = vsel %vm6997_vm14, %v6985_v54, %v6720_v44 }
 0x493   :  { %v6658_v30 = vpop.permute.xlu1 %6657  ;;  %7019 = vst.msk [vmem:[#allocation5 + $0x20] sm:$0xff] %vm7014_vm15, %v7002_v33  ;;  %7055 = vrot.lane.b32.xlu0 %v7002_v33, %s7213_s26 }
 0x494   :  { %v6986_v13 = vsel %vm6980_vm13, %v6969_v12, %v6658_v30 }
 0x495   :  { %v6724_v1 = vpop.permute.xlu0 %6723 }
 0x496   :  { %v7004_v41 = vsel %vm6997_vm14, %v6987_v17, %v6724_v1 }
 0x497   :  { %v6662_v57 = vpop.permute.xlu1 %6661  ;;  %7021 = vst.msk [vmem:[#allocation5 + $0x30] sm:$0xff] %vm7014_vm15, %v7004_v41  ;;  %7059 = vrot.lane.b32.xlu0 %v7004_v41, %s7213_s26 }
 0x498   :  { %v6988_v29 = vsel %vm6980_vm13, %v6971_v35, %v6662_v57 }
 0x499   :  { %v6728_v14 = vpop.permute.xlu0 %6727 }
 0x49a   :  { %v7006_v8 = vsel %vm6997_vm14, %v6989_v26, %v6728_v14 }
 0x49b   :  { %v6666_v31 = vpop.permute.xlu1 %6665  ;;  %7023 = vst.msk [vmem:[#allocation5 + $0x40] sm:$0xff] %vm7014_vm15, %v7006_v8  ;;  %7063 = vrot.lane.b32.xlu0 %v7006_v8, %s7213_s26 }
 0x49c   :  { %v6990_v43 = vsel %vm6980_vm13, %v6973_v7, %v6666_v31 }
 0x49d   :  { %v6732_v28 = vpop.permute.xlu0 %6731 }
 0x49e   :  { %v7008_v20 = vsel %vm6997_vm14, %v6991_v55, %v6732_v28 }
 0x49f   :  { %v6670_v34 = vpop.permute.xlu1 %6669  ;;  %7025 = vst.msk [vmem:[#allocation5 + $0x50] sm:$0xff] %vm7014_vm15, %v7008_v20  ;;  %7067 = vrot.lane.b32.xlu0 %v7008_v20, %s7213_s26 }
 0x4a0   :  { %v6992_v49 = vsel %vm6980_vm13, %v6975_v39, %v6670_v34 }
 0x4a1   :  { %v6736_v62 = vpop.permute.xlu0 %6735 }
 0x4a2   :  { %v7010_v11 = vsel %vm6997_vm14, %v6993_v53, %v6736_v62 }
 0x4a3   :  { %7027 = vst.msk [vmem:[#allocation5 + $0x60] sm:$0xff] %vm7014_vm15, %v7010_v11  ;;  %7071 = vrot.lane.b32.xlu0 %v7010_v11, %s7213_s26 }
 0x4a4   :  { %v6674_v61 = vpop.permute.xlu1 %6673 }
 0x4a5   :  { %v6994_v22 = vsel %vm6980_vm13, %v6977_v37, %v6674_v61 }
 0x4a8   :  { %v6678_v23 = vpop.permute.xlu1 %6677 }
 0x4a9   :  { %v6740_v45 = vpop.permute.xlu0 %6739  ;;  %v6996_v51 = vsel %vm6980_vm13, %v6979_v38, %v6678_v23 }
 0x4aa   :  { %v7012_v60 = vsel %vm6997_vm14, %v6995_v47, %v6740_v45 }
 0x4ab   :  { %7029 = vst.msk [vmem:[#allocation5 + $0x70] sm:$0xff] %vm7014_vm15, %v7012_v60  ;;  %7075 = vrot.lane.b32.xlu0 %v7012_v60, %s7213_s26 }
 0x4ac   :  { %v6714_v40 = vpop.permute.xlu1 %6713 }
 0x4ad   :  { %v6999_v21 = vsel %vm6997_vm14, %v6982_v19, %v6714_v40 }
 0x4ae   :  { %7016 = vst.msk [vmem:[#allocation5 + $0x8] sm:$0xff] %vm7014_vm15, %v6999_v21  ;;  %7049 = vrot.lane.b32.xlu1 %v6999_v21, %s7213_s26 }
 0x4b0   :  { %v6718_v36 = vpop.permute.xlu1 %6717 }
 0x4b1   :  { %v7001_v3 = vsel %vm6997_vm14, %v6984_v52, %v6718_v36 }
 0x4b2   :  { %7018 = vst.msk [vmem:[#allocation5 + $0x18] sm:$0xff] %vm7014_vm15, %v7001_v3  ;;  %7053 = vrot.lane.b32.xlu1 %v7001_v3, %s7213_s26 }
 0x4b4   :  { %v6722_v0 = vpop.permute.xlu1 %6721 }
 0x4b5   :  { %v7003_v63 = vsel %vm6997_vm14, %v6986_v13, %v6722_v0 }
 0x4b6   :  { %7020 = vst.msk [vmem:[#allocation5 + $0x28] sm:$0xff] %vm7014_vm15, %v7003_v63  ;;  %7057 = vrot.lane.b32.xlu1 %v7003_v63, %s7213_s26 }
 0x4b8   :  { %v6726_v25 = vpop.permute.xlu1 %6725 }
 0x4b9   :  { %v7005_v18 = vsel %vm6997_vm14, %v6988_v29, %v6726_v25 }
 0x4ba   :  { %7022 = vst.msk [vmem:[#allocation5 + $0x38] sm:$0xff] %vm7014_vm15, %v7005_v18  ;;  %7061 = vrot.lane.b32.xlu1 %v7005_v18, %s7213_s26 }
 0x4bc   :  { %v6730_v32 = vpop.permute.xlu1 %6729 }
 0x4bd   :  { %v7007_v56 = vsel %vm6997_vm14, %v6990_v43, %v6730_v32 }
 0x4be   :  { %7024 = vst.msk [vmem:[#allocation5 + $0x48] sm:$0xff] %vm7014_vm15, %v7007_v56  ;;  %7065 = vrot.lane.b32.xlu1 %v7007_v56, %s7213_s26 }
 0x4c0   :  { %v6734_v15 = vpop.permute.xlu1 %6733 }
 0x4c1   :  { %v7009_v4 = vsel %vm6997_vm14, %v6992_v49, %v6734_v15 }
 0x4c2   :  { %7026 = vst.msk [vmem:[#allocation5 + $0x58] sm:$0xff] %vm7014_vm15, %v7009_v4  ;;  %7069 = vrot.lane.b32.xlu1 %v7009_v4, %s7213_s26 }
 0x4c4   :  { %v6738_v59 = vpop.permute.xlu1 %6737 }
 0x4c5   :  { %v7011_v42 = vsel %vm6997_vm14, %v6994_v22, %v6738_v59 }
 0x4c6   :  { %7028 = vst.msk [vmem:[#allocation5 + $0x68] sm:$0xff] %vm7014_vm15, %v7011_v42  ;;  %7073 = vrot.lane.b32.xlu1 %v7011_v42, %s7213_s26 }
 0x4c8   :  { %v6742_v46 = vpop.permute.xlu1 %6741 }
 0x4c9   :  { %v7013_v54 = vsel %vm6997_vm14, %v6996_v51, %v6742_v46 }
 0x4ca   :  { %7030 = vst.msk [vmem:[#allocation5 + $0x78] sm:$0xff] %vm7014_vm15, %v7013_v54  ;;  %7077 = vrot.lane.b32.xlu1 %v7013_v54, %s7213_s26 }
 0x4fd   :  { %v7048_v5 = vpop.permute.xlu0 %7047 }
 0x4fe   :  { %7096 = vst.msk [vmem:[#allocation5] sm:$0xff] %vm7095_vm0, %v7048_v5 }
 0x501   :  { %v7052_v16 = vpop.permute.xlu0 %7051 }
 0x502   :  { %7098 = vst.msk [vmem:[#allocation5 + $0x10] sm:$0xff] %vm7095_vm0, %v7052_v16 }
 0x505   :  { %v7056_v30 = vpop.permute.xlu0 %7055 }
 0x506   :  { %7100 = vst.msk [vmem:[#allocation5 + $0x20] sm:$0xff] %vm7095_vm0, %v7056_v30 }
 0x509   :  { %v7060_v27 = vpop.permute.xlu0 %7059 }
 0x50a   :  { %7102 = vst.msk [vmem:[#allocation5 + $0x30] sm:$0xff] %vm7095_vm0, %v7060_v27 }
 0x50d   :  { %v7064_v58 = vpop.permute.xlu0 %7063 }
 0x50e   :  { %7104 = vst.msk [vmem:[#allocation5 + $0x40] sm:$0xff] %vm7095_vm0, %v7064_v58 }
 0x511   :  { %v7068_v44 = vpop.permute.xlu0 %7067 }
 0x512   :  { %7106 = vst.msk [vmem:[#allocation5 + $0x50] sm:$0xff] %vm7095_vm0, %v7068_v44 }
 0x515   :  { %v7072_v33 = vpop.permute.xlu0 %7071 }
 0x516   :  { %7108 = vst.msk [vmem:[#allocation5 + $0x60] sm:$0xff] %vm7095_vm0, %v7072_v33 }
 0x51d   :  { %v7076_v9 = vpop.permute.xlu0 %7075 }
 0x51e   :  { %7110 = vst.msk [vmem:[#allocation5 + $0x70] sm:$0xff] %vm7095_vm0, %v7076_v9 }
 0x520   :  { %v7050_v17 = vpop.permute.xlu1 %7049 }
 0x521   :  { %7097 = vst.msk [vmem:[#allocation5 + $0x8] sm:$0xff] %vm7095_vm0, %v7050_v17 }
 0x524   :  { %v7054_v57 = vpop.permute.xlu1 %7053 }
 0x525   :  { %7099 = vst.msk [vmem:[#allocation5 + $0x18] sm:$0xff] %vm7095_vm0, %v7054_v57 }
 0x528   :  { %v7058_v1 = vpop.permute.xlu1 %7057 }
 0x529   :  { %7101 = vst.msk [vmem:[#allocation5 + $0x28] sm:$0xff] %vm7095_vm0, %v7058_v1 }
 0x52c   :  { %v7062_v41 = vpop.permute.xlu1 %7061 }
 0x52d   :  { %7103 = vst.msk [vmem:[#allocation5 + $0x38] sm:$0xff] %vm7095_vm0, %v7062_v41 }
 0x530   :  { %v7066_v6 = vpop.permute.xlu1 %7065 }
 0x531   :  { %7105 = vst.msk [vmem:[#allocation5 + $0x48] sm:$0xff] %vm7095_vm0, %v7066_v6 }
 0x534   :  { %v7070_v26 = vpop.permute.xlu1 %7069 }
 0x535   :  { %7107 = vst.msk [vmem:[#allocation5 + $0x58] sm:$0xff] %vm7095_vm0, %v7070_v26 }
 0x538   :  { %v7074_v31 = vpop.permute.xlu1 %7073 }
 0x539   :  { %7109 = vst.msk [vmem:[#allocation5 + $0x68] sm:$0xff] %vm7095_vm0, %v7074_v31 }
 0x53c   :  { %v7078_v14 = vpop.permute.xlu1 %7077 }
 0x53d   :  { %7111 = vst.msk [vmem:[#allocation5 + $0x78] sm:$0xff] %vm7095_vm0, %v7078_v14 }
 0x53e   :  { %7181 = shalt.err (!%p7178_p9)
}
 0x53f   :  { %7123 = dma.vmem_to_hbm [thread:$0]  %s7118_s28, 2048, %s11359_s1, [#allocation4], %s7195_s9, %s7195_s9, %s7196_s10  }
 0x540   :  { %7192 = dma.done.wait [#allocation4], 2048  }
 0x541   :  { %7193 = vsyncadd [#allocation4], 4294965248 }
 0x542   :  { %7127 = vsyncpa [#allocation3], 1 }
 0x543   :  { %7128 = vsyncpa [#allocation4], 1 }

</bundles_post_ra>
